<compile_context>
chip_gen: v6e
topology: v6e:2x2x1
jax: 0.10.0
libtpu: 0.0.40
codegen_flags: <defaults>
</compile_context>

<pallas_src>
import functools

import jax
import jax.numpy as jnp
from jax import lax
from jax.experimental import pallas as pl
from jax.experimental.pallas import tpu as pltpu


def _basic_conv_kernel(x_ref, w_ref, bias_ref, o_ref, xpad_ref, patch_ref, *,
                       H, W, Ho, Wo, KH, KW, pad, apply_relu):
    """One grid step = one batch tile.

    x_ref:     (B_TILE, Cin, H, W)       raw NCHW input tile (VMEM)
    w_ref:     (Cout, KH*KW*Cin)         BN-scale-folded weight, K ordered (kh, kw, ci)
    bias_ref:  (Cout, 1)                 folded BN bias
    o_ref:     (B_TILE, Cout, Ho*Wo)     lane-dense output tile (flattened NCHW)
    xpad_ref:  (Cin, H+2*pad, W+2*pad)   scratch: zero-padded image
    patch_ref: (KH*KW*Cin, Ho*Wo)        scratch: im2col patch matrix
    """
    b_tile = x_ref.shape[0]
    cin = x_ref.shape[1]

    # Zero the padded-image scratch once per step; the interior is overwritten
    # per image below, the halo border stays zero.
    xpad_ref[...] = jnp.zeros_like(xpad_ref)

    for b in range(b_tile):
        # In-kernel halo / zero padding (replaces a wrapper-side jnp.pad
        # HBM round trip).
        xpad_ref[:, pad:pad + H, pad:pad + W] = x_ref[b]

        # im2col: fill Cin contiguous rows per (kh, kw) tap.
        for kh in range(KH):
            for kw in range(KW):
                tap = kh * KW + kw
                sl = xpad_ref[:, kh:kh + Ho, kw:kw + Wo]          # (Cin, Ho, Wo)
                patch_ref[tap * cin:(tap + 1) * cin, :] = sl.reshape(cin, Ho * Wo)

        # Single MXU contraction -> lane-dense (Cout, Ho*Wo) result.
        acc = jnp.dot(w_ref[...], patch_ref[...],
                      preferred_element_type=jnp.float32)          # (Cout, Ho*Wo)

        # Fused (folded) BatchNorm bias + ReLU epilogue.
        y = acc + bias_ref[...]                                    # (Cout,1) bcast over lanes
        if apply_relu:
            y = jnp.maximum(y, 0.0)
        o_ref[b] = y.astype(o_ref.dtype)


def basic_conv_forward(x_nchw, weight_oihw, gamma, beta, running_mean, running_var,
                       *, stride=1, padding=0, dilation=1, groups=1,
                       relu=True, bn=True, conv_bias=None, eps=1e-5,
                       batch_tile=None):
    """BasicConv forward (eval-mode BN). x_nchw: (N, Cin, H, W) f32 -> (N, Cout, Ho, Wo)."""
    assert stride == 1 and dilation == 1 and groups == 1, \
        "kernel implements stride=1, dilation=1, groups=1"
    # TODO(synk): stride>1 / dilation>1 / groups>1 need a different patch-gather scheme.

    N, Cin, H, W = x_nchw.shape
    Cout, Cin_w, KH, KW = weight_oihw.shape
    assert Cin_w == Cin

    Ho = H + 2 * padding - KH + 1
    Wo = W + 2 * padding - KW + 1
    Hp, Wp = H + 2 * padding, W + 2 * padding

    # --- fold eval-mode BN (running stats) into conv weight + a bias vector ---
    if bn:
        inv_std = 1.0 / jnp.sqrt(running_var.astype(jnp.float32) + eps)
        scale = gamma.astype(jnp.float32) * inv_std                 # (Cout,)
        bias = beta.astype(jnp.float32) - running_mean.astype(jnp.float32) * scale
    else:
        scale = jnp.ones((Cout,), jnp.float32)
        bias = jnp.zeros((Cout,), jnp.float32)
    if conv_bias is not None:
        bias = bias + scale * conv_bias.astype(jnp.float32)

    # Weight: OIHW -> (Cout, KH*KW*Cin), contraction index ordered (kh, kw, ci)
    # so the kernel fills Cin contiguous im2col rows per tap. BN scale folded in.
    w2 = jnp.transpose(weight_oihw, (0, 2, 3, 1)).reshape(Cout, KH * KW * Cin)
    w2 = (w2 * scale[:, None]).astype(jnp.float32)
    bias2 = bias.reshape(Cout, 1).astype(jnp.float32)

    if batch_tile is None:
        batch_tile = min(N, 8)
    assert N % batch_tile == 0, "demo wrapper requires N % batch_tile == 0"

    kernel = functools.partial(_basic_conv_kernel, H=H, W=W, Ho=Ho, Wo=Wo,
                               KH=KH, KW=KW, pad=padding, apply_relu=relu)

    out_flat = pl.pallas_call(
        kernel,
        out_shape=jax.ShapeDtypeStruct((N, Cout, Ho * Wo), jnp.float32),
        grid_spec=pltpu.PrefetchScalarGridSpec(
            num_scalar_prefetch=0,
            grid=(N // batch_tile,),
            in_specs=[
                # Native NCHW input (W on lanes); trailing dims equal full array dims.
                pl.BlockSpec((batch_tile, Cin, H, W), lambda n: (n, 0, 0, 0)),
                # Small, grid-invariant operands (constant index_map -> stay resident).
                pl.BlockSpec((Cout, KH * KW * Cin), lambda n: (0, 0)),
                pl.BlockSpec((Cout, 1), lambda n: (0, 0)),
            ],
            out_specs=pl.BlockSpec((batch_tile, Cout, Ho * Wo), lambda n: (n, 0, 0)),
            scratch_shapes=[
                pltpu.VMEM((Cin, Hp, Wp), jnp.float32),              # padded image
                pltpu.VMEM((KH * KW * Cin, Ho * Wo), jnp.float32),   # im2col patches
            ],
        ),
        compiler_params=pltpu.CompilerParams(dimension_semantics=("parallel",)),
    )(x_nchw, w2, bias2)

    # Flattened-NCHW -> NCHW is a pure metadata reshape (no HBM transpose).
    return out_flat.reshape(N, Cout, Ho, Wo)


if __name__ == "__main__":
    key = jax.random.PRNGKey(0)
    k_x, k_w, k_g, k_b, k_m, k_v = jax.random.split(key, 6)

    N, Cin, H, W = 2, 4, 16, 16
    Cout, KH, KW = 8, 3, 3

    x = jax.random.normal(k_x, (N, Cin, H, W), dtype=jnp.float32)
    weight = jax.random.normal(k_w, (Cout, Cin, KH, KW), dtype=jnp.float32) * 0.1
    gamma = jax.random.normal(k_g, (Cout,), dtype=jnp.float32) * 0.1 + 1.0
    beta = jax.random.normal(k_b, (Cout,), dtype=jnp.float32) * 0.1
    running_mean = jax.random.normal(k_m, (Cout,), dtype=jnp.float32) * 0.1
    running_var = jnp.abs(jax.random.normal(k_v, (Cout,), dtype=jnp.float32)) * 0.1 + 1.0

    out = basic_conv_forward(x, weight, gamma, beta, running_mean, running_var,
                             stride=1, padding=1)
    jax.block_until_ready(out)

    # Reference: lax.conv + eval-mode BN + ReLU.
    ref = lax.conv_general_dilated(
        x, weight, window_strides=(1, 1), padding=((1, 1), (1, 1)),
        dimension_numbers=("NCHW", "OIHW", "NCHW"))
    inv_std = 1.0 / jnp.sqrt(running_var + 1e-5)
    ref = (ref - running_mean[None, :, None, None]) * (gamma * inv_std)[None, :, None, None] \
        + beta[None, :, None, None]
    ref = jnp.maximum(ref, 0.0)
    assert out.shape == (N, Cout, H, W)
    assert jnp.allclose(out, ref, atol=1e-4, rtol=1e-4)

    print("KERNEL_OK")
</pallas_src>

<mosaic_0001>
module attributes {stable_mosaic.version = 11 : i64} {
  func.func @_basic_conv_kernel(%arg0: i32, %arg1: memref<2x4x16x16xf32, #tpu.memory_space<vmem>>, %arg2: memref<8x36xf32, #tpu.memory_space<vmem>>, %arg3: memref<8x1xf32, #tpu.memory_space<vmem>>, %arg4: memref<2x8x256xf32, #tpu.memory_space<vmem>>, %arg5: memref<4x18x18xf32, #tpu.memory_space<vmem>>, %arg6: memref<36x256xf32, #tpu.memory_space<vmem>>) attributes {dimension_semantics = [#tpu.dimension_semantics<parallel>], iteration_bounds = array<i64: 1>, scalar_prefetch = 0 : i64, scratch_operands = 2 : i64, tpu.core_type = #tpu.core_type<tc>, window_params = [{transform_indices = @transform_0, window_bounds = array<i64: 2, 4, 16, 16>}, {pipeline_mode = #tpu.pipeline_mode<synchronous>, transform_indices = @transform_1, window_bounds = array<i64: 8, 36>}, {pipeline_mode = #tpu.pipeline_mode<synchronous>, transform_indices = @transform_2, window_bounds = array<i64: 8, 1>}, {transform_indices = @transform_3, window_bounds = array<i64: 2, 8, 256>}]} {
    %cst = arith.constant 0.000000e+00 : f32
    %0 = vector.broadcast %cst : f32 to vector<4x18x18xf32>
    %c0 = arith.constant 0 : index
    %c0_0 = arith.constant 0 : index
    %c0_1 = arith.constant 0 : index
    %1 = vector.load %arg5[%c0, %c0_0, %c0_1] : memref<4x18x18xf32, #tpu.memory_space<vmem>>, vector<4x18x18xf32>
    tpu.vector_store %arg5[%c0, %c0_0, %c0_1], %0 {strides = array<i32>} : memref<4x18x18xf32, #tpu.memory_space<vmem>>, vector<4x18x18xf32>,
    %c0_2 = arith.constant 0 : index
    %c0_3 = arith.constant 0 : index
    %c0_4 = arith.constant 0 : index
    %c0_5 = arith.constant 0 : index
    %2 = vector.load %arg1[%c0_2, %c0_3, %c0_4, %c0_5] : memref<2x4x16x16xf32, #tpu.memory_space<vmem>>, vector<1x4x16x16xf32>
    %3 = vector.shape_cast %2 : vector<1x4x16x16xf32> to vector<4x16x16xf32>
    %c0_6 = arith.constant 0 : index
    %c1 = arith.constant 1 : index
    %c1_7 = arith.constant 1 : index
    %4 = vector.load %arg5[%c0_6, %c1, %c1_7] : memref<4x18x18xf32, #tpu.memory_space<vmem>>, vector<4x16x16xf32>
    tpu.vector_store %arg5[%c0_6, %c1, %c1_7], %3 {strides = array<i32>} : memref<4x18x18xf32, #tpu.memory_space<vmem>>, vector<4x16x16xf32>,
    %c0_8 = arith.constant 0 : index
    %c0_9 = arith.constant 0 : index
    %c0_10 = arith.constant 0 : index
    %5 = vector.load %arg5[%c0_8, %c0_9, %c0_10] : memref<4x18x18xf32, #tpu.memory_space<vmem>>, vector<4x16x16xf32>
    %6 = vector.shape_cast %5 : vector<4x16x16xf32> to vector<4x256xf32>
    %c0_11 = arith.constant 0 : index
    %c0_12 = arith.constant 0 : index
    %7 = vector.load %arg6[%c0_11, %c0_12] : memref<36x256xf32, #tpu.memory_space<vmem>>, vector<4x256xf32>
    tpu.vector_store %arg6[%c0_11, %c0_12], %6 {strides = array<i32>} : memref<36x256xf32, #tpu.memory_space<vmem>>, vector<4x256xf32>,
    %c0_13 = arith.constant 0 : index
    %c0_14 = arith.constant 0 : index
    %c1_15 = arith.constant 1 : index
    %8 = vector.load %arg5[%c0_13, %c0_14, %c1_15] : memref<4x18x18xf32, #tpu.memory_space<vmem>>, vector<4x16x16xf32>
    %9 = vector.shape_cast %8 : vector<4x16x16xf32> to vector<4x256xf32>
    %c4 = arith.constant 4 : index
    %c0_16 = arith.constant 0 : index
    %10 = vector.load %arg6[%c4, %c0_16] : memref<36x256xf32, #tpu.memory_space<vmem>>, vector<4x256xf32>
    tpu.vector_store %arg6[%c4, %c0_16], %9 {strides = array<i32>} : memref<36x256xf32, #tpu.memory_space<vmem>>, vector<4x256xf32>,
    %c0_17 = arith.constant 0 : index
    %c0_18 = arith.constant 0 : index
    %c2 = arith.constant 2 : index
    %11 = vector.load %arg5[%c0_17, %c0_18, %c2] : memref<4x18x18xf32, #tpu.memory_space<vmem>>, vector<4x16x16xf32>
    %12 = vector.shape_cast %11 : vector<4x16x16xf32> to vector<4x256xf32>
    %c8 = arith.constant 8 : index
    %c0_19 = arith.constant 0 : index
    %13 = vector.load %arg6[%c8, %c0_19] : memref<36x256xf32, #tpu.memory_space<vmem>>, vector<4x256xf32>
    tpu.vector_store %arg6[%c8, %c0_19], %12 {strides = array<i32>} : memref<36x256xf32, #tpu.memory_space<vmem>>, vector<4x256xf32>,
    %c0_20 = arith.constant 0 : index
    %c1_21 = arith.constant 1 : index
    %c0_22 = arith.constant 0 : index
    %14 = vector.load %arg5[%c0_20, %c1_21, %c0_22] : memref<4x18x18xf32, #tpu.memory_space<vmem>>, vector<4x16x16xf32>
    %15 = vector.shape_cast %14 : vector<4x16x16xf32> to vector<4x256xf32>
    %c12 = arith.constant 12 : index
    %c0_23 = arith.constant 0 : index
    %16 = vector.load %arg6[%c12, %c0_23] : memref<36x256xf32, #tpu.memory_space<vmem>>, vector<4x256xf32>
    tpu.vector_store %arg6[%c12, %c0_23], %15 {strides = array<i32>} : memref<36x256xf32, #tpu.memory_space<vmem>>, vector<4x256xf32>,
    %c0_24 = arith.constant 0 : index
    %c1_25 = arith.constant 1 : index
    %c1_26 = arith.constant 1 : index
    %17 = vector.load %arg5[%c0_24, %c1_25, %c1_26] : memref<4x18x18xf32, #tpu.memory_space<vmem>>, vector<4x16x16xf32>
    %18 = vector.shape_cast %17 : vector<4x16x16xf32> to vector<4x256xf32>
    %c16 = arith.constant 16 : index
    %c0_27 = arith.constant 0 : index
    %19 = vector.load %arg6[%c16, %c0_27] : memref<36x256xf32, #tpu.memory_space<vmem>>, vector<4x256xf32>
    tpu.vector_store %arg6[%c16, %c0_27], %18 {strides = array<i32>} : memref<36x256xf32, #tpu.memory_space<vmem>>, vector<4x256xf32>,
    %c0_28 = arith.constant 0 : index
    %c1_29 = arith.constant 1 : index
    %c2_30 = arith.constant 2 : index
    %20 = vector.load %arg5[%c0_28, %c1_29, %c2_30] : memref<4x18x18xf32, #tpu.memory_space<vmem>>, vector<4x16x16xf32>
    %21 = vector.shape_cast %20 : vector<4x16x16xf32> to vector<4x256xf32>
    %c20 = arith.constant 20 : index
    %c0_31 = arith.constant 0 : index
    %22 = vector.load %arg6[%c20, %c0_31] : memref<36x256xf32, #tpu.memory_space<vmem>>, vector<4x256xf32>
    tpu.vector_store %arg6[%c20, %c0_31], %21 {strides = array<i32>} : memref<36x256xf32, #tpu.memory_space<vmem>>, vector<4x256xf32>,
    %c0_32 = arith.constant 0 : index
    %c2_33 = arith.constant 2 : index
    %c0_34 = arith.constant 0 : index
    %23 = vector.load %arg5[%c0_32, %c2_33, %c0_34] : memref<4x18x18xf32, #tpu.memory_space<vmem>>, vector<4x16x16xf32>
    %24 = vector.shape_cast %23 : vector<4x16x16xf32> to vector<4x256xf32>
    %c24 = arith.constant 24 : index
    %c0_35 = arith.constant 0 : index
    %25 = vector.load %arg6[%c24, %c0_35] : memref<36x256xf32, #tpu.memory_space<vmem>>, vector<4x256xf32>
    tpu.vector_store %arg6[%c24, %c0_35], %24 {strides = array<i32>} : memref<36x256xf32, #tpu.memory_space<vmem>>, vector<4x256xf32>,
    %c0_36 = arith.constant 0 : index
    %c2_37 = arith.constant 2 : index
    %c1_38 = arith.constant 1 : index
    %26 = vector.load %arg5[%c0_36, %c2_37, %c1_38] : memref<4x18x18xf32, #tpu.memory_space<vmem>>, vector<4x16x16xf32>
    %27 = vector.shape_cast %26 : vector<4x16x16xf32> to vector<4x256xf32>
    %c28 = arith.constant 28 : index
    %c0_39 = arith.constant 0 : index
    %28 = vector.load %arg6[%c28, %c0_39] : memref<36x256xf32, #tpu.memory_space<vmem>>, vector<4x256xf32>
    tpu.vector_store %arg6[%c28, %c0_39], %27 {strides = array<i32>} : memref<36x256xf32, #tpu.memory_space<vmem>>, vector<4x256xf32>,
    %c0_40 = arith.constant 0 : index
    %c2_41 = arith.constant 2 : index
    %c2_42 = arith.constant 2 : index
    %29 = vector.load %arg5[%c0_40, %c2_41, %c2_42] : memref<4x18x18xf32, #tpu.memory_space<vmem>>, vector<4x16x16xf32>
    %30 = vector.shape_cast %29 : vector<4x16x16xf32> to vector<4x256xf32>
    %c32 = arith.constant 32 : index
    %c0_43 = arith.constant 0 : index
    %31 = vector.load %arg6[%c32, %c0_43] : memref<36x256xf32, #tpu.memory_space<vmem>>, vector<4x256xf32>
    tpu.vector_store %arg6[%c32, %c0_43], %30 {strides = array<i32>} : memref<36x256xf32, #tpu.memory_space<vmem>>, vector<4x256xf32>,
    %c0_44 = arith.constant 0 : index
    %c0_45 = arith.constant 0 : index
    %32 = vector.load %arg2[%c0_44, %c0_45] : memref<8x36xf32, #tpu.memory_space<vmem>>, vector<8x36xf32>
    %c0_46 = arith.constant 0 : index
    %c0_47 = arith.constant 0 : index
    %33 = vector.load %arg6[%c0_46, %c0_47] : memref<36x256xf32, #tpu.memory_space<vmem>>, vector<36x256xf32>
    %cst_48 = arith.constant dense<0.000000e+00> : vector<8x256xf32>
    %34 = tpu.matmul %32, %33, %cst_48 {dimension_numbers = #tpu.dot_dimension_numbers<[1], [0], [0], [1], [0, 0, 1, 1], [], []>} : vector<8x36xf32>, vector<36x256xf32>, vector<8x256xf32> -> vector<8x256xf32>
    %c0_49 = arith.constant 0 : index
    %c0_50 = arith.constant 0 : index
    %35 = vector.load %arg3[%c0_49, %c0_50] : memref<8x1xf32, #tpu.memory_space<vmem>>, vector<8x1xf32>
    %36 = vector.broadcast %35 : vector<8x1xf32> to vector<8x256xf32>
    %37 = arith.addf %34, %36 : vector<8x256xf32>
    %cst_51 = arith.constant 0.000000e+00 : f32
    %38 = vector.broadcast %cst_51 : f32 to vector<8x256xf32>
    %39 = arith.maximumf %37, %38 : vector<8x256xf32>
    %c0_52 = arith.constant 0 : index
    %c0_53 = arith.constant 0 : index
    %c0_54 = arith.constant 0 : index
    %40 = vector.load %arg4[%c0_52, %c0_53, %c0_54] : memref<2x8x256xf32, #tpu.memory_space<vmem>>, vector<1x8x256xf32>
    %41 = vector.shape_cast %40 : vector<1x8x256xf32> to vector<8x256xf32>
    %42 = vector.shape_cast %39 : vector<8x256xf32> to vector<1x8x256xf32>
    tpu.vector_store %arg4[%c0_52, %c0_53, %c0_54], %42 {strides = array<i32>} : memref<2x8x256xf32, #tpu.memory_space<vmem>>, vector<1x8x256xf32>,
    %c1_55 = arith.constant 1 : index
    %c0_56 = arith.constant 0 : index
    %c0_57 = arith.constant 0 : index
    %c0_58 = arith.constant 0 : index
    %43 = vector.load %arg1[%c1_55, %c0_56, %c0_57, %c0_58] : memref<2x4x16x16xf32, #tpu.memory_space<vmem>>, vector<1x4x16x16xf32>
    %44 = vector.shape_cast %43 : vector<1x4x16x16xf32> to vector<4x16x16xf32>
    %c0_59 = arith.constant 0 : index
    %c1_60 = arith.constant 1 : index
    %c1_61 = arith.constant 1 : index
    %45 = vector.load %arg5[%c0_59, %c1_60, %c1_61] : memref<4x18x18xf32, #tpu.memory_space<vmem>>, vector<4x16x16xf32>
    tpu.vector_store %arg5[%c0_59, %c1_60, %c1_61], %44 {strides = array<i32>} : memref<4x18x18xf32, #tpu.memory_space<vmem>>, vector<4x16x16xf32>,
    %c0_62 = arith.constant 0 : index
    %c0_63 = arith.constant 0 : index
    %c0_64 = arith.constant 0 : index
    %46 = vector.load %arg5[%c0_62, %c0_63, %c0_64] : memref<4x18x18xf32, #tpu.memory_space<vmem>>, vector<4x16x16xf32>
    %47 = vector.shape_cast %46 : vector<4x16x16xf32> to vector<4x256xf32>
    %c0_65 = arith.constant 0 : index
    %c0_66 = arith.constant 0 : index
    %48 = vector.load %arg6[%c0_65, %c0_66] : memref<36x256xf32, #tpu.memory_space<vmem>>, vector<4x256xf32>
    tpu.vector_store %arg6[%c0_65, %c0_66], %47 {strides = array<i32>} : memref<36x256xf32, #tpu.memory_space<vmem>>, vector<4x256xf32>,
    %c0_67 = arith.constant 0 : index
    %c0_68 = arith.constant 0 : index
    %c1_69 = arith.constant 1 : index
    %49 = vector.load %arg5[%c0_67, %c0_68, %c1_69] : memref<4x18x18xf32, #tpu.memory_space<vmem>>, vector<4x16x16xf32>
    %50 = vector.shape_cast %49 : vector<4x16x16xf32> to vector<4x256xf32>
    %c4_70 = arith.constant 4 : index
    %c0_71 = arith.constant 0 : index
    %51 = vector.load %arg6[%c4_70, %c0_71] : memref<36x256xf32, #tpu.memory_space<vmem>>, vector<4x256xf32>
    tpu.vector_store %arg6[%c4_70, %c0_71], %50 {strides = array<i32>} : memref<36x256xf32, #tpu.memory_space<vmem>>, vector<4x256xf32>,
    %c0_72 = arith.constant 0 : index
    %c0_73 = arith.constant 0 : index
    %c2_74 = arith.constant 2 : index
    %52 = vector.load %arg5[%c0_72, %c0_73, %c2_74] : memref<4x18x18xf32, #tpu.memory_space<vmem>>, vector<4x16x16xf32>
    %53 = vector.shape_cast %52 : vector<4x16x16xf32> to vector<4x256xf32>
    %c8_75 = arith.constant 8 : index
    %c0_76 = arith.constant 0 : index
    %54 = vector.load %arg6[%c8_75, %c0_76] : memref<36x256xf32, #tpu.memory_space<vmem>>, vector<4x256xf32>
    tpu.vector_store %arg6[%c8_75, %c0_76], %53 {strides = array<i32>} : memref<36x256xf32, #tpu.memory_space<vmem>>, vector<4x256xf32>,
    %c0_77 = arith.constant 0 : index
    %c1_78 = arith.constant 1 : index
    %c0_79 = arith.constant 0 : index
    %55 = vector.load %arg5[%c0_77, %c1_78, %c0_79] : memref<4x18x18xf32, #tpu.memory_space<vmem>>, vector<4x16x16xf32>
    %56 = vector.shape_cast %55 : vector<4x16x16xf32> to vector<4x256xf32>
    %c12_80 = arith.constant 12 : index
    %c0_81 = arith.constant 0 : index
    %57 = vector.load %arg6[%c12_80, %c0_81] : memref<36x256xf32, #tpu.memory_space<vmem>>, vector<4x256xf32>
    tpu.vector_store %arg6[%c12_80, %c0_81], %56 {strides = array<i32>} : memref<36x256xf32, #tpu.memory_space<vmem>>, vector<4x256xf32>,
    %c0_82 = arith.constant 0 : index
    %c1_83 = arith.constant 1 : index
    %c1_84 = arith.constant 1 : index
    %58 = vector.load %arg5[%c0_82, %c1_83, %c1_84] : memref<4x18x18xf32, #tpu.memory_space<vmem>>, vector<4x16x16xf32>
    %59 = vector.shape_cast %58 : vector<4x16x16xf32> to vector<4x256xf32>
    %c16_85 = arith.constant 16 : index
    %c0_86 = arith.constant 0 : index
    %60 = vector.load %arg6[%c16_85, %c0_86] : memref<36x256xf32, #tpu.memory_space<vmem>>, vector<4x256xf32>
    tpu.vector_store %arg6[%c16_85, %c0_86], %59 {strides = array<i32>} : memref<36x256xf32, #tpu.memory_space<vmem>>, vector<4x256xf32>,
    %c0_87 = arith.constant 0 : index
    %c1_88 = arith.constant 1 : index
    %c2_89 = arith.constant 2 : index
    %61 = vector.load %arg5[%c0_87, %c1_88, %c2_89] : memref<4x18x18xf32, #tpu.memory_space<vmem>>, vector<4x16x16xf32>
    %62 = vector.shape_cast %61 : vector<4x16x16xf32> to vector<4x256xf32>
    %c20_90 = arith.constant 20 : index
    %c0_91 = arith.constant 0 : index
    %63 = vector.load %arg6[%c20_90, %c0_91] : memref<36x256xf32, #tpu.memory_space<vmem>>, vector<4x256xf32>
    tpu.vector_store %arg6[%c20_90, %c0_91], %62 {strides = array<i32>} : memref<36x256xf32, #tpu.memory_space<vmem>>, vector<4x256xf32>,
    %c0_92 = arith.constant 0 : index
    %c2_93 = arith.constant 2 : index
    %c0_94 = arith.constant 0 : index
    %64 = vector.load %arg5[%c0_92, %c2_93, %c0_94] : memref<4x18x18xf32, #tpu.memory_space<vmem>>, vector<4x16x16xf32>
    %65 = vector.shape_cast %64 : vector<4x16x16xf32> to vector<4x256xf32>
    %c24_95 = arith.constant 24 : index
    %c0_96 = arith.constant 0 : index
    %66 = vector.load %arg6[%c24_95, %c0_96] : memref<36x256xf32, #tpu.memory_space<vmem>>, vector<4x256xf32>
    tpu.vector_store %arg6[%c24_95, %c0_96], %65 {strides = array<i32>} : memref<36x256xf32, #tpu.memory_space<vmem>>, vector<4x256xf32>,
    %c0_97 = arith.constant 0 : index
    %c2_98 = arith.constant 2 : index
    %c1_99 = arith.constant 1 : index
    %67 = vector.load %arg5[%c0_97, %c2_98, %c1_99] : memref<4x18x18xf32, #tpu.memory_space<vmem>>, vector<4x16x16xf32>
    %68 = vector.shape_cast %67 : vector<4x16x16xf32> to vector<4x256xf32>
    %c28_100 = arith.constant 28 : index
    %c0_101 = arith.constant 0 : index
    %69 = vector.load %arg6[%c28_100, %c0_101] : memref<36x256xf32, #tpu.memory_space<vmem>>, vector<4x256xf32>
    tpu.vector_store %arg6[%c28_100, %c0_101], %68 {strides = array<i32>} : memref<36x256xf32, #tpu.memory_space<vmem>>, vector<4x256xf32>,
    %c0_102 = arith.constant 0 : index
    %c2_103 = arith.constant 2 : index
    %c2_104 = arith.constant 2 : index
    %70 = vector.load %arg5[%c0_102, %c2_103, %c2_104] : memref<4x18x18xf32, #tpu.memory_space<vmem>>, vector<4x16x16xf32>
    %71 = vector.shape_cast %70 : vector<4x16x16xf32> to vector<4x256xf32>
    %c32_105 = arith.constant 32 : index
    %c0_106 = arith.constant 0 : index
    %72 = vector.load %arg6[%c32_105, %c0_106] : memref<36x256xf32, #tpu.memory_space<vmem>>, vector<4x256xf32>
    tpu.vector_store %arg6[%c32_105, %c0_106], %71 {strides = array<i32>} : memref<36x256xf32, #tpu.memory_space<vmem>>, vector<4x256xf32>,
    %c0_107 = arith.constant 0 : index
    %c0_108 = arith.constant 0 : index
    %73 = vector.load %arg2[%c0_107, %c0_108] : memref<8x36xf32, #tpu.memory_space<vmem>>, vector<8x36xf32>
    %c0_109 = arith.constant 0 : index
    %c0_110 = arith.constant 0 : index
    %74 = vector.load %arg6[%c0_109, %c0_110] : memref<36x256xf32, #tpu.memory_space<vmem>>, vector<36x256xf32>
    %cst_111 = arith.constant dense<0.000000e+00> : vector<8x256xf32>
    %75 = tpu.matmul %73, %74, %cst_111 {dimension_numbers = #tpu.dot_dimension_numbers<[1], [0], [0], [1], [0, 0, 1, 1], [], []>} : vector<8x36xf32>, vector<36x256xf32>, vector<8x256xf32> -> vector<8x256xf32>
    %c0_112 = arith.constant 0 : index
    %c0_113 = arith.constant 0 : index
    %76 = vector.load %arg3[%c0_112, %c0_113] : memref<8x1xf32, #tpu.memory_space<vmem>>, vector<8x1xf32>
    %77 = vector.broadcast %76 : vector<8x1xf32> to vector<8x256xf32>
    %78 = arith.addf %75, %77 : vector<8x256xf32>
    %cst_114 = arith.constant 0.000000e+00 : f32
    %79 = vector.broadcast %cst_114 : f32 to vector<8x256xf32>
    %80 = arith.maximumf %78, %79 : vector<8x256xf32>
    %c1_115 = arith.constant 1 : index
    %c0_116 = arith.constant 0 : index
    %c0_117 = arith.constant 0 : index
    %81 = vector.load %arg4[%c1_115, %c0_116, %c0_117] : memref<2x8x256xf32, #tpu.memory_space<vmem>>, vector<1x8x256xf32>
    %82 = vector.shape_cast %81 : vector<1x8x256xf32> to vector<8x256xf32>
    %83 = vector.shape_cast %80 : vector<8x256xf32> to vector<1x8x256xf32>
    tpu.vector_store %arg4[%c1_115, %c0_116, %c0_117], %83 {strides = array<i32>} : memref<2x8x256xf32, #tpu.memory_space<vmem>>, vector<1x8x256xf32>,
    return
  }
  func.func @transform_0(%arg0: i32) -> (i32, i32, i32, i32) {
    %c0_i32 = arith.constant 0 : i32
    %c0_i32_0 = arith.constant 0 : i32
    %c0_i32_1 = arith.constant 0 : i32
    %c0_i32_2 = arith.constant 0 : i32
    return %arg0, %c0_i32, %c0_i32_0, %c0_i32_1 : i32, i32, i32, i32
  }
  func.func @transform_1(%arg0: i32) -> (i32, i32) {
    %c0_i32 = arith.constant 0 : i32
    %c0_i32_0 = arith.constant 0 : i32
    %c0_i32_1 = arith.constant 0 : i32
    return %c0_i32, %c0_i32_0 : i32, i32
  }
  func.func @transform_2(%arg0: i32) -> (i32, i32) {
    %c0_i32 = arith.constant 0 : i32
    %c0_i32_0 = arith.constant 0 : i32
    %c0_i32_1 = arith.constant 0 : i32
    return %c0_i32, %c0_i32_0 : i32, i32
  }
  func.func @transform_3(%arg0: i32) -> (i32, i32, i32) {
    %c0_i32 = arith.constant 0 : i32
    %c0_i32_0 = arith.constant 0 : i32
    %c0_i32_1 = arith.constant 0 : i32
    return %arg0, %c0_i32, %c0_i32_0 : i32, i32, i32
  }
}

</mosaic_0001>

<bundles_post_ra>
// kernel: tpu_custom_call.1
= control target key start
LH: loop header
LB: loop body
LE: loop exit
PB: predicated region body
PF: predicated region fallthrough
CT: control target
= control target key end

     0   :  { %8 = vsyncpa [#allocation5], 0  ;;  %s7411_s0 = inlined_call_operand.hbm [shape: f32[2,4,16,16], index: 0, kind: input, shape index: {}]   ;;  %s7412_s1 = inlined_call_operand.vmem [shape: f32[8,36], index: 1, kind: input, shape index: {}]   ;;  %s7413_s2 = inlined_call_operand.vmem [shape: f32[8,1], index: 2, kind: input, shape index: {}]   ;;  %s7414_s3 = inlined_call_operand.hbm [shape: f32[2,8,256], index: 3, kind: output, shape index: {}]  }
   0x1   :  { %9 = vsyncpa [#allocation6], 0  ;;  %s4812_s12 = smov [#allocation4]  }
   0x2   :  { %s15_s13 = sshll.u32 %s4812_s12, 4  ;;  %s16_s13 = int_to_ptr.vmem [resolvable:$true] %s15_s13 }
   0x3   :  { %s4776_s14 = scalar_lea.vmem %s16_s13, 2048  ;;  %p4781_p1 = scmp.lt.s32.totalorder %s16_s13, %s16_s13 }
   0x4   :  { %p4777_p0 = scmp.ne.s32.totalorder %s16_s13, %s4776_s14  ;;  %p4782_p2 = scmp.lt.s32.totalorder %s4776_s14, %s4776_s14 }
   0x6   :  { %p4783_p3 = por %p4782_p2, %p4781_p1 }
   0x8   :  { %p4784_p4 = pnand %p4783_p3, %p4777_p0 }
   0xa   :  { %4787 = shalt.err (!%p4784_p4)
}
   0xb   :  { %s4813_s15 = smov 128   ;;  %s4814_s16 = smov 8  }
   0xc   :  { %21 = dma.hbm_to_vmem [thread:$0]  %s7411_s0, 2048, %s16_s13, [#allocation5], %s4813_s15, %s4813_s15, %s4814_s16  }
   0xd   :  { %4808 = dma.done.wait [#allocation5], 2048  }
   0xe   :  { %4809 = vsyncadd [#allocation5], 4294965248  ;;  %vm29_vm0 = vcmask 146432   ;;  %v7415_v0 = vmov 0.0   ;;  %vm32_vm1 = vcmask 140288   ;;  %v45_v1 = vld [vmem:[#allocation4 + $0x10] sm:$0xff]  ;;  %v105_v34 = vlaneseq }
   0xf   :  { %34 = vst.msk [vmem:[#allocation2 + $0x18] sm:$0xff] %vm29_vm0, %v7415_v0  ;;  %35 = vst.msk [vmem:[#allocation2 + $0x20] sm:$0xff] %vm29_vm0, %v7415_v0  ;;  %2351 = vmatprep.mubr.f32.mxu0 %v7415_v0  ;;  %4661 = vmatprep.mubr.f32.mxu1 %v7415_v0  ;;  %v43_v2 = vld [vmem:[#allocation4] sm:$0xff]  ;;  %s4816_s0 = smov 1   ;;  %v46_v3 = vld [vmem:[#allocation4 + $0x18] sm:$0xff]  ;;  %vm83_vm2 = vcmask 138248  }
  0x10   :  { %30 = vst.msk [vmem:[#allocation2] sm:$0xff] %vm29_vm0, %v7415_v0  ;;  %31 = vst.msk [vmem:[#allocation2 + $0x8] sm:$0xff] %vm29_vm0, %v7415_v0  ;;  %63 = vrot.lane.b32.xlu1 %v45_v1, %s4816_s0  ;;  %59 = vrot.lane.b32.xlu0 %v43_v2, %s4816_s0  ;;  %v44_v4 = vld [vmem:[#allocation4 + $0x8] sm:$0xff]  ;;  %v47_v6 = vld [vmem:[#allocation4 + $0x20] sm:$0xff]  ;;  %s4817_s19 = smov 127   ;;  %s4818_s20 = smov 126  }
  0x11   :  { %37 = vst.msk [vmem:[#allocation2 + $0x30] sm:$0xff] %vm29_vm0, %v7415_v0  ;;  %38 = vst.msk [vmem:[#allocation2 + $0x38] sm:$0xff] %vm29_vm0, %v7415_v0  ;;  %v48_v5 = vld [vmem:[#allocation4 + $0x28] sm:$0xff]  ;;  %v50_v7 = vld [vmem:[#allocation4 + $0x38] sm:$0xff]  ;;  %v4819_v32 = vmov 1983009808  }
  0x12   :  { %40 = vst.msk [vmem:[#allocation2 + $0x48] sm:$0xff] %vm29_vm0, %v7415_v0  ;;  %41 = vst.msk [vmem:[#allocation2 + $0x50] sm:$0xff] %vm29_vm0, %v7415_v0  ;;  %v49_v8 = vld [vmem:[#allocation4 + $0x30] sm:$0xff]  ;;  %v103_v33 = vunpack.c.l.s4 %v4819_v32  ;;  %v106_v37 = vshrl.u32 %v105_v34, 7  ;;  %v4820_v38 = vmov 1934713408  }
  0x13   :  { %36 = vst.msk [vmem:[#allocation2 + $0x28] sm:$0x3] %vm32_vm1, %v7415_v0  ;;  %33 = vst.msk [vmem:[#allocation2 + $0x10] sm:$0x3] %vm32_vm1, %v7415_v0  ;;  %v135_v39 = vunpack.c.l.s4 %v4820_v38  ;;  %s4821_s21 = smov 32   ;;  %s4822_s22 = smov 64  }
  0x14   :  { %39 = vst.msk [vmem:[#allocation2 + $0x40] sm:$0x3] %vm32_vm1, %v7415_v0  ;;  %42 = vst.msk [vmem:[#allocation2 + $0x58] sm:$0x3] %vm32_vm1, %v7415_v0  ;;  %65 = vrot.lane.b32.xlu1 %v46_v3, %s4816_s0  ;;  %61 = vrot.lane.b32.xlu0 %v44_v4, %s4816_s0  ;;  %v104_v36 = vunpack.c.0.s8 %v103_v33  ;;  %s4823_s23 = smov 96   ;;  %s4824_s24 = smov 16  }
  0x15   :  { %v136_v43 = vunpack.c.0.s8 %v135_v39  ;;  %s4825_s25 = smov 48   ;;  %s4826_s26 = smov 80   ;;  %vm292_vm3 = vcmask 130048   ;;  %vm294_vm4 = vcmask 261120   ;;  %vm296_vm5 = vcmask 392192  }
  0x16   :  { %v4955_v41 = vsub.s32 %v104_v36, %v106_v37  ;;  %s4827_s27 = smov 112   ;;  %vm298_vm6 = vcmask 523264   ;;  %vm300_vm7 = vcmask 654336   ;;  %vm302_vm8 = vcmask 785408   ;;  %s4829_s8 = smov [#allocation7]  }
  0x17   :  { %v4973_v50 = vsub.s32 %v136_v43, %v106_v37  ;;  %vm304_vm9 = vcmask 916480   ;;  %vm2280_vm10 = vcmask 1043456   ;;  %vm2276_vm11 = vcmask 293888   ;;  %s4678_s9 = sshll.u32 %s4829_s8, 4  ;;  %s4679_s9 = int_to_ptr.vmem [resolvable:$true] %s4678_s9 }
  0x18   :  { %69 = vrot.lane.b32.xlu1 %v48_v5, %s4816_s0  ;;  %67 = vrot.lane.b32.xlu0 %v47_v6, %s4816_s0  ;;  %s4788_s10 = scalar_lea.vmem %s4679_s9, 512  ;;  %p4793_p6 = scmp.lt.s32.totalorder %s4679_s9, %s4679_s9 }
  0x19   :  { %p4789_p5 = scmp.ne.s32.totalorder %s4679_s9, %s4788_s10  ;;  %p4794_p7 = scmp.lt.s32.totalorder %s4788_s10, %s4788_s10 }
  0x1b   :  { %p4795_p8 = por %p4794_p7, %p4793_p6 }
  0x1c   :  { %73 = vrot.lane.b32.xlu1 %v50_v7, %s4816_s0  ;;  %71 = vrot.lane.b32.xlu0 %v49_v8, %s4816_s0 }
  0x1d   :  { %p4796_p9 = pnand %p4795_p8, %p4789_p5 }
  0x82   :  { %v64_v9 = vpop.permute.xlu1 %63  ;;  %v60_v10 = vpop.permute.xlu0 %59 }
  0x83   :  { %86 = vst.msk [vmem:[#allocation2 + $0x19] sm:$0xff] %vm83_vm2, %v64_v9  ;;  %84 = vst.msk [vmem:[#allocation2 + $0x1] sm:$0xff] %vm83_vm2, %v60_v10 }
  0x86   :  { %v66_v11 = vpop.permute.xlu1 %65  ;;  %v62_v12 = vpop.permute.xlu0 %61 }
  0x87   :  { %87 = vst.msk [vmem:[#allocation2 + $0x21] sm:$0xff] %vm83_vm2, %v66_v11  ;;  %85 = vst.msk [vmem:[#allocation2 + $0x9] sm:$0xff] %vm83_vm2, %v62_v12 }
  0x8a   :  { %v70_v13 = vpop.permute.xlu1 %69  ;;  %v68_v14 = vpop.permute.xlu0 %67  ;;  %v4880_v15 = vld [vmem:[#allocation2] sm:$0xff]  ;;  %v4886_v16 = vld [vmem:[#allocation2 + $0x18] sm:$0xff] }
  0x8b   :  { %89 = vst.msk [vmem:[#allocation2 + $0x39] sm:$0xff] %vm83_vm2, %v70_v13  ;;  %88 = vst.msk [vmem:[#allocation2 + $0x31] sm:$0xff] %vm83_vm2, %v68_v14  ;;  %331 = vrot.lane.b32.xlu0 %v4880_v15, %s4817_s19  ;;  %v4919_v25 = vld [vmem:[#allocation2 + $0x1] sm:$0xff]  ;;  %v4926_v27 = vld [vmem:[#allocation2 + $0x19] sm:$0xff] }
  0x8e   :  { %v74_v17 = vpop.permute.xlu1 %73  ;;  %v72_v18 = vpop.permute.xlu0 %71  ;;  %v4888_v19 = vld [vmem:[#allocation2 + $0x8] sm:$0xff]  ;;  %v318_v20 = vld [vmem:[#allocation2 + $0x20] sm:$0xff] }
  0x8f   :  { %91 = vst.msk [vmem:[#allocation2 + $0x51] sm:$0xff] %vm83_vm2, %v74_v17  ;;  %90 = vst.msk [vmem:[#allocation2 + $0x49] sm:$0xff] %vm83_vm2, %v72_v18  ;;  %333 = vrot.lane.b32.xlu1 %v4888_v19, %s4817_s19  ;;  %335 = vrot.lane.b32.xlu0 %v4886_v16, %s4817_s19  ;;  %v4924_v26 = vld [vmem:[#allocation2 + $0x9] sm:$0xff]  ;;  %v4932_v28 = vld [vmem:[#allocation2 + $0x21] sm:$0xff] }
  0x90   :  { %v5065_v37 = vld [vmem:[#allocation2 + $0x2] sm:$0xff] }
  0x92   :  { %v4896_v21 = vld [vmem:[#allocation2 + $0x30] sm:$0xff]  ;;  %v320_v22 = vld [vmem:[#allocation2 + $0x38] sm:$0xff] }
  0x93   :  { %337 = vrot.lane.b32.xlu1 %v318_v20, %s4817_s19  ;;  %339 = vrot.lane.b32.xlu0 %v4896_v21, %s4817_s19  ;;  %v4934_v29 = vld [vmem:[#allocation2 + $0x31] sm:$0xff]  ;;  %v4940_v30 = vld [vmem:[#allocation2 + $0x39] sm:$0xff]  ;;  %v168_v42 = vcombine.low %v4888_v19, %v320_v22  ;;  %v169_v48 = vcombine.high %v4888_v19, %v320_v22  ;;  %v100_v49 = vcombine.low %v4880_v15, %v4896_v21 }
  0x94   :  { %v101_v57 = vcombine.high %v4880_v15, %v4896_v21  ;;  %v893_v63 = vcombine.low %v4924_v26, %v4940_v30  ;;  %v894_v10 = vcombine.high %v4924_v26, %v4940_v30  ;;  %v825_v11 = vcombine.low %v4919_v25, %v4934_v29  ;;  %v5057_v32 = vld [vmem:[#allocation2 + $0x32] sm:$0xff] }
  0x95   :  { %v4968_v47 = vrot.slane %v168_v42, %v4955_v41  ;;  %v183_v55 = vrot.slane %v169_v48, %v4955_v41  ;;  %v108_v56 = vrot.slane %v100_v49, %v4955_v41  ;;  %7453 = vst [vmem:[#allocation11_spill] sm:$0xff] %v5057_v32  ;;  %v1549_v38 = vcombine.low %v5065_v37, %v5057_v32 }
  0x96   :  { %v4901_v23 = vld [vmem:[#allocation2 + $0x48] sm:$0xff]  ;;  %v322_v24 = vld [vmem:[#allocation2 + $0x50] sm:$0xff]  ;;  %v115_v1 = vrot.slane %v101_v57, %v4955_v41  ;;  %v5014_v9 = vrot.slane %v893_v63, %v4955_v41  ;;  %v1550_v49 = vcombine.high %v5065_v37, %v5057_v32 }
  0x97   :  { %341 = vrot.lane.b32.xlu1 %v320_v22, %s4817_s19  ;;  %343 = vrot.lane.b32.xlu0 %v4901_v23, %s4817_s19  ;;  %v4942_v31 = vld [vmem:[#allocation2 + $0x49] sm:$0xff]  ;;  %v1046_v35 = vld [vmem:[#allocation2 + $0x51] sm:$0xff]  ;;  %v184_v40 = vcombine.low %v318_v20, %v322_v24  ;;  %v185_v45 = vcombine.high %v318_v20, %v322_v24  ;;  %v116_v46 = vcombine.low %v4886_v16, %v4901_v23 }
  0x98   :  { %v117_v54 = vcombine.high %v4886_v16, %v4901_v23  ;;  %v909_v58 = vcombine.low %v4932_v28, %v1046_v35  ;;  %v910_v3 = vcombine.high %v4932_v28, %v1046_v35  ;;  %v841_v4 = vcombine.low %v4926_v27, %v4942_v31 }
  0x99   :  { %v4959_v44 = vrot.slane %v184_v40, %v4955_v41  ;;  %v199_v52 = vrot.slane %v185_v45, %v4955_v41  ;;  %v4979_v53 = vrot.slane %v116_v46, %v4955_v41  ;;  %v842_v18 = vcombine.high %v4926_v27, %v4942_v31 }
  0x9a   :  { %v131_v62 = vrot.slane %v117_v54, %v4955_v41  ;;  %v5004_v2 = vrot.slane %v909_v58, %v4955_v41  ;;  %v924_v13 = vrot.slane %v910_v3, %v4955_v41  ;;  %v5027_v14 = vrot.slane %v841_v4, %v4955_v41 }
  0x9b   :  { %345 = vrot.lane.b32.xlu1 %v322_v24, %s4817_s19  ;;  %585 = vrot.lane.b32.xlu0 %v4880_v15, %s4818_s20  ;;  %v201_v51 = vcombine.high %v4968_v47, %v4959_v44  ;;  %v216_v60 = vcombine.low %v183_v55, %v199_v52  ;;  %v133_v61 = vcombine.high %v108_v56, %v4979_v53 }
  0x9c   :  { %v217_v7 = vcombine.high %v183_v55, %v199_v52  ;;  %v148_v8 = vcombine.low %v115_v1, %v131_v62  ;;  %v926_v12 = vcombine.high %v5014_v9, %v5004_v2  ;;  %v149_v17 = vcombine.high %v115_v1, %v131_v62 }
  0x9d   :  { %v4993_v59 = vrot.slane %v201_v51, %v4973_v50  ;;  %v5010_v5 = vrot.slane %v216_v60, %v4973_v50  ;;  %v147_v6 = vrot.slane %v133_v61, %v4973_v50  ;;  %v1557_v48 = vrot.slane %v1549_v38, %v4955_v41 }
  0x9e   :  { %v5030_v15 = vrot.slane %v217_v7, %v4973_v50  ;;  %v5097_v55 = vrot.slane %v1550_v49, %v4955_v41  ;;  %v200_v60 = vcombine.low %v4968_v47, %v4959_v44 }
  0x9f   :  { %587 = vrot.lane.b32.xlu1 %v4888_v19, %s4818_s20  ;;  %589 = vrot.lane.b32.xlu0 %v4886_v16, %s4818_s20  ;;  %v156_v16 = vrot.slane %v148_v8, %v4973_v50  ;;  %v908_v19 = vrot.slane %v894_v10, %v4955_v41  ;;  %v165_v57 = vcombine.high %v147_v6, %v7415_v0 }
  0xa0   :  { %v5110_v63 = vrot.slane %v200_v60, %v4973_v50  ;;  %v233_v4 = vcombine.high %v4993_v59, %v7415_v0  ;;  %v234_v7 = vcombine.high %v5010_v5, %v7415_v0  ;;  %v925_v10 = vcombine.low %v5014_v9, %v5004_v2 }
  0xa1   :  { %v166_v62 = vcombine.high %v156_v16, %v7415_v0 }
  0xa2   :  { %v232_v44 = vcombine.high %v5110_v63, %v7415_v0 }
  0xa3   :  { %591 = vrot.lane.b32.xlu1 %v318_v20, %s4818_s20  ;;  %593 = vrot.lane.b32.xlu0 %v4896_v21, %s4818_s20  ;;  %v833_v20 = vrot.slane %v825_v11, %v4955_v41  ;;  %v826_v21 = vcombine.high %v4919_v25, %v4934_v29 }
  0xa5   :  { %v857_v1 = vcombine.low %v833_v20, %v5027_v14 }
  0xa7   :  { %595 = vrot.lane.b32.xlu1 %v320_v22, %s4818_s20  ;;  %597 = vrot.lane.b32.xlu0 %v4901_v23, %s4818_s20  ;;  %v941_v22 = vcombine.low %v908_v19, %v924_v13  ;;  %v5043_v23 = vrot.slane %v926_v12, %v4973_v50  ;;  %v5119_v3 = vrot.slane %v857_v1, %v4973_v50 }
  0xa8   :  { %v5140_v12 = vrot.slane %v925_v10, %v4973_v50 }
  0xa9   :  { %v5060_v33 = vrot.slane %v941_v22, %v4973_v50 }
  0xaa   :  { %v957_v2 = vcombine.high %v5140_v12, %v7415_v0 }
  0xab   :  { %599 = vrot.lane.b32.xlu1 %v322_v24, %s4818_s20  ;;  %1055 = vrot.lane.b32.xlu0 %v4919_v25, %s4817_s19  ;;  %v163_v24 = vrot.slane %v149_v17, %v4973_v50  ;;  %v958_v17 = vcombine.high %v5043_v23, %v7415_v0 }
  0xad   :  { %v167_v47 = vcombine.high %v163_v24, %v7415_v0 }
  0xaf   :  { %1057 = vrot.lane.b32.xlu1 %v4924_v26, %s4817_s19  ;;  %1059 = vrot.lane.b32.xlu0 %v4926_v27, %s4817_s19 }
  0xb3   :  { %1061 = vrot.lane.b32.xlu1 %v4932_v28, %s4817_s19  ;;  %1063 = vrot.lane.b32.xlu0 %v4934_v29, %s4817_s19 }
  0xb7   :  { %1065 = vrot.lane.b32.xlu1 %v4940_v30, %s4817_s19  ;;  %1067 = vrot.lane.b32.xlu0 %v4942_v31, %s4817_s19 }
  0xbb   :  { %1069 = vrot.lane.b32.xlu1 %v1046_v35, %s4817_s19  ;;  %1303 = vrot.lane.b32.xlu0 %v4919_v25, %s4818_s20  ;;  %v942_v25 = vcombine.high %v908_v19, %v924_v13 }
  0xbd   :  { %v5073_v39 = vrot.slane %v942_v25, %v4973_v50 }
  0xbf   :  { %1305 = vrot.lane.b32.xlu1 %v4924_v26, %s4818_s20  ;;  %1307 = vrot.lane.b32.xlu0 %v4926_v27, %s4818_s20  ;;  %v858_v26 = vcombine.high %v833_v20, %v5027_v14  ;;  %v856_v27 = vrot.slane %v842_v18, %v4955_v41 }
  0xc1   :  { %v872_v34 = vrot.slane %v858_v26, %v4973_v50 }
  0xc3   :  { %1309 = vrot.lane.b32.xlu1 %v4932_v28, %s4818_s20  ;;  %1311 = vrot.lane.b32.xlu0 %v4934_v29, %s4818_s20  ;;  %v5048_v28 = vld [vmem:[#allocation2 + $0x4a] sm:$0xff]  ;;  %v132_v29 = vcombine.low %v108_v56, %v4979_v53  ;;  %v890_v8 = vcombine.high %v872_v34, %v7415_v0 }
  0xc4   :  { %7452 = vst [vmem:[#allocation10_spill] sm:$0xff] %v5048_v28 }
  0xc5   :  { %v5076_v40 = vrot.slane %v132_v29, %v4973_v50 }
  0xc7   :  { %1313 = vrot.lane.b32.xlu1 %v4940_v30, %s4818_s20  ;;  %1315 = vrot.lane.b32.xlu0 %v4942_v31, %s4818_s20  ;;  %v840_v30 = vrot.slane %v826_v21, %v4955_v41  ;;  %v5055_v31 = vld [vmem:[#allocation2 + $0x1a] sm:$0xff]  ;;  %v164_v52 = vcombine.high %v5076_v40, %v7415_v0  ;;  %v959_v21 = vcombine.high %v5060_v33, %v7415_v0 }
  0xc8   :  { %v1565_v36 = vcombine.low %v5055_v31, %v5048_v28  ;;  %v1566_v46 = vcombine.high %v5055_v31, %v5048_v28 }
  0xc9   :  { %v874_v43 = vcombine.high %v840_v30, %v856_v27 }
  0xca   :  { %v1573_v45 = vrot.slane %v1565_v36, %v4955_v41  ;;  %v5092_v54 = vrot.slane %v1566_v46, %v4955_v41 }
  0xcb   :  { %1317 = vrot.lane.b32.xlu1 %v1046_v35, %s4818_s20  ;;  %269 = vrot.lane.b32.xlu0 %v4993_v59, %s4821_s21  ;;  %v873_v35 = vcombine.low %v840_v30, %v856_v27  ;;  %v888_v51 = vrot.slane %v874_v43, %v4973_v50  ;;  %v235_v59 = vcombine.high %v5030_v15, %v7415_v0 }
  0xcc   :  { %v1582_v53 = vcombine.high %v1557_v48, %v1573_v45  ;;  %v1597_v58 = vcombine.low %v5097_v55, %v5092_v54  ;;  %v1581_v13 = vcombine.low %v1557_v48, %v1573_v45  ;;  %v960_v27 = vcombine.high %v5073_v39, %v7415_v0 }
  0xcd   :  { %v881_v42 = vrot.slane %v873_v35, %v4973_v50  ;;  %v892_v9 = vcombine.high %v888_v51, %v7415_v0  ;;  %v1598_v25 = vcombine.high %v5097_v55, %v5092_v54 }
  0xce   :  { %v1596_v56 = vrot.slane %v1582_v53, %v4973_v50  ;;  %v1605_v61 = vrot.slane %v1597_v58, %v4973_v50  ;;  %v5148_v14 = vrot.slane %v1581_v13, %v4973_v50 }
  0xcf   :  { %277 = vrot.lane.b32.xlu0 %v5010_v5, %s4822_s22  ;;  %241 = vrot.lane.b32.xlu1 %v147_v6, %s4821_s21  ;;  %v889_v6 = vcombine.high %v5119_v3, %v7415_v0  ;;  %v891_v11 = vcombine.high %v881_v42, %v7415_v0  ;;  %v5178_v45 = vrot.slane %v1598_v25, %v4973_v50 }
  0xd0   :  { %7454 = vst [vmem:[#allocation12_spill] sm:$0xff] %v5148_v14  ;;  %v1613_v18 = vcombine.high %v5148_v14, %v7415_v0  ;;  %v1614_v22 = vcombine.high %v1596_v56, %v7415_v0  ;;  %v1615_v30 = vcombine.high %v1605_v61, %v7415_v0 }
  0xd3   :  { %285 = vrot.lane.b32.xlu0 %v5030_v15, %s4823_s23  ;;  %249 = vrot.lane.b32.xlu1 %v156_v16, %s4822_s22 }
  0xd7   :  { %994 = vrot.lane.b32.xlu0 %v5043_v23, %s4821_s21  ;;  %257 = vrot.lane.b32.xlu1 %v163_v24, %s4823_s23 }
  0xdb   :  { %1002 = vrot.lane.b32.xlu0 %v5060_v33, %s4822_s22  ;;  %966 = vrot.lane.b32.xlu1 %v872_v34, %s4821_s21 }
  0xdf   :  { %1010 = vrot.lane.b32.xlu0 %v5073_v39, %s4823_s23  ;;  %974 = vrot.lane.b32.xlu1 %v881_v42, %s4822_s22 }
  0xe3   :  { %982 = vrot.lane.b32.xlu1 %v888_v51, %s4823_s23  ;;  %237 = vrot.lane.b32.xlu0 %v164_v52, %s4824_s24 }
  0xe7   :  { %1690 = vrot.lane.b32.xlu1 %v1596_v56, %s4821_s21  ;;  %245 = vrot.lane.b32.xlu0 %v165_v57, %s4825_s25 }
  0xeb   :  { %1698 = vrot.lane.b32.xlu1 %v1605_v61, %s4822_s22  ;;  %253 = vrot.lane.b32.xlu0 %v166_v62, %s4826_s26 }
  0xef   :  { %265 = vrot.lane.b32.xlu1 %v232_v44, %s4824_s24  ;;  %261 = vrot.lane.b32.xlu0 %v167_v47, %s4827_s27 }
  0xf3   :  { %273 = vrot.lane.b32.xlu1 %v233_v4, %s4825_s25  ;;  %962 = vrot.lane.b32.xlu0 %v889_v6, %s4824_s24 }
  0xf7   :  { %281 = vrot.lane.b32.xlu1 %v234_v7, %s4826_s26  ;;  %970 = vrot.lane.b32.xlu0 %v890_v8, %s4825_s25 }
  0xfb   :  { %289 = vrot.lane.b32.xlu1 %v235_v59, %s4827_s27  ;;  %978 = vrot.lane.b32.xlu0 %v891_v11, %s4826_s26 }
  0xfd   :  { %v332_v5 = vpop.permute.xlu0 %331 }
  0xff   :  { %990 = vrot.lane.b32.xlu1 %v957_v2, %s4824_s24  ;;  %986 = vrot.lane.b32.xlu0 %v892_v9, %s4827_s27 }
 0x101   :  { %v334_v15 = vpop.permute.xlu1 %333  ;;  %v336_v16 = vpop.permute.xlu0 %335 }
 0x103   :  { %998 = vrot.lane.b32.xlu1 %v958_v17, %s4825_s25  ;;  %1686 = vrot.lane.b32.xlu0 %v1613_v18, %s4824_s24 }
 0x105   :  { %v338_v19 = vpop.permute.xlu1 %337  ;;  %v340_v20 = vpop.permute.xlu0 %339 }
 0x106   :  { %v355_v24 = vcombine.low %v332_v5, %v340_v20  ;;  %v356_v33 = vcombine.high %v332_v5, %v340_v20 }
 0x107   :  { %1006 = vrot.lane.b32.xlu1 %v959_v21, %s4826_s26  ;;  %1694 = vrot.lane.b32.xlu0 %v1614_v22, %s4825_s25 }
 0x108   :  { %v5171_v35 = vrot.slane %v355_v24, %v4955_v41  ;;  %v370_v52 = vrot.slane %v356_v33, %v4955_v41 }
 0x109   :  { %v342_v23 = vpop.permute.xlu1 %341  ;;  %v344_v26 = vpop.permute.xlu0 %343 }
 0x10a   :  { %v371_v29 = vcombine.low %v336_v16, %v344_v26  ;;  %v372_v34 = vcombine.high %v336_v16, %v344_v26  ;;  %v423_v36 = vcombine.low %v334_v15, %v342_v23  ;;  %v424_v46 = vcombine.high %v334_v15, %v342_v23 }
 0x10b   :  { %1014 = vrot.lane.b32.xlu1 %v960_v27, %s4827_s27  ;;  %1702 = vrot.lane.b32.xlu0 %v1615_v30, %s4826_s26 }
 0x10c   :  { %v5174_v38 = vrot.slane %v371_v29, %v4955_v41  ;;  %v386_v39 = vrot.slane %v372_v34, %v4955_v41  ;;  %v5186_v53 = vrot.slane %v423_v36, %v4955_v41  ;;  %v438_v61 = vrot.slane %v424_v46, %v4955_v41 }
 0x10d   :  { %v346_v42 = vpop.permute.xlu1 %345  ;;  %v586_v43 = vpop.permute.xlu0 %585 }
 0x10e   :  { %v439_v48 = vcombine.low %v338_v19, %v346_v42  ;;  %v440_v49 = vcombine.high %v338_v19, %v346_v42  ;;  %v388_v51 = vcombine.high %v5171_v35, %v5174_v38  ;;  %v403_v60 = vcombine.low %v370_v52, %v386_v39 }
 0x10f   :  { %1706 = vrot.lane.b32.xlu1 %v5178_v45, %s4823_s23  ;;  %v404_v7 = vcombine.high %v370_v52, %v386_v39 }
 0x110   :  { %v5189_v54 = vrot.slane %v439_v48, %v4955_v41  ;;  %v454_v55 = vrot.slane %v440_v49, %v4955_v41  ;;  %v5193_v56 = vrot.slane %v388_v51, %v4973_v50  ;;  %v5204_v6 = vrot.slane %v403_v60, %v4973_v50 }
 0x111   :  { %v588_v57 = vpop.permute.xlu1 %587  ;;  %v590_v58 = vpop.permute.xlu0 %589  ;;  %v5214_v5 = vrot.slane %v404_v7, %v4973_v50 }
 0x112   :  { %v456_v62 = vcombine.high %v5186_v53, %v5189_v54  ;;  %v471_v44 = vcombine.low %v438_v61, %v454_v55  ;;  %v472_v8 = vcombine.high %v438_v61, %v454_v55 }
 0x113   :  { %496 = vrot.lane.b32.xlu1 %v5193_v56, %s4821_s21 }
 0x114   :  { %v5201_v1 = vrot.slane %v456_v62, %v4973_v50  ;;  %v5211_v59 = vrot.slane %v471_v44, %v4973_v50  ;;  %v5221_v16 = vrot.slane %v472_v8, %v4973_v50 }
 0x115   :  { %v592_v47 = vpop.permute.xlu1 %591  ;;  %v594_v4 = vpop.permute.xlu0 %593 }
 0x116   :  { %524 = vrot.lane.b32.xlu0 %v5201_v1, %s4821_s21  ;;  %v609_v10 = vcombine.low %v586_v43, %v594_v4  ;;  %v610_v2 = vcombine.high %v586_v43, %v594_v4 }
 0x117   :  { %504 = vrot.lane.b32.xlu1 %v5204_v6, %s4822_s22 }
 0x118   :  { %v5224_v17 = vrot.slane %v609_v10, %v4955_v41  ;;  %v624_v24 = vrot.slane %v610_v2, %v4955_v41 }
 0x119   :  { %v596_v11 = vpop.permute.xlu1 %595  ;;  %v598_v13 = vpop.permute.xlu0 %597 }
 0x11a   :  { %v625_v9 = vcombine.low %v590_v58, %v598_v13  ;;  %v626_v15 = vcombine.high %v590_v58, %v598_v13  ;;  %532 = vrot.lane.b32.xlu0 %v5211_v59, %s4822_s22  ;;  %v677_v18 = vcombine.low %v588_v57, %v596_v11  ;;  %v678_v30 = vcombine.high %v588_v57, %v596_v11 }
 0x11b   :  { %512 = vrot.lane.b32.xlu1 %v5214_v5, %s4823_s23 }
 0x11c   :  { %v5227_v19 = vrot.slane %v625_v9, %v4955_v41  ;;  %v640_v20 = vrot.slane %v626_v15, %v4955_v41  ;;  %v5236_v25 = vrot.slane %v677_v18, %v4955_v41  ;;  %v692_v46 = vrot.slane %v678_v30, %v4955_v41 }
 0x11d   :  { %v600_v21 = vpop.permute.xlu1 %599  ;;  %v1056_v22 = vpop.permute.xlu0 %1055 }
 0x11e   :  { %v693_v23 = vcombine.low %v592_v47, %v600_v21  ;;  %v694_v26 = vcombine.high %v592_v47, %v600_v21  ;;  %540 = vrot.lane.b32.xlu0 %v5221_v16, %s4823_s23  ;;  %v642_v27 = vcombine.high %v5224_v17, %v5227_v19  ;;  %v657_v33 = vcombine.low %v624_v24, %v640_v20 }
 0x11f   :  { %v658_v51 = vcombine.high %v624_v24, %v640_v20 }
 0x120   :  { %v5239_v29 = vrot.slane %v693_v23, %v4955_v41  ;;  %v5242_v34 = vrot.slane %v642_v27, %v4973_v50  ;;  %v708_v36 = vrot.slane %v694_v26, %v4955_v41  ;;  %v5251_v48 = vrot.slane %v657_v33, %v4973_v50 }
 0x121   :  { %v1058_v39 = vpop.permute.xlu1 %1057  ;;  %v1060_v42 = vpop.permute.xlu0 %1059  ;;  %v5261_v60 = vrot.slane %v658_v51, %v4973_v50 }
 0x122   :  { %750 = vrot.lane.b32.xlu1 %v5242_v34, %s4821_s21  ;;  %v710_v43 = vcombine.high %v5236_v25, %v5239_v29  ;;  %v725_v57 = vcombine.low %v692_v46, %v708_v36  ;;  %v726_v47 = vcombine.high %v692_v46, %v708_v36 }
 0x124   :  { %v5254_v49 = vrot.slane %v710_v43, %v4973_v50  ;;  %v5264_v44 = vrot.slane %v725_v57, %v4973_v50  ;;  %v5278_v18 = vrot.slane %v726_v47, %v4973_v50 }
 0x125   :  { %v1062_v52 = vpop.permute.xlu1 %1061  ;;  %v1064_v55 = vpop.permute.xlu0 %1063 }
 0x126   :  { %758 = vrot.lane.b32.xlu1 %v5251_v48, %s4822_s22  ;;  %778 = vrot.lane.b32.xlu0 %v5254_v49, %s4821_s21  ;;  %v1079_v58 = vcombine.low %v1056_v22, %v1064_v55  ;;  %v1080_v4 = vcombine.high %v1056_v22, %v1064_v55 }
 0x128   :  { %v5271_v10 = vrot.slane %v1079_v58, %v4955_v41  ;;  %v1094_v20 = vrot.slane %v1080_v4, %v4955_v41 }
 0x129   :  { %v1066_v61 = vpop.permute.xlu1 %1065  ;;  %v1068_v62 = vpop.permute.xlu0 %1067 }
 0x12a   :  { %v1095_v7 = vcombine.low %v1060_v42, %v1068_v62  ;;  %v1096_v8 = vcombine.high %v1060_v42, %v1068_v62  ;;  %766 = vrot.lane.b32.xlu1 %v5261_v60, %s4823_s23  ;;  %786 = vrot.lane.b32.xlu0 %v5264_v44, %s4822_s22  ;;  %v1147_v11 = vcombine.low %v1058_v39, %v1066_v61 }
 0x12b   :  { %v1148_v23 = vcombine.high %v1058_v39, %v1066_v61 }
 0x12c   :  { %v5274_v13 = vrot.slane %v1095_v7, %v4955_v41  ;;  %v1110_v2 = vrot.slane %v1096_v8, %v4955_v41  ;;  %v5286_v26 = vrot.slane %v1147_v11, %v4955_v41 }
 0x12d   :  { %v1070_v9 = vpop.permute.xlu1 %1069  ;;  %v1304_v15 = vpop.permute.xlu0 %1303  ;;  %v1162_v46 = vrot.slane %v1148_v23, %v4955_v41 }
 0x12e   :  { %v1163_v21 = vcombine.low %v1062_v52, %v1070_v9  ;;  %v1164_v22 = vcombine.high %v1062_v52, %v1070_v9  ;;  %v1112_v24 = vcombine.high %v5271_v10, %v5274_v13  ;;  %794 = vrot.lane.b32.xlu0 %v5278_v18, %s4823_s23  ;;  %v1127_v33 = vcombine.low %v1094_v20, %v1110_v2 }
 0x12f   :  { %v1128_v55 = vcombine.high %v1094_v20, %v1110_v2 }
 0x130   :  { %v5289_v27 = vrot.slane %v1163_v21, %v4955_v41  ;;  %v5292_v30 = vrot.slane %v1112_v24, %v4973_v50  ;;  %v1178_v36 = vrot.slane %v1164_v22, %v4955_v41  ;;  %v5301_v51 = vrot.slane %v1127_v33, %v4973_v50 }
 0x131   :  { %v1306_v42 = vpop.permute.xlu1 %1305  ;;  %v1308_v43 = vpop.permute.xlu0 %1307  ;;  %v5311_v47 = vrot.slane %v1128_v55, %v4973_v50 }
 0x132   :  { %1220 = vrot.lane.b32.xlu1 %v5292_v30, %s4821_s21  ;;  %v1180_v39 = vcombine.high %v5286_v26, %v5289_v27  ;;  %v1195_v61 = vcombine.low %v1162_v46, %v1178_v36  ;;  %v1196_v2 = vcombine.high %v1162_v46, %v1178_v36 }
 0x134   :  { %v5304_v52 = vrot.slane %v1180_v39, %v4973_v50  ;;  %v5314_v11 = vrot.slane %v1195_v61, %v4973_v50 }
 0x135   :  { %v1310_v57 = vpop.permute.xlu1 %1309  ;;  %v1312_v58 = vpop.permute.xlu0 %1311 }
 0x136   :  { %1228 = vrot.lane.b32.xlu1 %v5301_v51, %s4822_s22  ;;  %1248 = vrot.lane.b32.xlu0 %v5304_v52, %s4821_s21  ;;  %v1327_v62 = vcombine.low %v1304_v15, %v1312_v58  ;;  %v1328_v4 = vcombine.high %v1304_v15, %v1312_v58 }
 0x138   :  { %v5321_v22 = vrot.slane %v1327_v62, %v4955_v41  ;;  %v1342_v23 = vrot.slane %v1328_v4, %v4955_v41 }
 0x139   :  { %v1314_v7 = vpop.permute.xlu1 %1313  ;;  %v1316_v8 = vpop.permute.xlu0 %1315 }
 0x13a   :  { %v1343_v9 = vcombine.low %v1308_v43, %v1316_v8  ;;  %v1344_v20 = vcombine.high %v1308_v43, %v1316_v8  ;;  %1236 = vrot.lane.b32.xlu1 %v5311_v47, %s4823_s23  ;;  %v1395_v21 = vcombine.low %v1306_v42, %v1314_v7  ;;  %1256 = vrot.lane.b32.xlu0 %v5314_v11, %s4822_s22 }
 0x13b   :  { %v5331_v43 = vrot.slane %v1196_v2, %v4973_v50  ;;  %v1396_v39 = vcombine.high %v1306_v42, %v1314_v7 }
 0x13c   :  { %v5324_v15 = vrot.slane %v1343_v9, %v4955_v41  ;;  %v1358_v24 = vrot.slane %v1344_v20, %v4955_v41  ;;  %v5336_v61 = vrot.slane %v1395_v21, %v4955_v41  ;;  %v455_v20 = vcombine.low %v5186_v53, %v5189_v54 }
 0x13d   :  { %v1318_v33 = vpop.permute.xlu1 %1317  ;;  %v5328_v36 = vpop.permute.xlu0 %269  ;;  %v1410_v2 = vrot.slane %v1396_v39, %v4955_v41  ;;  %v387_v53 = vcombine.low %v5171_v35, %v5174_v38  ;;  %v7456_v35 = vmov 0.0  }
 0x13e   :  { %v1411_v46 = vcombine.low %v1310_v57, %v1318_v33  ;;  %v1412_v55 = vcombine.high %v1310_v57, %v1318_v33  ;;  %v1360_v58 = vcombine.high %v5321_v22, %v5324_v15  ;;  %1264 = vrot.lane.b32.xlu0 %v5331_v43, %s4823_s23  ;;  %v1375_v42 = vcombine.low %v1342_v23, %v1358_v24 }
 0x140   :  { %v5341_v62 = vrot.slane %v1411_v46, %v4955_v41  ;;  %v1426_v4 = vrot.slane %v1412_v55, %v4955_v41  ;;  %v5345_v8 = vrot.slane %v1360_v58, %v4973_v50  ;;  %v5357_v21 = vrot.slane %v1375_v42, %v4973_v50 }
 0x141   :  { %v5347_v7 = vpop.permute.xlu0 %277  ;;  %v242_v57 = vpop.permute.xlu1 %241  ;;  %v1376_v46 = vcombine.high %v1342_v23, %v1358_v24  ;;  %v5377_v24 = vrot.slane %v455_v20, %v4973_v50 }
 0x142   :  { %1468 = vrot.lane.b32.xlu1 %v5345_v8, %s4821_s21  ;;  %v1428_v9 = vcombine.high %v5336_v61, %v5341_v62  ;;  %v1443_v55 = vcombine.low %v1410_v2, %v1426_v4  ;;  %v1444_v23 = vcombine.high %v1410_v2, %v1426_v4  ;;  %v488_v2 = vcombine.high %v5201_v1, %v7456_v35 }
 0x143   :  { %v5371_v54 = vrot.slane %v1376_v46, %v4973_v50  ;;  %7455 = vst [vmem:[#allocation13_spill] sm:$0xff] %v5377_v24  ;;  %v487_v38 = vcombine.high %v5377_v24, %v7456_v35  ;;  %v709_v1 = vcombine.low %v5236_v25, %v5239_v29 }
 0x144   :  { %v5360_v33 = vrot.slane %v1428_v9, %v4973_v50  ;;  %v5374_v42 = vrot.slane %v1443_v55, %v4973_v50  ;;  %v5388_v46 = vrot.slane %v1444_v23, %v4973_v50  ;;  %v5391_v55 = vrot.slane %v387_v53, %v4973_v50 }
 0x145   :  { %v5362_v58 = vpop.permute.xlu0 %285  ;;  %v250_v39 = vpop.permute.xlu1 %249  ;;  %v420_v53 = vcombine.high %v5193_v56, %v7456_v35  ;;  %v641_v56 = vcombine.low %v5224_v17, %v5227_v19  ;;  %v5429_v25 = vrot.slane %v709_v1, %v4973_v50 }
 0x146   :  { %1476 = vrot.lane.b32.xlu1 %v5357_v21, %s4822_s22  ;;  %1496 = vrot.lane.b32.xlu0 %v5360_v33, %s4821_s21  ;;  %7457 = vst [vmem:[#allocation14_spill] sm:$0xff] %v5391_v55  ;;  %v419_v14 = vcombine.high %v5391_v55, %v7456_v35 }
 0x147   :  { %v5442_v17 = vrot.slane %v641_v56, %v4973_v50 }
 0x149   :  { %v5379_v9 = vpop.permute.xlu0 %994  ;;  %v258_v0 = vpop.permute.xlu1 %257 }
 0x14a   :  { %1484 = vrot.lane.b32.xlu1 %v5371_v54, %s4823_s23  ;;  %1504 = vrot.lane.b32.xlu0 %v5374_v42, %s4822_s22 }
 0x14d   :  { %v5393_v20 = vpop.permute.xlu0 %1002  ;;  %v5395_v4 = vpop.permute.xlu1 %966 }
 0x14e   :  { %520 = vrot.lane.b32.xlu1 %v487_v38, %s4824_s24  ;;  %1512 = vrot.lane.b32.xlu0 %v5388_v46, %s4823_s23  ;;  %v489_v38 = vcombine.high %v5211_v59, %v7456_v35  ;;  %v490_v59 = vcombine.high %v5221_v16, %v7456_v35  ;;  %v741_v16 = vcombine.high %v5429_v25, %v7456_v35 }
 0x151   :  { %v5404_v23 = vpop.permute.xlu0 %1010  ;;  %v5406_v24 = vpop.permute.xlu1 %974 }
 0x152   :  { %528 = vrot.lane.b32.xlu1 %v488_v2, %s4825_s25  ;;  %492 = vrot.lane.b32.xlu0 %v419_v14, %s4824_s24  ;;  %v421_v14 = vcombine.high %v5204_v6, %v7456_v35  ;;  %v422_v6 = vcombine.high %v5214_v5, %v7456_v35  ;;  %v742_v5 = vcombine.high %v5254_v49, %v7456_v35 }
 0x153   :  { %v674_v49 = vcombine.high %v5242_v34, %v7456_v35  ;;  %v675_v34 = vcombine.high %v5251_v48, %v7456_v35 }
 0x155   :  { %v5416_v28 = vpop.permute.xlu1 %982  ;;  %v238_v55 = vpop.permute.xlu0 %237 }
 0x156   :  { %v293_v32 = vsel %vm292_vm3, %v5076_v40, %v238_v55  ;;  %536 = vrot.lane.b32.xlu1 %v489_v38, %s4826_s26  ;;  %500 = vrot.lane.b32.xlu0 %v420_v53, %s4825_s25  ;;  %v673_v38 = vcombine.high %v5442_v17, %v7456_v35 }
 0x157   :  { %v295_v40 = vsel %vm294_vm4, %v293_v32, %v242_v57 }
 0x159   :  { %v5431_v29 = vpop.permute.xlu1 %1690  ;;  %v246_v55 = vpop.permute.xlu0 %245 }
 0x15a   :  { %v297_v2 = vsel %vm296_vm5, %v295_v40, %v246_v55  ;;  %544 = vrot.lane.b32.xlu1 %v490_v59, %s4827_s27  ;;  %508 = vrot.lane.b32.xlu0 %v421_v14, %s4826_s26  ;;  %v743_v40 = vcombine.high %v5264_v44, %v7456_v35  ;;  %v1111_v44 = vcombine.low %v5271_v10, %v5274_v13 }
 0x15b   :  { %v299_v32 = vsel %vm298_vm6, %v297_v2, %v250_v39  ;;  %v676_v10 = vcombine.high %v5261_v60, %v7456_v35  ;;  %v1212_v60 = vcombine.high %v5304_v52, %v7456_v35  ;;  %v1144_v52 = vcombine.high %v5292_v30, %v7456_v35 }
 0x15c   :  { %v1145_v30 = vcombine.high %v5301_v51, %v7456_v35  ;;  %v5545_v51 = vld [vmem:[#allocation2 + $0x22] sm:$0xff] }
 0x15d   :  { %v5444_v19 = vpop.permute.xlu1 %1698  ;;  %v254_v57 = vpop.permute.xlu0 %253 }
 0x15e   :  { %v301_v53 = vsel %vm300_vm7, %v299_v32, %v254_v57  ;;  %774 = vrot.lane.b32.xlu1 %v741_v16, %s4824_s24  ;;  %516 = vrot.lane.b32.xlu0 %v422_v6, %s4827_s27 }
 0x15f   :  { %v303_v14 = vsel %vm302_vm8, %v301_v53, %v258_v0  ;;  %v1179_v0 = vcombine.low %v5286_v26, %v5289_v27  ;;  %v744_v26 = vcombine.high %v5278_v18, %v7456_v35  ;;  %v5495_v18 = vrot.slane %v1111_v44, %v4973_v50 }
 0x161   :  { %v266_v1 = vpop.permute.xlu1 %265  ;;  %v262_v56 = vpop.permute.xlu0 %261  ;;  %v5480_v27 = vrot.slane %v1179_v0, %v4973_v50  ;;  %v1213_v0 = vcombine.high %v5314_v11, %v7456_v35  ;;  %v1359_v11 = vcombine.low %v5321_v22, %v5324_v15  ;;  %v5547_v22 = vld [vmem:[#allocation2 + $0x3a] sm:$0xff]  ;;  %v1146_v15 = vcombine.high %v5311_v47, %v7456_v35 }
 0x162   :  { %v306_v39 = vsel %vm292_vm3, %v5110_v63, %v266_v1  ;;  %v305_v59 = vsel %vm304_vm9, %v303_v14, %v262_v56  ;;  %782 = vrot.lane.b32.xlu1 %v742_v5, %s4825_s25  ;;  %746 = vrot.lane.b32.xlu0 %v673_v38, %s4824_s24 }
 0x163   :  { %313 = vst [vmem:[#allocation3 + $0x30] sm:$0xf] %v305_v59  ;;  %v307_v55 = vsel %vm294_vm4, %v306_v39, %v5328_v36  ;;  %v1211_v13 = vcombine.high %v5480_v27, %v7456_v35 }
 0x165   :  { %v274_v63 = vpop.permute.xlu1 %273  ;;  %v963_v2 = vpop.permute.xlu0 %962 }
 0x166   :  { %v308_v6 = vsel %vm296_vm5, %v307_v55, %v274_v63  ;;  %v1017_v16 = vsel %vm292_vm3, %v5119_v3, %v963_v2  ;;  %790 = vrot.lane.b32.xlu1 %v743_v40, %s4826_s26  ;;  %754 = vrot.lane.b32.xlu0 %v674_v49, %s4825_s25 }
 0x167   :  { %v309_v36 = vsel %vm298_vm6, %v308_v6, %v5347_v7  ;;  %v1018_v32 = vsel %vm294_vm4, %v1017_v16, %v5395_v4  ;;  %v5540_v16 = vld [vmem:[#allocation2 + $0x52] sm:$0xff] }
 0x168   :  { %v1633_v44 = vcombine.low %v5545_v51, %v5540_v16 }
 0x169   :  { %v282_v3 = vpop.permute.xlu1 %281  ;;  %v971_v57 = vpop.permute.xlu0 %970 }
 0x16a   :  { %v310_v53 = vsel %vm300_vm7, %v309_v36, %v282_v3  ;;  %v1019_v48 = vsel %vm296_vm5, %v1018_v32, %v971_v57  ;;  %798 = vrot.lane.b32.xlu1 %v744_v26, %s4827_s27  ;;  %762 = vrot.lane.b32.xlu0 %v675_v34, %s4826_s26  ;;  %v5560_v3 = vld [vmem:[#allocation2 + $0xa] sm:$0xff] }
 0x16b   :  { %v311_v7 = vsel %vm302_vm8, %v310_v53, %v5362_v58  ;;  %v1020_v5 = vsel %vm298_vm6, %v1019_v48, %v5406_v24  ;;  %v1143_v58 = vcombine.high %v5495_v18, %v7456_v35  ;;  %v1617_v47 = vcombine.low %v5560_v3, %v5547_v22 }
 0x16c   :  { %v1460_v48 = vcombine.high %v5360_v33, %v7456_v35  ;;  %v1392_v33 = vcombine.high %v5345_v8, %v7456_v35  ;;  %v1393_v8 = vcombine.high %v5357_v21, %v7456_v35 }
 0x16d   :  { %v290_v4 = vpop.permute.xlu1 %289  ;;  %v979_v38 = vpop.permute.xlu0 %978 }
 0x16e   :  { %v312_v1 = vsel %vm304_vm9, %v311_v7, %v290_v4  ;;  %v1021_v14 = vsel %vm300_vm7, %v1020_v5, %v979_v38  ;;  %1244 = vrot.lane.b32.xlu1 %v1211_v13, %s4824_s24  ;;  %770 = vrot.lane.b32.xlu0 %v676_v10, %s4827_s27  ;;  %v1641_v10 = vrot.slane %v1633_v44, %v4955_v41 }
 0x16f   :  { %314 = vst [vmem:[#allocation3] sm:$0xf] %v312_v1  ;;  %v1022_v24 = vsel %vm302_vm8, %v1021_v14, %v5416_v28  ;;  %v1427_v28 = vcombine.low %v5336_v61, %v5341_v62  ;;  %v1214_v61 = vcombine.high %v5331_v43, %v7456_v35  ;;  %v1625_v7 = vrot.slane %v1617_v47, %v4955_v41  ;;  %v7458_v47 = vld [vmem:[#allocation11_spill] sm:$0xff] }
 0x170   :  { %v1634_v4 = vcombine.high %v5545_v51, %v5540_v16  ;;  %v1461_v5 = vcombine.high %v5374_v42, %v7456_v35  ;;  %v1462_v42 = vcombine.high %v5388_v46, %v7456_v35 }
 0x171   :  { %v991_v56 = vpop.permute.xlu1 %990  ;;  %v987_v39 = vpop.permute.xlu0 %986  ;;  %v1649_v1 = vcombine.low %v1625_v7, %v1641_v10 }
 0x172   :  { %v1024_v59 = vsel %vm292_vm3, %v5140_v12, %v991_v56  ;;  %v1023_v49 = vsel %vm304_vm9, %v1022_v24, %v987_v39  ;;  %1252 = vrot.lane.b32.xlu1 %v1212_v60, %s4825_s25  ;;  %1216 = vrot.lane.b32.xlu0 %v1143_v58, %s4824_s24  ;;  %v1618_v60 = vcombine.high %v5560_v3, %v5547_v22 }
 0x173   :  { %v1033_v40 = vrot.slane %v1023_v49, 4  ;;  %v1025_v12 = vsel %vm294_vm4, %v1024_v59, %v5379_v9  ;;  %v5536_v9 = vrot.slane %v1427_v28, %v4973_v50  ;;  %v1648_v58 = vrot.slane %v1634_v4, %v4955_v41 }
 0x174   :  { %v5599_v24 = vrot.slane %v1649_v1, %v4973_v50  ;;  %v1650_v39 = vcombine.high %v1625_v7, %v1641_v10  ;;  %v1632_v49 = vrot.slane %v1618_v60, %v4955_v41  ;;  %v1616_v28 = vcombine.high %v5178_v45, %v7456_v35  ;;  %v7460_v60 = vld [vmem:[#allocation13_spill] sm:$0xff] }
 0x175   :  { %1037 = vst [vmem:[#allocation3 + $0x18] sm:$0xf0] %v1033_v40  ;;  %v999_v55 = vpop.permute.xlu1 %998  ;;  %v5533_v62 = vpop.permute.xlu0 %1686  ;;  %v1459_v43 = vcombine.high %v5536_v9, %v7456_v35  ;;  %v1394_v40 = vcombine.high %v5371_v54, %v7456_v35 }
 0x176   :  { %v1026_v63 = vsel %vm296_vm5, %v1025_v12, %v999_v55  ;;  %1260 = vrot.lane.b32.xlu1 %v1213_v0, %s4826_s26  ;;  %1224 = vrot.lane.b32.xlu0 %v1144_v52, %s4825_s25  ;;  %v1681_v21 = vcombine.high %v5599_v24, %v7456_v35  ;;  %v1664_v46 = vrot.slane %v1650_v39, %v4973_v50 }
 0x177   :  { %v1027_v2 = vsel %vm298_vm6, %v1026_v63, %v5393_v20  ;;  %v5554_v20 = vrot.slane %v1359_v11, %v4973_v50  ;;  %v1665_v52 = vcombine.low %v1632_v49, %v1648_v58  ;;  %v1666_v63 = vcombine.high %v1632_v49, %v1648_v58 }
 0x178   :  { %v1682_v55 = vcombine.high %v1664_v46, %v7456_v35 }
 0x179   :  { %v1007_v6 = vpop.permute.xlu1 %1006  ;;  %v5562_v32 = vpop.permute.xlu0 %1694  ;;  %v1673_v54 = vrot.slane %v1665_v52, %v4973_v50 }
 0x17a   :  { %v1028_v34 = vsel %vm300_vm7, %v1027_v2, %v1007_v6  ;;  %1268 = vrot.lane.b32.xlu1 %v1214_v61, %s4827_s27  ;;  %1232 = vrot.lane.b32.xlu0 %v1145_v30, %s4826_s26  ;;  %v1680_v2 = vrot.slane %v1666_v63, %v4973_v50 }
 0x17b   :  { %v1029_v26 = vsel %vm302_vm8, %v1028_v34, %v5404_v23  ;;  %v1391_v23 = vcombine.high %v5554_v20, %v7456_v35  ;;  %v1683_v61 = vcombine.high %v1673_v54, %v7456_v35 }
 0x17c   :  { %v1684_v6 = vcombine.high %v1680_v2, %v7456_v35 }
 0x17d   :  { %v1015_v36 = vpop.permute.xlu1 %1014  ;;  %v5585_v38 = vpop.permute.xlu0 %1702 }
 0x17e   :  { %v1030_v57 = vsel %vm304_vm9, %v1029_v26, %v1015_v36  ;;  %1492 = vrot.lane.b32.xlu1 %v1459_v43, %s4824_s24  ;;  %1240 = vrot.lane.b32.xlu0 %v1146_v15, %s4827_s27 }
 0x17f   :  { %v1034_v53 = vrot.slane %v1030_v57, 4 }
 0x181   :  { %1038 = vst [vmem:[#allocation3 + $0x10] sm:$0xf0] %v1034_v53  ;;  %v5574_v13 = vpop.permute.xlu1 %1706  ;;  %v7459_v53 = vld [vmem:[#allocation10_spill] sm:$0xff] }
 0x182   :  { %1500 = vrot.lane.b32.xlu1 %v1460_v48, %s4825_s25  ;;  %1464 = vrot.lane.b32.xlu0 %v1391_v23, %s4824_s24 }
 0x185   :  { %v5587_v14 = vpop.permute.xlu1 %496 }
 0x186   :  { %1508 = vrot.lane.b32.xlu1 %v1461_v5, %s4826_s26  ;;  %1472 = vrot.lane.b32.xlu0 %v1392_v33, %s4825_s25 }
 0x188   :  { %v525_v56 = vpop.permute.xlu0 %524 }
 0x189   :  { %v5601_v59 = vpop.permute.xlu1 %504 }
 0x18a   :  { %1516 = vrot.lane.b32.xlu1 %v1462_v42, %s4827_s27  ;;  %1480 = vrot.lane.b32.xlu0 %v1393_v8, %s4826_s26 }
 0x18c   :  { %v533_v0 = vpop.permute.xlu0 %532 }
 0x18d   :  { %v5615_v12 = vpop.permute.xlu1 %512 }
 0x18e   :  { %1714 = vrot.lane.b32.xlu1 %v1681_v21, %s4824_s24  ;;  %1488 = vrot.lane.b32.xlu0 %v1394_v40, %s4827_s27  ;;  %v7461_v40 = vld [vmem:[#allocation14_spill] sm:$0xff] }
 0x190   :  { %v541_v30 = vpop.permute.xlu0 %540 }
 0x192   :  { %1722 = vrot.lane.b32.xlu1 %v1682_v55, %s4825_s25  ;;  %1710 = vrot.lane.b32.xlu0 %v1616_v28, %s4827_s27 }
 0x194   :  { %v5621_v11 = vpop.permute.xlu1 %750 }
 0x196   :  { %1730 = vrot.lane.b32.xlu1 %v1683_v61, %s4826_s26  ;;  %1718 = vrot.lane.b32.xlu0 %v1664_v46, %s4821_s21 }
 0x198   :  { %v779_v45 = vpop.permute.xlu0 %778  ;;  %v5628_v34 = vpop.permute.xlu1 %758 }
 0x19a   :  { %1738 = vrot.lane.b32.xlu1 %v1684_v6, %s4827_s27  ;;  %1726 = vrot.lane.b32.xlu0 %v1673_v54, %s4822_s22 }
 0x19c   :  { %v787_v15 = vpop.permute.xlu0 %786  ;;  %v5635_v43 = vpop.permute.xlu1 %766 }
 0x19e   :  { %1775 = vrot.lane.b32.xlu1 %v5560_v3, %s4817_s19  ;;  %1734 = vrot.lane.b32.xlu0 %v1680_v2, %s4823_s23 }
 0x1a0   :  { %v795_v44 = vpop.permute.xlu0 %794 }
 0x1a2   :  { %1779 = vrot.lane.b32.xlu1 %v5545_v51, %s4817_s19  ;;  %1773 = vrot.lane.b32.xlu0 %v5065_v37, %s4817_s19 }
 0x1a4   :  { %v5641_v26 = vpop.permute.xlu1 %1220 }
 0x1a6   :  { %1783 = vrot.lane.b32.xlu1 %v5547_v22, %s4817_s19  ;;  %1777 = vrot.lane.b32.xlu0 %v5055_v31, %s4817_s19 }
 0x1a8   :  { %v5647_v36 = vpop.permute.xlu0 %1248  ;;  %v5649_v57 = vpop.permute.xlu1 %1228 }
 0x1aa   :  { %1787 = vrot.lane.b32.xlu1 %v5540_v16, %s4817_s19  ;;  %1781 = vrot.lane.b32.xlu0 %v7458_v47, %s4817_s19 }
 0x1ac   :  { %v5655_v37 = vpop.permute.xlu0 %1256  ;;  %v5659_v48 = vpop.permute.xlu1 %1236 }
 0x1ae   :  { %1785 = vrot.lane.b32.xlu0 %v7459_v53, %s4817_s19 }
 0x1b0   :  { %v5661_v23 = vpop.permute.xlu0 %1264 }
 0x1b4   :  { %v5663_v31 = vpop.permute.xlu1 %1468 }
 0x1b8   :  { %v5665_v10 = vpop.permute.xlu1 %1476  ;;  %v5667_v7 = vpop.permute.xlu0 %1496 }
 0x1bc   :  { %v5669_v4 = vpop.permute.xlu1 %1484  ;;  %v5671_v33 = vpop.permute.xlu0 %1504 }
 0x1c0   :  { %v521_v5 = vpop.permute.xlu1 %520  ;;  %v5673_v1 = vpop.permute.xlu0 %1512 }
 0x1c1   :  { %v554_v58 = vsel %vm292_vm3, %v7460_v60, %v521_v5 }
 0x1c2   :  { %v555_v42 = vsel %vm294_vm4, %v554_v58, %v525_v56 }
 0x1c4   :  { %v529_v8 = vpop.permute.xlu1 %528  ;;  %v493_v39 = vpop.permute.xlu0 %492 }
 0x1c5   :  { %v556_v49 = vsel %vm296_vm5, %v555_v42, %v529_v8  ;;  %v547_v21 = vsel %vm292_vm3, %v7461_v40, %v493_v39 }
 0x1c6   :  { %v557_v52 = vsel %vm298_vm6, %v556_v49, %v533_v0  ;;  %v548_v28 = vsel %vm294_vm4, %v547_v21, %v5587_v14 }
 0x1c8   :  { %v537_v46 = vpop.permute.xlu1 %536  ;;  %v501_v55 = vpop.permute.xlu0 %500 }
 0x1c9   :  { %v558_v54 = vsel %vm300_vm7, %v557_v52, %v537_v46  ;;  %v549_v63 = vsel %vm296_vm5, %v548_v28, %v501_v55 }
 0x1ca   :  { %v559_v56 = vsel %vm302_vm8, %v558_v54, %v541_v30  ;;  %v550_v2 = vsel %vm298_vm6, %v549_v63, %v5601_v59 }
 0x1cc   :  { %v545_v61 = vpop.permute.xlu1 %544  ;;  %v509_v6 = vpop.permute.xlu0 %508 }
 0x1cd   :  { %v560_v47 = vsel %vm304_vm9, %v559_v56, %v545_v61  ;;  %v551_v53 = vsel %vm300_vm7, %v550_v2, %v509_v6 }
 0x1ce   :  { %v564_v0 = vrot.slane %v560_v47, 4  ;;  %v552_v14 = vsel %vm302_vm8, %v551_v53, %v5615_v12 }
 0x1d0   :  { %568 = vst [vmem:[#allocation3] sm:$0xf0] %v564_v0  ;;  %v775_v5 = vpop.permute.xlu1 %774  ;;  %v517_v60 = vpop.permute.xlu0 %516 }
 0x1d1   :  { %v808_v58 = vsel %vm292_vm3, %v5429_v25, %v775_v5  ;;  %v553_v30 = vsel %vm304_vm9, %v552_v14, %v517_v60 }
 0x1d2   :  { %v563_v8 = vrot.slane %v553_v30, 4  ;;  %v809_v42 = vsel %vm294_vm4, %v808_v58, %v779_v45 }
 0x1d4   :  { %567 = vst [vmem:[#allocation3 + $0x30] sm:$0xf0] %v563_v8  ;;  %v783_v59 = vpop.permute.xlu1 %782  ;;  %v747_v39 = vpop.permute.xlu0 %746 }
 0x1d5   :  { %v810_v49 = vsel %vm296_vm5, %v809_v42, %v783_v59  ;;  %v801_v40 = vsel %vm292_vm3, %v5442_v17, %v747_v39 }
 0x1d6   :  { %v811_v12 = vsel %vm298_vm6, %v810_v49, %v787_v15  ;;  %v802_v46 = vsel %vm294_vm4, %v801_v40, %v5621_v11 }
 0x1d8   :  { %v791_v21 = vpop.permute.xlu1 %790  ;;  %v755_v25 = vpop.permute.xlu0 %754 }
 0x1d9   :  { %v812_v52 = vsel %vm300_vm7, %v811_v12, %v791_v21  ;;  %v803_v28 = vsel %vm296_vm5, %v802_v46, %v755_v25 }
 0x1da   :  { %v813_v45 = vsel %vm302_vm8, %v812_v52, %v795_v44  ;;  %v804_v54 = vsel %vm298_vm6, %v803_v28, %v5628_v34 }
 0x1dc   :  { %v799_v55 = vpop.permute.xlu1 %798  ;;  %v763_v63 = vpop.permute.xlu0 %762 }
 0x1dd   :  { %v814_v17 = vsel %vm304_vm9, %v813_v45, %v799_v55  ;;  %v805_v61 = vsel %vm300_vm7, %v804_v54, %v763_v63 }
 0x1de   :  { %816 = vst [vmem:[#allocation3 + $0x10] sm:$0xf] %v814_v17  ;;  %v806_v11 = vsel %vm302_vm8, %v805_v61, %v5635_v43 }
 0x1e0   :  { %v1245_v15 = vpop.permute.xlu1 %1244  ;;  %v771_v56 = vpop.permute.xlu0 %770 }
 0x1e1   :  { %v1278_v2 = vsel %vm292_vm3, %v5480_v27, %v1245_v15  ;;  %v807_v6 = vsel %vm304_vm9, %v806_v11, %v771_v56 }
 0x1e2   :  { %815 = vst [vmem:[#allocation3 + $0x18] sm:$0xf] %v807_v6  ;;  %v1279_v34 = vsel %vm294_vm4, %v1278_v2, %v5647_v36 }
 0x1e4   :  { %v1253_v44 = vpop.permute.xlu1 %1252  ;;  %v1217_v47 = vpop.permute.xlu0 %1216 }
 0x1e5   :  { %v1280_v53 = vsel %vm296_vm5, %v1279_v34, %v1253_v44  ;;  %v1271_v0 = vsel %vm292_vm3, %v5495_v18, %v1217_v47 }
 0x1e6   :  { %v1281_v43 = vsel %vm298_vm6, %v1280_v53, %v5655_v37  ;;  %v1272_v27 = vsel %vm294_vm4, %v1271_v0, %v5641_v26 }
 0x1e8   :  { %v1261_v5 = vpop.permute.xlu1 %1260  ;;  %v1225_v14 = vpop.permute.xlu0 %1224 }
 0x1e9   :  { %v1282_v60 = vsel %vm300_vm7, %v1281_v43, %v1261_v5  ;;  %v1273_v58 = vsel %vm296_vm5, %v1272_v27, %v1225_v14 }
 0x1ea   :  { %v1283_v36 = vsel %vm302_vm8, %v1282_v60, %v5661_v23  ;;  %v1274_v8 = vsel %vm298_vm6, %v1273_v58, %v5649_v57 }
 0x1ec   :  { %v1269_v30 = vpop.permute.xlu1 %1268  ;;  %v1233_v18 = vpop.permute.xlu0 %1232 }
 0x1ed   :  { %v1284_v59 = vsel %vm304_vm9, %v1283_v36, %v1269_v30  ;;  %v1275_v37 = vsel %vm300_vm7, %v1274_v8, %v1233_v18 }
 0x1ee   :  { %1286 = vst [vmem:[#allocation3 + $0x28] sm:$0xf] %v1284_v59  ;;  %v1276_v26 = vsel %vm302_vm8, %v1275_v37, %v5659_v48 }
 0x1f0   :  { %v1493_v42 = vpop.permute.xlu1 %1492  ;;  %v1241_v39 = vpop.permute.xlu0 %1240 }
 0x1f1   :  { %v1526_v49 = vsel %vm292_vm3, %v5536_v9, %v1493_v42  ;;  %v1277_v40 = vsel %vm304_vm9, %v1276_v26, %v1241_v39 }
 0x1f2   :  { %1285 = vst [vmem:[#allocation3 + $0x48] sm:$0xf] %v1277_v40  ;;  %v1527_v57 = vsel %vm294_vm4, %v1526_v49, %v5667_v7  ;;  %v7462_v7 = vld [vmem:[#allocation12_spill] sm:$0xff] }
 0x1f3   :  { %v1741_v45 = vsel %vm292_vm3, %v7462_v7, %v5533_v62 }
 0x1f4   :  { %v1501_v23 = vpop.permute.xlu1 %1500  ;;  %v1465_v21 = vpop.permute.xlu0 %1464  ;;  %v1742_v61 = vsel %vm294_vm4, %v1741_v45, %v5431_v29 }
 0x1f5   :  { %v1528_v12 = vsel %vm296_vm5, %v1527_v57, %v1501_v23  ;;  %v1519_v46 = vsel %vm292_vm3, %v5554_v20, %v1465_v21  ;;  %v1743_v11 = vsel %vm296_vm5, %v1742_v61, %v5562_v32 }
 0x1f6   :  { %v1529_v48 = vsel %vm298_vm6, %v1528_v12, %v5671_v33  ;;  %v1520_v9 = vsel %vm294_vm4, %v1519_v46, %v5663_v31  ;;  %v1744_v2 = vsel %vm298_vm6, %v1743_v11, %v5444_v19 }
 0x1f7   :  { %v1745_v44 = vsel %vm300_vm7, %v1744_v2, %v5585_v38 }
 0x1f8   :  { %v1509_v25 = vpop.permute.xlu1 %1508  ;;  %v1473_v52 = vpop.permute.xlu0 %1472  ;;  %v1746_v29 = vsel %vm302_vm8, %v1745_v44, %v5574_v13 }
 0x1f9   :  { %v1530_v28 = vsel %vm300_vm7, %v1529_v48, %v1509_v25  ;;  %v1521_v55 = vsel %vm296_vm5, %v1520_v9, %v1473_v52 }
 0x1fa   :  { %v1531_v20 = vsel %vm302_vm8, %v1530_v28, %v5673_v1  ;;  %v1522_v63 = vsel %vm298_vm6, %v1521_v55, %v5665_v10 }
 0x1fc   :  { %v1517_v54 = vpop.permute.xlu1 %1516  ;;  %v1481_v33 = vpop.permute.xlu0 %1480 }
 0x1fd   :  { %v1532_v17 = vsel %vm304_vm9, %v1531_v20, %v1517_v54  ;;  %v1523_v31 = vsel %vm300_vm7, %v1522_v63, %v1481_v33 }
 0x1fe   :  { %v1536_v15 = vrot.slane %v1532_v17, 4  ;;  %v1524_v1 = vsel %vm302_vm8, %v1523_v31, %v5669_v4 }
 0x200   :  { %1540 = vst [vmem:[#allocation3 + $0x28] sm:$0xf0] %v1536_v15  ;;  %v1715_v62 = vpop.permute.xlu1 %1714  ;;  %v1489_v56 = vpop.permute.xlu0 %1488 }
 0x201   :  { %v1525_v10 = vsel %vm304_vm9, %v1524_v1, %v1489_v56  ;;  %v1748_v4 = vsel %vm292_vm3, %v5599_v24, %v1715_v62 }
 0x202   :  { %v1535_v6 = vrot.slane %v1525_v10, 4 }
 0x204   :  { %1539 = vst [vmem:[#allocation3 + $0x48] sm:$0xf0] %v1535_v6  ;;  %v1723_v32 = vpop.permute.xlu1 %1722  ;;  %v1711_v34 = vpop.permute.xlu0 %1710 }
 0x205   :  { %v1747_v47 = vsel %vm304_vm9, %v1746_v29, %v1711_v34 }
 0x206   :  { %1755 = vst [vmem:[#allocation3 + $0x8] sm:$0xf] %v1747_v47 }
 0x208   :  { %v1731_v53 = vpop.permute.xlu1 %1730  ;;  %v1719_v0 = vpop.permute.xlu0 %1718 }
 0x209   :  { %v1749_v19 = vsel %vm294_vm4, %v1748_v4, %v1719_v0 }
 0x20a   :  { %v1750_v43 = vsel %vm296_vm5, %v1749_v19, %v1723_v32  ;;  %v2366_v19 = vld [vmem:[#allocation4 + $0x58] sm:$0xff] }
 0x20c   :  { %v1739_v5 = vpop.permute.xlu1 %1738  ;;  %v1727_v38 = vpop.permute.xlu0 %1726 }
 0x20d   :  { %v1751_v27 = vsel %vm298_vm6, %v1750_v43, %v1727_v38  ;;  %v2370_v43 = vld [vmem:[#allocation4 + $0x78] sm:$0xff]  ;;  %v2368_v38 = vld [vmem:[#allocation4 + $0x68] sm:$0xff] }
 0x20e   :  { %v1752_v14 = vsel %vm300_vm7, %v1751_v27, %v1731_v53  ;;  %v2365_v27 = vld [vmem:[#allocation4 + $0x50] sm:$0xff] }
 0x210   :  { %v1776_v13 = vpop.permute.xlu1 %1775  ;;  %v1735_v60 = vpop.permute.xlu0 %1734 }
 0x211   :  { %v1753_v58 = vsel %vm302_vm8, %v1752_v14, %v1735_v60  ;;  %v2369_v14 = vld [vmem:[#allocation4 + $0x70] sm:$0xff]  ;;  %v2367_v60 = vld [vmem:[#allocation4 + $0x60] sm:$0xff] }
 0x212   :  { %v1754_v30 = vsel %vm304_vm9, %v1753_v58, %v1739_v5  ;;  %v2364_v5 = vld [vmem:[#allocation4 + $0x48] sm:$0xff]  ;;  %v2011_v58 = vld [vmem:[#allocation2 + $0x2] sm:$0xff] }
 0x213   :  { %1756 = vst [vmem:[#allocation3 + $0x20] sm:$0xf] %v1754_v30  ;;  %v2013_v30 = vld [vmem:[#allocation2 + $0x1a] sm:$0xff] }
 0x214   :  { %v1774_v24 = vpop.permute.xlu0 %1773  ;;  %v1780_v36 = vpop.permute.xlu1 %1779 }
 0x218   :  { %v1778_v8 = vpop.permute.xlu0 %1777  ;;  %v1784_v18 = vpop.permute.xlu1 %1783 }
 0x219   :  { %v1865_v46 = vcombine.low %v1776_v13, %v1784_v18  ;;  %v1866_v31 = vcombine.high %v1776_v13, %v1784_v18  ;;  %v2363_v13 = vld [vmem:[#allocation4 + $0x40] sm:$0xff] }
 0x21b   :  { %v1873_v45 = vrot.slane %v1865_v46, %v4955_v41  ;;  %v1880_v56 = vrot.slane %v1866_v31, %v4955_v41 }
 0x21c   :  { %v1782_v59 = vpop.permute.xlu0 %1781  ;;  %v1788_v26 = vpop.permute.xlu1 %1787 }
 0x21d   :  { %v1797_v37 = vcombine.low %v1774_v24, %v1782_v59  ;;  %v1798_v39 = vcombine.high %v1774_v24, %v1782_v59  ;;  %v1881_v23 = vcombine.low %v1780_v36, %v1788_v26  ;;  %v1882_v20 = vcombine.high %v1780_v36, %v1788_v26  ;;  %v2015_v24 = vld [vmem:[#allocation2 + $0x32] sm:$0xff]  ;;  %v2017_v36 = vld [vmem:[#allocation2 + $0x4a] sm:$0xff] }
 0x21f   :  { %v1805_v57 = vrot.slane %v1797_v37, %v4955_v41  ;;  %v1812_v25 = vrot.slane %v1798_v39, %v4955_v41  ;;  %v1889_v52 = vrot.slane %v1881_v23, %v4955_v41  ;;  %v1896_v15 = vrot.slane %v1882_v20, %v4955_v41 }
 0x220   :  { %v1786_v42 = vpop.permute.xlu0 %1785 }
 0x221   :  { %v1813_v49 = vcombine.low %v1778_v8, %v1786_v42  ;;  %v1814_v40 = vcombine.high %v1778_v8, %v1786_v42  ;;  %v1897_v63 = vcombine.low %v1873_v45, %v1889_v52  ;;  %v1898_v11 = vcombine.high %v1873_v45, %v1889_v52 }
 0x222   :  { %v1913_v2 = vcombine.low %v1880_v56, %v1896_v15  ;;  %v1914_v32 = vcombine.high %v1880_v56, %v1896_v15 }
 0x223   :  { %v1821_v21 = vrot.slane %v1813_v49, %v4955_v41  ;;  %v1828_v12 = vrot.slane %v1814_v40, %v4955_v41  ;;  %v5800_v1 = vrot.slane %v1897_v63, %v4973_v50  ;;  %v1912_v44 = vrot.slane %v1898_v11, %v4973_v50 }
 0x224   :  { %v1921_v47 = vrot.slane %v1913_v2, %v4973_v50  ;;  %v1928_v53 = vrot.slane %v1914_v32, %v4973_v50 }
 0x225   :  { %v1829_v48 = vcombine.low %v1805_v57, %v1821_v21  ;;  %v1830_v9 = vcombine.high %v1805_v57, %v1821_v21  ;;  %v1845_v28 = vcombine.low %v1812_v25, %v1828_v12  ;;  %v1846_v33 = vcombine.high %v1812_v25, %v1828_v12 }
 0x226   :  { %v1929_v6 = vcombine.high %v5800_v1, %v7456_v35  ;;  %v1930_v34 = vcombine.high %v1912_v44, %v7456_v35  ;;  %v1931_v4 = vcombine.high %v1921_v47, %v7456_v35  ;;  %v1932_v0 = vcombine.high %v1928_v53, %v7456_v35 }
 0x227   :  { %v1844_v55 = vrot.slane %v1830_v9, %v4973_v50  ;;  %v5786_v7 = vrot.slane %v1829_v48, %v4973_v50  ;;  %v1853_v17 = vrot.slane %v1845_v28, %v4973_v50  ;;  %v1860_v62 = vrot.slane %v1846_v33, %v4973_v50 }
 0x229   :  { %1938 = vrot.lane.b32.xlu1 %v1844_v55, %s4821_s21  ;;  %v1861_v54 = vcombine.high %v5786_v7, %v7456_v35  ;;  %v1862_v61 = vcombine.high %v1844_v55, %v7456_v35  ;;  %v1863_v10 = vcombine.high %v1853_v17, %v7456_v35  ;;  %v1864_v29 = vcombine.high %v1860_v62, %v7456_v35 }
 0x22b   :  { %1934 = vrot.lane.b32.xlu0 %v1861_v54, %s4824_s24 }
 0x22d   :  { %1946 = vrot.lane.b32.xlu1 %v1853_v17, %s4822_s22 }
 0x22f   :  { %1942 = vrot.lane.b32.xlu0 %v1862_v61, %s4825_s25 }
 0x231   :  { %1954 = vrot.lane.b32.xlu1 %v1860_v62, %s4823_s23 }
 0x233   :  { %1950 = vrot.lane.b32.xlu0 %v1863_v10, %s4826_s26 }
 0x235   :  { %1962 = vrot.lane.b32.xlu1 %v1929_v6, %s4824_s24 }
 0x237   :  { %1958 = vrot.lane.b32.xlu0 %v1864_v29, %s4827_s27 }
 0x239   :  { %1970 = vrot.lane.b32.xlu1 %v1930_v34, %s4825_s25 }
 0x23b   :  { %1966 = vrot.lane.b32.xlu0 %v1912_v44, %s4821_s21 }
 0x23d   :  { %1978 = vrot.lane.b32.xlu1 %v1931_v4, %s4826_s26 }
 0x23f   :  { %1974 = vrot.lane.b32.xlu0 %v1921_v47, %s4822_s22 }
 0x241   :  { %1986 = vrot.lane.b32.xlu1 %v1932_v0, %s4827_s27 }
 0x243   :  { %1982 = vrot.lane.b32.xlu0 %v1928_v53, %s4823_s23 }
 0x245   :  { %2385 = vrot.lane.b32.xlu1 %v2366_v19, %s4816_s0 }
 0x247   :  { %2381 = vrot.lane.b32.xlu0 %v2364_v5, %s4816_s0 }
 0x249   :  { %2393 = vrot.lane.b32.xlu1 %v2370_v43, %s4816_s0 }
 0x24b   :  { %2389 = vrot.lane.b32.xlu0 %v2368_v38, %s4816_s0 }
 0x24d   :  { %2383 = vrot.lane.b32.xlu1 %v2365_v27, %s4816_s0 }
 0x24f   :  { %2379 = vrot.lane.b32.xlu0 %v2363_v13, %s4816_s0 }
 0x251   :  { %2391 = vrot.lane.b32.xlu1 %v2369_v14, %s4816_s0 }
 0x253   :  { %2387 = vrot.lane.b32.xlu0 %v2367_v60, %s4816_s0 }
 0x255   :  { %2029 = vrot.lane.b32.xlu1 %v5560_v3, %s4818_s20  ;;  %v4828_v3 = vmov 0  }
 0x256   :  { %4715 = vset.pattern.permute.xlu0 %v4828_v3 }
 0x257   :  { %2027 = vrot.lane.b32.xlu0 %v2011_v58, %s4818_s20 }
 0x259   :  { %2033 = vrot.lane.b32.xlu1 %v5545_v51, %s4818_s20 }
 0x25b   :  { %2031 = vrot.lane.b32.xlu0 %v2013_v30, %s4818_s20 }
 0x25d   :  { %2037 = vrot.lane.b32.xlu1 %v5547_v22, %s4818_s20 }
 0x25f   :  { %2035 = vrot.lane.b32.xlu0 %v2015_v24, %s4818_s20 }
 0x261   :  { %2041 = vrot.lane.b32.xlu1 %v5540_v16, %s4818_s20 }
 0x263   :  { %2039 = vrot.lane.b32.xlu0 %v2017_v36, %s4818_s20 }
 0x29b   :  { %v1939_v8 = vpop.permute.xlu1 %1938 }
 0x29d   :  { %v1935_v18 = vpop.permute.xlu0 %1934 }
 0x29e   :  { %v1989_v51 = vsel %vm292_vm3, %v5786_v7, %v1935_v18 }
 0x29f   :  { %v1947_v59 = vpop.permute.xlu1 %1946  ;;  %v1990_v37 = vsel %vm294_vm4, %v1989_v51, %v1939_v8 }
 0x2a1   :  { %v1943_v22 = vpop.permute.xlu0 %1942 }
 0x2a2   :  { %v1991_v42 = vsel %vm296_vm5, %v1990_v37, %v1943_v22 }
 0x2a3   :  { %v1955_v26 = vpop.permute.xlu1 %1954  ;;  %v1992_v39 = vsel %vm298_vm6, %v1991_v42, %v1947_v59 }
 0x2a5   :  { %v1951_v16 = vpop.permute.xlu0 %1950 }
 0x2a6   :  { %v1993_v49 = vsel %vm300_vm7, %v1992_v39, %v1951_v16 }
 0x2a7   :  { %v1963_v40 = vpop.permute.xlu1 %1962  ;;  %v1994_v23 = vsel %vm302_vm8, %v1993_v49, %v1955_v26 }
 0x2a8   :  { %v1996_v25 = vsel %vm292_vm3, %v5800_v1, %v1963_v40 }
 0x2a9   :  { %v1959_v57 = vpop.permute.xlu0 %1958 }
 0x2aa   :  { %v1995_v21 = vsel %vm304_vm9, %v1994_v23, %v1959_v57 }
 0x2ab   :  { %v2005_v12 = vrot.slane %v1995_v21, 4  ;;  %v1971_v46 = vpop.permute.xlu1 %1970 }
 0x2ad   :  { %2009 = vst [vmem:[#allocation3 + $0x8] sm:$0xf0] %v2005_v12  ;;  %v1967_v48 = vpop.permute.xlu0 %1966 }
 0x2ae   :  { %v1997_v9 = vsel %vm294_vm4, %v1996_v25, %v1967_v48 }
 0x2af   :  { %v1979_v52 = vpop.permute.xlu1 %1978  ;;  %v1998_v28 = vsel %vm296_vm5, %v1997_v9, %v1971_v46 }
 0x2b1   :  { %v1975_v55 = vpop.permute.xlu0 %1974 }
 0x2b2   :  { %v1999_v7 = vsel %vm298_vm6, %v1998_v28, %v1975_v55 }
 0x2b3   :  { %v1987_v45 = vpop.permute.xlu1 %1986  ;;  %v2000_v54 = vsel %vm300_vm7, %v1999_v7, %v1979_v52 }
 0x2b5   :  { %v1983_v20 = vpop.permute.xlu0 %1982 }
 0x2b6   :  { %v2001_v63 = vsel %vm302_vm8, %v2000_v54, %v1983_v20 }
 0x2b7   :  { %v2002_v33 = vsel %vm304_vm9, %v2001_v63, %v1987_v45  ;;  %v2386_v17 = vpop.permute.xlu1 %2385 }
 0x2b8   :  { %v2006_v31 = vrot.slane %v2002_v33, 4  ;;  %2406 = vst.msk [vmem:[#allocation2 + $0x21] sm:$0xff] %vm83_vm2, %v2386_v17 }
 0x2b9   :  { %v2382_v61 = vpop.permute.xlu0 %2381 }
 0x2ba   :  { %2010 = vst [vmem:[#allocation3 + $0x20] sm:$0xf0] %v2006_v31  ;;  %2404 = vst.msk [vmem:[#allocation2 + $0x9] sm:$0xff] %vm83_vm2, %v2382_v61 }
 0x2bb   :  { %v2394_v15 = vpop.permute.xlu1 %2393 }
 0x2bc   :  { %2410 = vst.msk [vmem:[#allocation2 + $0x51] sm:$0xff] %vm83_vm2, %v2394_v15 }
 0x2bd   :  { %v2390_v11 = vpop.permute.xlu0 %2389 }
 0x2be   :  { %2408 = vst.msk [vmem:[#allocation2 + $0x39] sm:$0xff] %vm83_vm2, %v2390_v11 }
 0x2bf   :  { %v2384_v62 = vpop.permute.xlu1 %2383 }
 0x2c0   :  { %2405 = vst.msk [vmem:[#allocation2 + $0x19] sm:$0xff] %vm83_vm2, %v2384_v62 }
 0x2c1   :  { %v2380_v1 = vpop.permute.xlu0 %2379 }
 0x2c2   :  { %2403 = vst.msk [vmem:[#allocation2 + $0x1] sm:$0xff] %vm83_vm2, %v2380_v1 }
 0x2c3   :  { %v2392_v56 = vpop.permute.xlu1 %2391 }
 0x2c4   :  { %2409 = vst.msk [vmem:[#allocation2 + $0x49] sm:$0xff] %vm83_vm2, %v2392_v56 }
 0x2c5   :  { %v2388_v10 = vpop.permute.xlu0 %2387 }
 0x2c6   :  { %2407 = vst.msk [vmem:[#allocation2 + $0x31] sm:$0xff] %vm83_vm2, %v2388_v10 }
 0x2c7   :  { %v2030_v2 = vpop.permute.xlu1 %2029  ;;  %v5870_v14 = vld [vmem:[#allocation2 + $0x18] sm:$0xff] }
 0x2c8   :  { %v5890_v39 = vld [vmem:[#allocation2 + $0x19] sm:$0xff] }
 0x2c9   :  { %v2028_v6 = vpop.permute.xlu0 %2027  ;;  %v5877_v8 = vld [vmem:[#allocation2] sm:$0xff] }
 0x2ca   :  { %v5898_v23 = vld [vmem:[#allocation2 + $0x1] sm:$0xff] }
 0x2cb   :  { %v2034_v44 = vpop.permute.xlu1 %2033  ;;  %v5874_v58 = vld [vmem:[#allocation2 + $0x48] sm:$0xff] }
 0x2cc   :  { %v2435_v51 = vcombine.low %v5870_v14, %v5874_v58  ;;  %v5892_v16 = vld [vmem:[#allocation2 + $0x49] sm:$0xff] }
 0x2cd   :  { %v2032_v29 = vpop.permute.xlu0 %2031  ;;  %v5872_v60 = vld [vmem:[#allocation2 + $0x30] sm:$0xff]  ;;  %v3154_v52 = vcombine.high %v5890_v39, %v5892_v16 }
 0x2ce   :  { %v2419_v18 = vcombine.low %v5877_v8, %v5872_v60  ;;  %v5888_v26 = vld [vmem:[#allocation2 + $0x31] sm:$0xff]  ;;  %v5904_v12 = vrot.slane %v2435_v51, %v4955_v41  ;;  %v2628_v51 = vld [vmem:[#allocation2 + $0x8] sm:$0xff] }
 0x2cf   :  { %v2038_v32 = vpop.permute.xlu1 %2037  ;;  %v3138_v46 = vcombine.high %v5898_v23, %v5888_v26  ;;  %v5918_v45 = vrot.slane %v3154_v52, %v4955_v41 }
 0x2d0   :  { %v2119_v30 = vcombine.low %v2030_v2, %v2038_v32  ;;  %v5901_v21 = vrot.slane %v2419_v18, %v4955_v41  ;;  %7464 = vst [vmem:[#allocation10_spill] sm:$0xff] %v5904_v12  ;;  %v2120_v28 = vcombine.high %v2030_v2, %v2038_v32  ;;  %v6022_v18 = vld [vmem:[#allocation2 + $0x51] sm:$0xff] }
 0x2d1   :  { %v2036_v34 = vpop.permute.xlu0 %2035  ;;  %v5915_v7 = vrot.slane %v3138_v46, %v4955_v41  ;;  %7466 = vst [vmem:[#allocation14_spill] sm:$0xff] %v5918_v45  ;;  %7471 = vst [vmem:[#allocation18_spill] sm:$0xff] %v6022_v18 }
 0x2d2   :  { %v2051_v47 = vcombine.low %v2028_v6, %v2036_v34  ;;  %v2052_v5 = vcombine.high %v2028_v6, %v2036_v34  ;;  %v2127_v49 = vrot.slane %v2119_v30, %v4955_v41  ;;  %7463 = vst [vmem:[#allocation11_spill] sm:$0xff] %v5901_v21  ;;  %v2134_v31 = vrot.slane %v2120_v28, %v4955_v41  ;;  %v5998_v30 = vld [vmem:[#allocation2 + $0x4a] sm:$0xff] }
 0x2d3   :  { %v2042_v53 = vpop.permute.xlu1 %2041  ;;  %7465 = vst [vmem:[#allocation13_spill] sm:$0xff] %v5915_v7  ;;  %v2451_v32 = vcombine.low %v5901_v21, %v5904_v12 }
 0x2d4   :  { %v2059_v43 = vrot.slane %v2051_v47, %v4955_v41  ;;  %v2135_v38 = vcombine.low %v2034_v44, %v2042_v53  ;;  %v2066_v24 = vrot.slane %v2052_v5, %v4955_v41  ;;  %v2136_v57 = vcombine.high %v2034_v44, %v2042_v53  ;;  %v2270_v53 = vld [vmem:[%s7413_s2] sm:$0xff] }
 0x2d5   :  { %v2040_v4 = vpop.permute.xlu0 %2039  ;;  %v5952_v47 = vrot.slane %v2451_v32, %v4973_v50  ;;  %v5970_v5 = vld [vmem:[#allocation2 + $0x3a] sm:$0xff] }
 0x2d6   :  { %v2067_v0 = vcombine.low %v2032_v29, %v2040_v4  ;;  %v2068_v19 = vcombine.high %v2032_v29, %v2040_v4  ;;  %v2143_v59 = vrot.slane %v2135_v38, %v4955_v41  ;;  %v2150_v20 = vrot.slane %v2136_v57, %v4955_v41  ;;  %v5986_v38 = vld [vmem:[#allocation2 + $0x2] sm:$0xff] }
 0x2d7   :  { %7467 = vst [vmem:[#allocation12_spill] sm:$0xff] %v5952_v47  ;;  %v2483_v4 = vcombine.high %v5952_v47, %v7456_v35 }
 0x2d8   :  { %v2075_v27 = vrot.slane %v2067_v0, %v4955_v41  ;;  %v2082_v13 = vrot.slane %v2068_v19, %v4955_v41  ;;  %v2151_v25 = vcombine.low %v2127_v49, %v2143_v59  ;;  %v2152_v63 = vcombine.high %v2127_v49, %v2143_v59  ;;  %v5962_v0 = vld [vmem:[#allocation2 + $0xa] sm:$0xff]  ;;  %v5966_v19 = vld [vmem:[#allocation2 + $0x22] sm:$0xff] }
 0x2d9   :  { %v2167_v11 = vcombine.low %v2134_v31, %v2150_v20  ;;  %v2168_v10 = vcombine.high %v2134_v31, %v2150_v20  ;;  %v2630_v59 = vld [vmem:[#allocation2 + $0x20] sm:$0xff] }
 0x2da   :  { %v2083_v36 = vcombine.low %v2059_v43, %v2075_v27  ;;  %v2084_v3 = vcombine.high %v2059_v43, %v2075_v27  ;;  %v2099_v37 = vcombine.low %v2066_v24, %v2082_v13  ;;  %v2100_v48 = vcombine.high %v2066_v24, %v2082_v13  ;;  %v5974_v43 = vld [vmem:[#allocation2 + $0x52] sm:$0xff]  ;;  %v5990_v27 = vld [vmem:[#allocation2 + $0x1a] sm:$0xff]  ;;  %v6010_v24 = vld [vmem:[#allocation2 + $0x9] sm:$0xff] }
 0x2db   :  { %v5926_v17 = vrot.slane %v2151_v25, %v4973_v50  ;;  %v2166_v1 = vrot.slane %v2152_v63, %v4973_v50  ;;  %v2175_v6 = vrot.slane %v2167_v11, %v4973_v50  ;;  %v2182_v29 = vrot.slane %v2168_v10, %v4973_v50  ;;  %v5994_v13 = vld [vmem:[#allocation2 + $0x32] sm:$0xff]  ;;  %7468 = vst [vmem:[#allocation15_spill] sm:$0xff] %v6010_v24 }
 0x2dc   :  { %v2098_v22 = vrot.slane %v2084_v3, %v4973_v50  ;;  %v5886_v42 = vrot.slane %v2083_v36, %v4973_v50  ;;  %v2107_v9 = vrot.slane %v2099_v37, %v4973_v50  ;;  %v2114_v33 = vrot.slane %v2100_v48, %v4973_v50  ;;  %v6014_v36 = vld [vmem:[#allocation2 + $0x21] sm:$0xff]  ;;  %v6018_v3 = vld [vmem:[#allocation2 + $0x39] sm:$0xff] }
 0x2dd   :  { %v2183_v62 = vcombine.high %v5926_v17, %v7456_v35  ;;  %v2184_v2 = vcombine.high %v2166_v1, %v7456_v35  ;;  %v2185_v44 = vcombine.high %v2175_v6, %v7456_v35  ;;  %v2186_v34 = vcombine.high %v2182_v29, %v7456_v35  ;;  %7469 = vst [vmem:[#allocation16_spill] sm:$0xff] %v6014_v36  ;;  %v2632_v37 = vld [vmem:[#allocation2 + $0x38] sm:$0xff] }
 0x2de   :  { %2192 = vrot.lane.b32.xlu1 %v2098_v22, %s4821_s21  ;;  %v2115_v40 = vcombine.high %v5886_v42, %v7456_v35  ;;  %v2116_v55 = vcombine.high %v2098_v22, %v7456_v35  ;;  %v2117_v61 = vcombine.high %v2107_v9, %v7456_v35  ;;  %v2118_v56 = vcombine.high %v2114_v33, %v7456_v35  ;;  %v2634_v22 = vld [vmem:[#allocation2 + $0x50] sm:$0xff] }
 0x2df   :  { %7470 = vst [vmem:[#allocation17_spill] sm:$0xff] %v6018_v3 }
 0x2e0   :  { %2188 = vrot.lane.b32.xlu0 %v2115_v40, %s4824_s24 }
 0x2e2   :  { %2200 = vrot.lane.b32.xlu1 %v2107_v9, %s4822_s22 }
 0x2e4   :  { %2196 = vrot.lane.b32.xlu0 %v2116_v55, %s4825_s25 }
 0x2e6   :  { %2208 = vrot.lane.b32.xlu1 %v2114_v33, %s4823_s23 }
 0x2e8   :  { %2204 = vrot.lane.b32.xlu0 %v2117_v61, %s4826_s26 }
 0x2ea   :  { %2216 = vrot.lane.b32.xlu1 %v2183_v62, %s4824_s24 }
 0x2ec   :  { %2212 = vrot.lane.b32.xlu0 %v2118_v56, %s4827_s27 }
 0x2ee   :  { %2224 = vrot.lane.b32.xlu1 %v2184_v2, %s4825_s25 }
 0x2f0   :  { %2220 = vrot.lane.b32.xlu0 %v2166_v1, %s4821_s21 }
 0x2f2   :  { %2232 = vrot.lane.b32.xlu1 %v2185_v44, %s4826_s26 }
 0x2f4   :  { %2228 = vrot.lane.b32.xlu0 %v2175_v6, %s4822_s22 }
 0x2f6   :  { %2240 = vrot.lane.b32.xlu1 %v2186_v34, %s4827_s27 }
 0x2f8   :  { %2236 = vrot.lane.b32.xlu0 %v2182_v29, %s4823_s23 }
 0x2fa   :  { %2556 = vrot.lane.b32.xlu1 %v2483_v4, %s4824_s24 }
 0x2fc   :  { %2273 = vperm.xlu0 %4715, %v2270_v53   ;;  %v2267_v53 = vld [vmem:[#allocation3 + $0x20] sm:$0xff] }
 0x2fe   :  { %4087 = vrot.lane.b32.xlu1 %v5962_v0, %s4817_s19 }
 0x300   :  { %4091 = vrot.lane.b32.xlu0 %v5966_v19, %s4817_s19 }
 0x302   :  { %4095 = vrot.lane.b32.xlu1 %v5970_v5, %s4817_s19 }
 0x304   :  { %4099 = vrot.lane.b32.xlu0 %v5974_v43, %s4817_s19 }
 0x306   :  { %4341 = vrot.lane.b32.xlu1 %v5962_v0, %s4818_s20 }
 0x308   :  { %4345 = vrot.lane.b32.xlu0 %v5966_v19, %s4818_s20 }
 0x30a   :  { %4349 = vrot.lane.b32.xlu1 %v5970_v5, %s4818_s20 }
 0x30c   :  { %4353 = vrot.lane.b32.xlu0 %v5974_v43, %s4818_s20 }
 0x30e   :  { %4085 = vrot.lane.b32.xlu1 %v5986_v38, %s4817_s19 }
 0x310   :  { %4089 = vrot.lane.b32.xlu0 %v5990_v27, %s4817_s19 }
 0x312   :  { %4093 = vrot.lane.b32.xlu1 %v5994_v13, %s4817_s19 }
 0x314   :  { %4097 = vrot.lane.b32.xlu0 %v5998_v30, %s4817_s19 }
 0x316   :  { %4339 = vrot.lane.b32.xlu1 %v5986_v38, %s4818_s20 }
 0x318   :  { %4343 = vrot.lane.b32.xlu0 %v5990_v27, %s4818_s20 }
 0x31a   :  { %4347 = vrot.lane.b32.xlu1 %v5994_v13, %s4818_s20 }
 0x31c   :  { %4351 = vrot.lane.b32.xlu0 %v5998_v30, %s4818_s20 }
 0x31e   :  { %3617 = vrot.lane.b32.xlu1 %v6010_v24, %s4818_s20 }
 0x320   :  { %3621 = vrot.lane.b32.xlu0 %v6014_v36, %s4818_s20 }
 0x322   :  { %3625 = vrot.lane.b32.xlu1 %v6018_v3, %s4818_s20 }
 0x324   :  { %3629 = vrot.lane.b32.xlu0 %v6022_v18, %s4818_s20 }
 0x326   :  { %3615 = vrot.lane.b32.xlu1 %v5898_v23, %s4818_s20 }
 0x328   :  { %3619 = vrot.lane.b32.xlu0 %v5890_v39, %s4818_s20 }
 0x32a   :  { %3623 = vrot.lane.b32.xlu1 %v5888_v26, %s4818_s20 }
 0x32c   :  { %3627 = vrot.lane.b32.xlu0 %v5892_v16, %s4818_s20 }
 0x32e   :  { %3369 = vrot.lane.b32.xlu1 %v6010_v24, %s4817_s19 }
 0x330   :  { %3373 = vrot.lane.b32.xlu0 %v6014_v36, %s4817_s19 }
 0x332   :  { %3377 = vrot.lane.b32.xlu1 %v6018_v3, %s4817_s19 }
 0x334   :  { %3381 = vrot.lane.b32.xlu0 %v6022_v18, %s4817_s19 }
 0x336   :  { %3367 = vrot.lane.b32.xlu1 %v5898_v23, %s4817_s19 }
 0x338   :  { %3371 = vrot.lane.b32.xlu0 %v5890_v39, %s4817_s19 }
 0x33a   :  { %3375 = vrot.lane.b32.xlu1 %v5888_v26, %s4817_s19 }
 0x33c   :  { %3379 = vrot.lane.b32.xlu0 %v5892_v16, %s4817_s19 }
 0x33e   :  { %2645 = vrot.lane.b32.xlu1 %v2628_v51, %s4817_s19 }
 0x340   :  { %2649 = vrot.lane.b32.xlu0 %v2630_v59, %s4817_s19 }
 0x342   :  { %2653 = vrot.lane.b32.xlu1 %v2632_v37, %s4817_s19 }
 0x344   :  { %2657 = vrot.lane.b32.xlu0 %v2634_v22, %s4817_s19 }
 0x346   :  { %2899 = vrot.lane.b32.xlu1 %v2628_v51, %s4818_s20 }
 0x348   :  { %2903 = vrot.lane.b32.xlu0 %v2630_v59, %s4818_s20  ;;  %v2266_v59 = vld [vmem:[#allocation3 + $0x8] sm:$0xff] }
 0x34a   :  { %2907 = vrot.lane.b32.xlu1 %v2632_v37, %s4818_s20 }
 0x34c   :  { %2911 = vrot.lane.b32.xlu0 %v2634_v22, %s4818_s20  ;;  %v2265_v22 = vld [vmem:[#allocation3 + $0x28] sm:$0xff] }
 0x34e   :  { %2643 = vrot.lane.b32.xlu1 %v5877_v8, %s4817_s19 }
 0x350   :  { %v2193_v49 = vpop.permute.xlu1 %2192  ;;  %2647 = vrot.lane.b32.xlu0 %v5870_v14, %s4817_s19 }
 0x352   :  { %2651 = vrot.lane.b32.xlu1 %v5872_v60, %s4817_s19  ;;  %v2189_v40 = vpop.permute.xlu0 %2188 }
 0x353   :  { %v2243_v57 = vsel %vm292_vm3, %v5886_v42, %v2189_v40  ;;  %v2263_v40 = vld [vmem:[#allocation3 + $0x10] sm:$0xff] }
 0x354   :  { %v2201_v46 = vpop.permute.xlu1 %2200  ;;  %2655 = vrot.lane.b32.xlu0 %v5874_v58, %s4817_s19  ;;  %v2244_v25 = vsel %vm294_vm4, %v2243_v57, %v2193_v49  ;;  %v2264_v49 = vld [vmem:[#allocation3 + $0x48] sm:$0xff] }
 0x356   :  { %2897 = vrot.lane.b32.xlu1 %v5877_v8, %s4818_s20  ;;  %v2197_v48 = vpop.permute.xlu0 %2196 }
 0x357   :  { %v2245_v9 = vsel %vm296_vm5, %v2244_v25, %v2197_v48  ;;  %v2261_v48 = vld [vmem:[#allocation3] sm:$0xff] }
 0x358   :  { %v2209_v52 = vpop.permute.xlu1 %2208  ;;  %2901 = vrot.lane.b32.xlu0 %v5870_v14, %s4818_s20  ;;  %v2246_v42 = vsel %vm298_vm6, %v2245_v9, %v2201_v46  ;;  %v2262_v46 = vld [vmem:[#allocation3 + $0x18] sm:$0xff]  ;;  %v2259_v9 = vld [vmem:[%s7412_s1] sm:$0xff] }
 0x35a   :  { %2905 = vrot.lane.b32.xlu1 %v5872_v60, %s4818_s20  ;;  %v2205_v28 = vpop.permute.xlu0 %2204 }
 0x35b   :  { %v2247_v55 = vsel %vm300_vm7, %v2246_v42, %v2205_v28 }
 0x35c   :  { %v2217_v20 = vpop.permute.xlu1 %2216  ;;  %2909 = vrot.lane.b32.xlu0 %v5874_v58, %s4818_s20  ;;  %v2248_v8 = vsel %vm302_vm8, %v2247_v55, %v2209_v52  ;;  %v2260_v52 = vld [vmem:[#allocation3 + $0x30] sm:$0xff] }
 0x35d   :  { %v2250_v14 = vsel %vm292_vm3, %v5926_v17, %v2217_v20 }
 0x35e   :  { %v2213_v63 = vpop.permute.xlu0 %2212 }
 0x35f   :  { %v2249_v33 = vsel %vm304_vm9, %v2248_v8, %v2213_v63 }
 0x360   :  { %2257 = vst [vmem:[#allocation3 + $0x40] sm:$0xf] %v2249_v33  ;;  %v2225_v31 = vpop.permute.xlu1 %2224 }
 0x362   :  { %v2221_v60 = vpop.permute.xlu0 %2220 }
 0x363   :  { %v2251_v61 = vsel %vm294_vm4, %v2250_v14, %v2221_v60 }
 0x364   :  { %v2233_v11 = vpop.permute.xlu1 %2232  ;;  %v2252_v62 = vsel %vm296_vm5, %v2251_v61, %v2225_v31 }
 0x366   :  { %v2229_v1 = vpop.permute.xlu0 %2228 }
 0x367   :  { %v2253_v56 = vsel %vm298_vm6, %v2252_v62, %v2229_v1  ;;  %v2268_v4 = vld [vmem:[#allocation3 + $0x40] sm:$0xf] }
 0x368   :  { %v2241_v58 = vpop.permute.xlu1 %2240  ;;  %v2254_v10 = vsel %vm300_vm7, %v2253_v56, %v2233_v11 }
 0x36a   :  { %v2237_v2 = vpop.permute.xlu0 %2236 }
 0x36b   :  { %v2255_v6 = vsel %vm302_vm8, %v2254_v10, %v2237_v2 }
 0x36c   :  { %v2256_v44 = vsel %vm304_vm9, %v2255_v6, %v2241_v58  ;;  %v6090_v29 = vpop.permute.xlu1 %2556  ;;  %v3945_v6 = vcombine.low %v5966_v19, %v5974_v43 }
 0x36d   :  { %7472 = vst [vmem:[#allocation19_spill] sm:$0xff] %v6090_v29  ;;  %2258 = vst [vmem:[#allocation3 + $0x38] sm:$0xf] %v2256_v44 }
 0x370   :  { %v6092_v17 = vpop.permute.xlu1 %4087 }
 0x374   :  { %v6094_v32 = vpop.permute.xlu1 %4095  ;;  %v2269_v34 = vld [vmem:[#allocation3 + $0x38] sm:$0xf] }
 0x375   :  { %4690 = vmatprep.subr.msk.mxu0 %vm2280_vm10, %v2269_v34  ;;  %v4177_v42 = vcombine.low %v6092_v17, %v6094_v32 }
 0x376   :  { %4691 = vmatpush1.msk.msra.mxu0 %vm2280_vm10, %v2268_v4  ;;  %v3929_v4 = vcombine.low %v5962_v0, %v5970_v5 }
 0x377   :  { %2311 = vmatprep.subr.mxu0 %v2267_v53  ;;  %v6098_v51 = vpop.permute.xlu0 %2273  ;;  %v4185_v8 = vrot.slane %v4177_v42, %v4955_v41 }
 0x378   :  { %7473 = vst [vmem:[#allocation20_spill] sm:$0xff] %v6098_v51  ;;  %v6100_v37 = vpop.permute.xlu1 %4341  ;;  %2312 = vmatpush1.msra.mxu0 %v2266_v59 }
 0x379   :  { %2313 = vmatprep.subr.mxu0 %v2265_v22 }
 0x37a   :  { %2314 = vmatpush1.msra.mxu0 %v2264_v49  ;;  %v6156_v49 = vrot.slane %v3945_v6, %v4955_v41 }
 0x37b   :  { %2315 = vmatprep.subr.mxu0 %v2263_v40  ;;  %v6102_v57 = vpop.permute.xlu0 %4091 }
 0x37c   :  { %v6104_v25 = vpop.permute.xlu1 %4349  ;;  %2316 = vmatpush1.msra.mxu0 %v2262_v46 }
 0x37d   :  { %2317 = vmatprep.subr.mxu0 %v2261_v48  ;;  %v4431_v60 = vcombine.low %v6100_v37, %v6104_v25 }
 0x37e   :  { %2318 = vmatpush1.msra.mxu0 %v2260_v52  ;;  %v6165_v52 = vrot.slane %v3929_v4, %v4955_v41 }
 0x37f   :  { %4692 = vmatmul.mubr.msk.f32.vlgmr.msra.gmra.mxu0 %vm2276_vm11, %v2259_v9  ;;  %v6112_v28 = vpop.permute.xlu0 %4099  ;;  %v4439_v58 = vrot.slane %v4431_v60, %v4955_v41 }
 0x380   :  { %v4193_v55 = vcombine.low %v6102_v57, %v6112_v28  ;;  %v6116_v20 = vpop.permute.xlu1 %4085 }
 0x382   :  { %v4201_v63 = vrot.slane %v4193_v55, %v4955_v41 }
 0x383   :  { %v6120_v33 = vpop.permute.xlu0 %4345 }
 0x384   :  { %v4209_v31 = vcombine.low %v4185_v8, %v4201_v63  ;;  %v6122_v14 = vpop.permute.xlu1 %4093  ;;  %v4210_v40 = vcombine.high %v4185_v8, %v4201_v63 }
 0x385   :  { %v4109_v53 = vcombine.low %v6116_v20, %v6122_v14 }
 0x386   :  { %v6127_v61 = vrot.slane %v4209_v31, %v4973_v50 }
 0x387   :  { %v6129_v11 = vpop.permute.xlu0 %4353  ;;  %v6168_v42 = vrot.slane %v4109_v53, %v4955_v41 }
 0x388   :  { %7474 = vst [vmem:[#allocation21_spill] sm:$0xff] %v6127_v61  ;;  %v4447_v62 = vcombine.low %v6120_v33, %v6129_v11  ;;  %v6133_v1 = vpop.permute.xlu1 %4339  ;;  %v4241_v56 = vcombine.high %v6127_v61, %v7456_v35 }
 0x38a   :  { %v4455_v10 = vrot.slane %v4447_v62, %v4955_v41  ;;  %4274 = vrot.lane.b32.xlu1 %v4241_v56, %s4824_s24  ;;  %v4224_v62 = vrot.slane %v4210_v40, %v4973_v50  ;;  %v3961_v56 = vcombine.low %v6165_v52, %v6156_v49 }
 0x38b   :  { %v6140_v2 = vpop.permute.xlu0 %4089 }
 0x38c   :  { %v4463_v44 = vcombine.low %v4439_v58, %v4455_v10  ;;  %v6144_v34 = vpop.permute.xlu1 %4347  ;;  %v4464_v63 = vcombine.high %v4439_v58, %v4455_v10  ;;  %v4242_v29 = vcombine.high %v4224_v62, %v7456_v35 }
 0x38d   :  { %v4363_v6 = vcombine.low %v6133_v1, %v6144_v34 }
 0x38e   :  { %v6151_v59 = vrot.slane %v4463_v44, %v4973_v50  ;;  %v4478_v53 = vrot.slane %v4464_v63, %v4973_v50 }
 0x38f   :  { %v6153_v22 = vpop.permute.xlu0 %4097 }
 0x390   :  { %7475 = vst [vmem:[#allocation22_spill] sm:$0xff] %v6151_v59  ;;  %v4125_v46 = vcombine.low %v6140_v2, %v6153_v22  ;;  %v6160_v48 = vpop.permute.xlu1 %3617  ;;  %v4495_v9 = vcombine.high %v6151_v59, %v7456_v35  ;;  %v4496_v21 = vcombine.high %v4478_v53, %v7456_v35 }
 0x392   :  { %v6171_v55 = vrot.slane %v4125_v46, %v4955_v41  ;;  %4528 = vrot.lane.b32.xlu0 %v4495_v9, %s4824_s24  ;;  %v6199_v46 = vrot.slane %v3961_v56, %v4973_v50  ;;  %v6202_v9 = vrot.slane %v4363_v6, %v4955_v41 }
 0x393   :  { %v6174_v8 = vpop.permute.xlu0 %4343 }
 0x394   :  { %v4141_v31 = vcombine.low %v6168_v42, %v6171_v55  ;;  %v6178_v60 = vpop.permute.xlu1 %3625  ;;  %7477 = vst [vmem:[#allocation24_spill] sm:$0xff] %v6199_v46  ;;  %v3993_v56 = vcombine.high %v6199_v46, %v7456_v35 }
 0x395   :  { %v3707_v6 = vcombine.low %v6160_v48, %v6178_v60 }
 0x396   :  { %4278 = vrot.lane.b32.xlu0 %v4224_v62, %s4821_s21  ;;  %v6187_v44 = vrot.slane %v4141_v31, %v4973_v50 }
 0x397   :  { %v6189_v4 = vpop.permute.xlu0 %4351  ;;  %v3715_v61 = vrot.slane %v3707_v6, %v4955_v41 }
 0x398   :  { %7476 = vst [vmem:[#allocation23_spill] sm:$0xff] %v6187_v44  ;;  %v4379_v58 = vcombine.low %v6174_v8, %v6189_v4  ;;  %v6193_v10 = vpop.permute.xlu1 %3615  ;;  %v4173_v40 = vcombine.high %v6187_v44, %v7456_v35 }
 0x39a   :  { %v6205_v31 = vrot.slane %v4379_v58, %v4955_v41  ;;  %4532 = vrot.lane.b32.xlu0 %v4478_v53, %s4821_s21  ;;  %4246 = vrot.lane.b32.xlu1 %v4173_v40, %s4824_s24  ;;  %v4432_v53 = vcombine.high %v6100_v37, %v6104_v25 }
 0x39b   :  { %v6209_v15 = vpop.permute.xlu0 %3621 }
 0x39c   :  { %v4395_v63 = vcombine.low %v6202_v9, %v6205_v31  ;;  %v6213_v54 = vpop.permute.xlu1 %3623 }
 0x39d   :  { %v3639_v6 = vcombine.low %v6193_v10, %v6213_v54 }
 0x39e   :  { %4026 = vrot.lane.b32.xlu0 %v3993_v56, %s4824_s24  ;;  %v6221_v58 = vrot.slane %v4395_v63, %v4973_v50  ;;  %v4194_v63 = vcombine.high %v6102_v57, %v6112_v28  ;;  %v3962_v57 = vcombine.high %v6165_v52, %v6156_v49 }
 0x39f   :  { %v6223_v47 = vpop.permute.xlu0 %3629 }
 0x3a0   :  { %7478 = vst [vmem:[#allocation25_spill] sm:$0xff] %v6221_v58  ;;  %v3723_v40 = vcombine.low %v6209_v15, %v6223_v47  ;;  %v4427_v44 = vcombine.high %v6221_v58, %v7456_v35  ;;  %v6230_v59 = vpop.permute.xlu1 %3369  ;;  %v4178_v58 = vcombine.high %v6092_v17, %v6094_v32  ;;  %v6252_v28 = vrot.slane %v4194_v63, %v4955_v41 }
 0x3a1   :  { %7479 = vst [vmem:[#allocation26_spill] sm:$0xff] %v6230_v59  ;;  %v3861_v32 = vcombine.low %v5986_v38, %v5994_v13 }
 0x3a2   :  { %v3731_v46 = vrot.slane %v3723_v40, %v4955_v41  ;;  %4282 = vrot.lane.b32.xlu0 %v4242_v29, %s4825_s25  ;;  %4500 = vrot.lane.b32.xlu1 %v4427_v44, %s4824_s24 }
 0x3a3   :  { %v6238_v56 = vpop.permute.xlu0 %3619  ;;  %v6290_v63 = vrot.slane %v3861_v32, %v4955_v41 }
 0x3a4   :  { %v3739_v12 = vcombine.low %v3715_v61, %v3731_v46  ;;  %v3740_v62 = vcombine.high %v3715_v61, %v3731_v46  ;;  %v4448_v61 = vcombine.high %v6120_v33, %v6129_v11  ;;  %v6256_v44 = vpop.permute.xlu1 %3377  ;;  %v6272_v11 = vrot.slane %v4178_v58, %v4955_v41 }
 0x3a5   :  { %7481 = vst [vmem:[#allocation28_spill] sm:$0xff] %v6256_v44  ;;  %v6277_v46 = vrot.slane %v3639_v6, %v4955_v41  ;;  %v3976_v58 = vrot.slane %v3962_v57, %v4973_v50  ;;  %v6306_v57 = vrot.slane %v4432_v53, %v4955_v41  ;;  %v3459_v32 = vcombine.low %v6230_v59, %v6256_v44 }
 0x3a6   :  { %4536 = vrot.lane.b32.xlu0 %v4496_v21, %s4825_s25  ;;  %v6247_v29 = vrot.slane %v3739_v12, %v4973_v50  ;;  %v3877_v21 = vcombine.low %v5990_v27, %v5998_v30  ;;  %v4142_v12 = vcombine.high %v6168_v42, %v6171_v55  ;;  %v3754_v52 = vrot.slane %v3740_v62, %v4973_v50 }
 0x3a7   :  { %v6258_v17 = vpop.permute.xlu0 %3627  ;;  %v4225_v42 = vcombine.low %v6272_v11, %v6252_v28  ;;  %v6296_v25 = vrot.slane %v4448_v61, %v4955_v41  ;;  %v4396_v62 = vcombine.high %v6202_v9, %v6205_v31  ;;  %v6326_v51 = vrot.slane %v3459_v32, %v4955_v41 }
 0x3a8   :  { %7480 = vst [vmem:[#allocation27_spill] sm:$0xff] %v6247_v29  ;;  %v3655_v49 = vcombine.low %v6238_v56, %v6258_v17  ;;  %v3771_v33 = vcombine.high %v6247_v29, %v7456_v35  ;;  %v6293_v37 = vrot.slane %v3877_v21, %v4955_v41 }
 0x3a9   :  { %v4233_v9 = vrot.slane %v4225_v42, %v4973_v50  ;;  %v4479_v21 = vcombine.low %v6306_v57, %v6296_v25  ;;  %v4410_v53 = vrot.slane %v4396_v62, %v4973_v50  ;;  %v3205_v62 = vcombine.low %v6010_v24, %v6018_v3 }
 0x3aa   :  { %v6280_v40 = vrot.slane %v3655_v49, %v4955_v41  ;;  %3808 = vrot.lane.b32.xlu0 %v3754_v52, %s4821_s21  ;;  %3804 = vrot.lane.b32.xlu1 %v3771_v33, %s4824_s24  ;;  %v4156_v49 = vrot.slane %v4142_v12, %v4973_v50  ;;  %v6303_v33 = vpop.permute.xlu1 %3367  ;;  %v3893_v31 = vcombine.low %v6290_v63, %v6293_v37 }
 0x3ab   :  { %v6286_v55 = vpop.permute.xlu0 %3373 }
 0x3ac   :  { %7482 = vst [vmem:[#allocation29_spill] sm:$0xff] %v6286_v55  ;;  %v3671_v6 = vcombine.low %v6277_v46, %v6280_v40  ;;  %v6347_v44 = vrot.slane %v3893_v31, %v4973_v50 }
 0x3ae   :  { %4030 = vrot.lane.b32.xlu0 %v3976_v58, %s4821_s21  ;;  %4250 = vrot.lane.b32.xlu1 %v4156_v49, %s4821_s21  ;;  %v6323_v29 = vrot.slane %v3671_v6, %v4973_v50  ;;  %v6333_v42 = vpop.permute.xlu1 %3375  ;;  %v3221_v6 = vcombine.low %v6014_v36, %v6022_v18  ;;  %7485 = vst [vmem:[#allocation32_spill] sm:$0xff] %v6347_v44 }
 0x3af   :  { %v6312_v61 = vpop.permute.xlu0 %3381  ;;  %v3925_v31 = vcombine.high %v6347_v44, %v7456_v35  ;;  %v3213_v36 = vrot.slane %v3205_v62, %v4955_v41  ;;  %v4174_v44 = vcombine.high %v4156_v49, %v7456_v35  ;;  %v3772_v18 = vcombine.high %v3754_v52, %v7456_v35 }
 0x3b0   :  { %7483 = vst [vmem:[#allocation30_spill] sm:$0xff] %v6312_v61  ;;  %v3475_v12 = vcombine.low %v6286_v55, %v6312_v61  ;;  %7484 = vst [vmem:[#allocation31_spill] sm:$0xff] %v6323_v29  ;;  %v3703_v59 = vcombine.high %v6323_v29, %v7456_v35  ;;  %v3392_v55 = vcombine.high %v6303_v33, %v6333_v42 }
 0x3b1   :  { %v3994_v62 = vcombine.high %v3976_v58, %v7456_v35  ;;  %v4243_v58 = vcombine.high %v4233_v9, %v7456_v35  ;;  %v4110_v49 = vcombine.high %v6116_v20, %v6122_v14  ;;  %v3153_v20 = vcombine.low %v5890_v39, %v5892_v16 }
 0x3b2   :  { %v6329_v7 = vrot.slane %v3475_v12, %v4955_v41  ;;  %4286 = vrot.lane.b32.xlu0 %v4233_v9, %s4822_s22  ;;  %4504 = vrot.lane.b32.xlu1 %v4410_v53, %s4821_s21  ;;  %v4487_v12 = vrot.slane %v4479_v21, %v4973_v50  ;;  %v3229_v21 = vrot.slane %v3221_v6, %v4955_v41 }
 0x3b3   :  { %v6335_v45 = vpop.permute.xlu0 %3371  ;;  %v4380_v14 = vcombine.high %v6174_v8, %v6189_v4  ;;  %v3946_v39 = vcombine.high %v5966_v19, %v5974_v43  ;;  %v4364_v16 = vcombine.high %v6133_v1, %v6144_v34  ;;  %v6449_v43 = vrot.slane %v3153_v20, %v4955_v41 }
 0x3b4   :  { %v3491_v32 = vcombine.low %v6326_v51, %v6329_v7 }
 0x3b5   :  { %v6452_v1 = vrot.slane %v4380_v14, %v4955_v41  ;;  %v6464_v4 = vrot.slane %v4364_v16, %v4955_v41 }
 0x3b6   :  { %4540 = vrot.lane.b32.xlu0 %v4487_v12, %s4822_s22  ;;  %3776 = vrot.lane.b32.xlu1 %v3703_v59, %s4824_s24  ;;  %v6354_v61 = vrot.slane %v3491_v32, %v4973_v50  ;;  %v6367_v59 = vrot.slane %v3392_v55, %v4955_v41 }
 0x3b7   :  { %v6356_v24 = vpop.permute.xlu0 %3379 }
 0x3b8   :  { %7486 = vst [vmem:[#allocation33_spill] sm:$0xff] %v6354_v61  ;;  %v3408_v29 = vcombine.high %v6335_v45, %v6356_v24  ;;  %v3523_v3 = vcombine.high %v6354_v61, %v7456_v35  ;;  %v3237_v61 = vcombine.low %v3213_v36, %v3229_v21  ;;  %v3407_v8 = vcombine.low %v6335_v45, %v6356_v24 }
 0x3ba   :  { %v6370_v32 = vrot.slane %v3408_v29, %v4955_v41  ;;  %3998 = vrot.lane.b32.xlu1 %v3925_v31, %s4824_s24  ;;  %3556 = vrot.lane.b32.xlu0 %v3523_v3, %s4824_s24  ;;  %v4428_v29 = vcombine.high %v4410_v53, %v7456_v35  ;;  %v6385_v3 = vrot.slane %v3237_v61, %v4973_v50  ;;  %v6387_v31 = vpop.permute.xlu1 %2645 }
 0x3bb   :  { %v6380_v55 = vpop.permute.xlu0 %2649  ;;  %v3238_v53 = vcombine.high %v3213_v36, %v3229_v21  ;;  %v3724_v36 = vcombine.high %v6209_v15, %v6223_v47  ;;  %v4497_v21 = vcombine.high %v4487_v12, %v7456_v35  ;;  %v4411_v12 = vcombine.low %v6464_v4, %v6452_v1 }
 0x3bc   :  { %v3269_v52 = vcombine.high %v6385_v3, %v7456_v35 }
 0x3bd   :  { %v6438_v15 = vrot.slane %v3238_v53, %v4973_v50  ;;  %v6455_v34 = vrot.slane %v3724_v36, %v4955_v41 }
 0x3be   :  { %4254 = vrot.lane.b32.xlu1 %v4174_v44, %s4825_s25  ;;  %3812 = vrot.lane.b32.xlu0 %v3772_v18, %s4825_s25  ;;  %v4126_v44 = vcombine.high %v6140_v2, %v6153_v22  ;;  %v3672_v18 = vcombine.high %v6277_v46, %v6280_v40  ;;  %v6407_v22 = vpop.permute.xlu1 %2653  ;;  %v3894_v46 = vcombine.high %v6290_v63, %v6293_v37 }
 0x3bf   :  { %v6400_v61 = vpop.permute.xlu0 %2657  ;;  %v3137_v40 = vcombine.low %v5898_v23, %v5888_v26  ;;  %v3930_v26 = vcombine.high %v5962_v0, %v5970_v5  ;;  %v3708_v23 = vcombine.high %v6160_v48, %v6178_v60  ;;  %v3492_v48 = vcombine.high %v6326_v51, %v6329_v7 }
 0x3c0   :  { %v6405_v2 = vrot.slane %v4126_v44, %v4955_v41  ;;  %v6420_v9 = vrot.slane %v3672_v18, %v4973_v50  ;;  %v3908_v19 = vrot.slane %v3894_v46, %v4973_v50  ;;  %v3391_v37 = vcombine.low %v6303_v33, %v6333_v42 }
 0x3c1   :  { %v6446_v5 = vrot.slane %v3137_v40, %v4955_v41  ;;  %v6467_v63 = vrot.slane %v3708_v23, %v4955_v41  ;;  %v6478_v24 = vrot.slane %v3930_v26, %v4955_v41  ;;  %v6481_v51 = vrot.slane %v3946_v39, %v4955_v41 }
 0x3c2   :  { %4508 = vrot.lane.b32.xlu1 %v4428_v29, %s4825_s25  ;;  %4034 = vrot.lane.b32.xlu0 %v3994_v62, %s4825_s25  ;;  %v6424_v29 = vrot.slane %v4110_v49, %v4955_v41  ;;  %v6461_v60 = vpop.permute.xlu1 %2899  ;;  %v6488_v42 = vrot.slane %v3407_v8, %v4955_v41  ;;  %v3506_v62 = vrot.slane %v3492_v48, %v4973_v50 }
 0x3c3   :  { %v6442_v0 = vpop.permute.xlu0 %2903  ;;  %v3169_v45 = vcombine.low %v6446_v5, %v6449_v43  ;;  %v3755_v33 = vcombine.low %v6467_v63, %v6455_v34  ;;  %v6494_v18 = vrot.slane %v3391_v37, %v4955_v41  ;;  %v3977_v49 = vcombine.low %v6478_v24, %v6481_v51 }
 0x3c4   :  { %v4157_v47 = vcombine.low %v6424_v29, %v6405_v2  ;;  %v4419_v40 = vrot.slane %v4411_v12, %v4973_v50  ;;  %v2751_v8 = vcombine.low %v6380_v55, %v6400_v61 }
 0x3c5   :  { %v3423_v53 = vcombine.low %v6494_v18, %v6488_v42  ;;  %v3763_v20 = vrot.slane %v3755_v33, %v4973_v50  ;;  %v3985_v36 = vrot.slane %v3977_v49, %v4973_v50  ;;  %v3926_v33 = vcombine.high %v3908_v19, %v7456_v35 }
 0x3c6   :  { %3302 = vrot.lane.b32.xlu1 %v3269_v52, %s4824_s24  ;;  %4290 = vrot.lane.b32.xlu0 %v4243_v58, %s4826_s26  ;;  %v4165_v7 = vrot.slane %v4157_v47, %v4973_v50  ;;  %v6498_v52 = vpop.permute.xlu1 %2907  ;;  %v6501_v58 = vrot.slane %v3169_v45, %v4973_v50  ;;  %v4480_v47 = vcombine.high %v6306_v57, %v6296_v25 }
 0x3c7   :  { %v6491_v44 = vpop.permute.xlu0 %2911  ;;  %v2989_v14 = vcombine.low %v6461_v60, %v6498_v52  ;;  %v6524_v16 = vrot.slane %v3423_v53, %v4973_v50  ;;  %v3704_v25 = vcombine.high %v6420_v9, %v7456_v35  ;;  %v2735_v45 = vcombine.low %v6387_v31, %v6407_v22 }
 0x3c8   :  { %v3005_v46 = vcombine.low %v6442_v0, %v6491_v44  ;;  %v3201_v39 = vcombine.high %v6501_v58, %v7456_v35  ;;  %v4494_v37 = vrot.slane %v4480_v47, %v4973_v50  ;;  %v6553_v12 = vrot.slane %v2751_v8, %v4955_v41 }
 0x3c9   :  { %v6527_v23 = vrot.slane %v2989_v14, %v4955_v41  ;;  %v3455_v48 = vcombine.high %v6524_v16, %v7456_v35  ;;  %v3270_v14 = vcombine.high %v6438_v15, %v7456_v35  ;;  %v3640_v8 = vcombine.high %v6193_v10, %v6213_v54 }
 0x3ca   :  { %3780 = vrot.lane.b32.xlu1 %v6420_v9, %s4821_s21  ;;  %4544 = vrot.lane.b32.xlu0 %v4497_v21, %s4826_s26  ;;  %v4226_v21 = vcombine.high %v6272_v11, %v6252_v28  ;;  %v6519_v26 = vrot.slane %v3005_v46, %v4955_v41  ;;  %v6559_v9 = vrot.slane %v2735_v45, %v4955_v41  ;;  %v7489_v45 = vld [vmem:[#allocation18_spill] sm:$0xff] }
 0x3cb   :  { %v4175_v46 = vcombine.high %v4165_v7, %v7456_v35  ;;  %v3995_v10 = vcombine.high %v3985_v36, %v7456_v35 }
 0x3cc   :  { %v3021_v28 = vcombine.low %v6527_v23, %v6519_v26  ;;  %v4240_v11 = vrot.slane %v4226_v21, %v4973_v50  ;;  %v2767_v53 = vcombine.low %v6559_v9, %v6553_v12  ;;  %v4429_v21 = vcombine.high %v4419_v40, %v7456_v35 }
 0x3ce   :  { %4002 = vrot.lane.b32.xlu1 %v3908_v19, %s4821_s21  ;;  %3306 = vrot.lane.b32.xlu0 %v6438_v15, %s4821_s21  ;;  %v6546_v57 = vrot.slane %v3021_v28, %v4973_v50  ;;  %v6570_v19 = vpop.permute.xlu0 %2647  ;;  %v6575_v47 = vrot.slane %v2767_v53, %v4973_v50  ;;  %v6577_v28 = vpop.permute.xlu1 %2643  ;;  %v3656_v15 = vcombine.high %v6238_v56, %v6258_v17 }
 0x3cf   :  { %v3862_v56 = vcombine.high %v5986_v38, %v5994_v13  ;;  %v3878_v17 = vcombine.high %v5990_v27, %v5998_v30 }
 0x3d0   :  { %7487 = vst [vmem:[#allocation34_spill] sm:$0xff] %v6546_v57  ;;  %v3053_v49 = vcombine.high %v6546_v57, %v7456_v35  ;;  %7488 = vst [vmem:[#allocation35_spill] sm:$0xff] %v6575_v47 }
 0x3d1   :  { %v6618_v27 = vrot.slane %v3862_v56, %v4955_v41  ;;  %v6621_v13 = vrot.slane %v3878_v17, %v4955_v41  ;;  %v7494_v56 = vld [vmem:[#allocation29_spill] sm:$0xff] }
 0x3d2   :  { %4258 = vrot.lane.b32.xlu1 %v4165_v7, %s4822_s22  ;;  %3560 = vrot.lane.b32.xlu0 %v3506_v62, %s4821_s21  ;;  %v2799_v7 = vcombine.high %v6575_v47, %v7456_v35 }
 0x3d3   :  { %v3909_v53 = vcombine.low %v6618_v27, %v6621_v13 }
 0x3d6   :  { %4512 = vrot.lane.b32.xlu1 %v4419_v40, %s4822_s22  ;;  %3816 = vrot.lane.b32.xlu0 %v3763_v20, %s4822_s22  ;;  %v6588_v40 = vpop.permute.xlu0 %2655 }
 0x3da   :  { %3274 = vrot.lane.b32.xlu1 %v3201_v39, %s4824_s24  ;;  %4038 = vrot.lane.b32.xlu0 %v3985_v36, %s4822_s22  ;;  %v3524_v39 = vcombine.high %v3506_v62, %v7456_v35  ;;  %v3170_v62 = vcombine.high %v6446_v5, %v6449_v43  ;;  %v3424_v5 = vcombine.high %v6494_v18, %v6488_v42  ;;  %v6615_v38 = vpop.permute.xlu0 %2901 }
 0x3db   :  { %v6610_v43 = vrot.slane %v3640_v8, %v4955_v41  ;;  %v4244_v18 = vcombine.high %v4240_v11, %v7456_v35  ;;  %v7493_v8 = vld [vmem:[#allocation30_spill] sm:$0xff] }
 0x3dc   :  { %v6606_v54 = vrot.slane %v3170_v62, %v4973_v50  ;;  %v6626_v42 = vrot.slane %v3424_v5, %v4973_v50  ;;  %v3476_v17 = vcombine.high %v7494_v56, %v7493_v8  ;;  %v6665_v5 = vrot.slane %v3909_v53, %v4973_v50 }
 0x3de   :  { %4294 = vrot.lane.b32.xlu0 %v4240_v11, %s4823_s23  ;;  %3528 = vrot.lane.b32.xlu1 %v3455_v48, %s4824_s24  ;;  %v3773_v48 = vcombine.high %v3763_v20, %v7456_v35  ;;  %v6601_v20 = vrot.slane %v3656_v15, %v4955_v41  ;;  %v2683_v11 = vcombine.low %v6570_v19, %v6588_v40 }
 0x3e0   :  { %v3687_v30 = vcombine.low %v6610_v43, %v6601_v20 }
 0x3e2   :  { %4548 = vrot.lane.b32.xlu0 %v4494_v37, %s4823_s23  ;;  %3784 = vrot.lane.b32.xlu1 %v3704_v25, %s4825_s25  ;;  %v6594_v25 = vpop.permute.xlu1 %2651  ;;  %v6645_v15 = vrot.slane %v3687_v30, %v4973_v50  ;;  %v3022_v30 = vcombine.high %v6527_v23, %v6519_v26  ;;  %v4412_v26 = vcombine.high %v6464_v4, %v6452_v1 }
 0x3e3   :  { %v2667_v62 = vcombine.low %v6577_v28, %v6594_v25 }
 0x3e5   :  { %v2675_v53 = vrot.slane %v2667_v62, %v4955_v41  ;;  %v6701_v62 = vrot.slane %v3022_v30, %v4973_v50  ;;  %v4426_v30 = vrot.slane %v4412_v26, %v4973_v50 }
 0x3e6   :  { %4006 = vrot.lane.b32.xlu1 %v3926_v33, %s4825_s25  ;;  %3086 = vrot.lane.b32.xlu0 %v3053_v49, %s4824_s24  ;;  %v6629_v36 = vpop.permute.xlu1 %2897  ;;  %v7490_v33 = vld [vmem:[#allocation16_spill] sm:$0xff] }
 0x3e7   :  { %v3222_v49 = vcombine.high %v7490_v33, %v7489_v45  ;;  %v7496_v33 = vld [vmem:[#allocation26_spill] sm:$0xff] }
 0x3ea   :  { %4262 = vrot.lane.b32.xlu1 %v4175_v46, %s4826_s26  ;;  %3310 = vrot.lane.b32.xlu0 %v3270_v14, %s4825_s25  ;;  %v7491_v46 = vld [vmem:[#allocation17_spill] sm:$0xff]  ;;  %v7492_v14 = vld [vmem:[#allocation15_spill] sm:$0xff] }
 0x3ee   :  { %4516 = vrot.lane.b32.xlu1 %v4429_v21, %s4826_s26  ;;  %3564 = vrot.lane.b32.xlu0 %v3524_v39, %s4825_s25  ;;  %v3206_v21 = vcombine.high %v7492_v14, %v7491_v46  ;;  %v2768_v39 = vcombine.high %v6559_v9, %v6553_v12  ;;  %v6656_v12 = vrot.slane %v3222_v49, %v4955_v41 }
 0x3ef   :  { %v4158_v9 = vcombine.high %v6424_v29, %v6405_v2  ;;  %v7495_v29 = vld [vmem:[#allocation28_spill] sm:$0xff] }
 0x3f0   :  { %v6676_v2 = vrot.slane %v2768_v39, %v4973_v50  ;;  %v3460_v49 = vcombine.high %v7496_v33, %v7495_v29  ;;  %v3756_v29 = vcombine.high %v6467_v63, %v6455_v34 }
 0x3f1   :  { %v6690_v23 = vrot.slane %v4158_v9, %v4973_v50 }
 0x3f2   :  { %2832 = vrot.lane.b32.xlu1 %v2799_v7, %s4824_s24  ;;  %3820 = vrot.lane.b32.xlu0 %v3773_v48, %s4826_s26  ;;  %v4498_v7 = vcombine.high %v4494_v37, %v7456_v35  ;;  %v6648_v48 = vpop.permute.xlu0 %2909  ;;  %v6662_v37 = vpop.permute.xlu1 %2905  ;;  %v6704_v8 = vrot.slane %v3460_v49, %v4955_v41  ;;  %v6745_v34 = vrot.slane %v3756_v29, %v4973_v50 }
 0x3f3   :  { %v2937_v45 = vcombine.low %v6615_v38, %v6648_v48  ;;  %v2921_v46 = vcombine.low %v6629_v36, %v6662_v37  ;;  %v3202_v29 = vcombine.high %v6606_v54, %v7456_v35 }
 0x3f5   :  { %v2929_v1 = vrot.slane %v2921_v46, %v4955_v41 }
 0x3f6   :  { %3278 = vrot.lane.b32.xlu1 %v6606_v54, %s4821_s21  ;;  %4042 = vrot.lane.b32.xlu0 %v3995_v10, %s4826_s26  ;;  %v6668_v10 = vrot.slane %v3206_v21, %v4955_v41  ;;  %v6695_v21 = vrot.slane %v3476_v17, %v4955_v41 }
 0x3f8   :  { %v3253_v14 = vcombine.low %v6668_v10, %v6656_v12  ;;  %v3507_v9 = vcombine.low %v6704_v8, %v6695_v21 }
 0x3fa   :  { %3532 = vrot.lane.b32.xlu1 %v6626_v42, %s4821_s21  ;;  %4298 = vrot.lane.b32.xlu0 %v4244_v18, %s4827_s27  ;;  %v2691_v18 = vrot.slane %v2683_v11, %v4955_v41  ;;  %v2945_v11 = vrot.slane %v2937_v45, %v4955_v41  ;;  %v6712_v4 = vrot.slane %v3253_v14, %v4973_v50 }
 0x3fb   :  { %v6730_v49 = vrot.slane %v3507_v9, %v4973_v50  ;;  %v3978_v9 = vcombine.high %v6478_v24, %v6481_v51  ;;  %v4756_v24 = vld [vmem:[#allocation2 + $0x8] ss:$48 sps:$4 sm:$0xff]  }
 0x3fc   :  { %v2699_v39 = vcombine.low %v2675_v53, %v2691_v18  ;;  %v2953_v56 = vcombine.low %v2929_v1, %v2945_v11  ;;  %v6740_v14 = vpop.permute.xlu1 %4274  ;;  %v2700_v51 = vcombine.high %v2675_v53, %v2691_v18  ;;  %v2495_v54 = vrot.slane %v4756_v24, %v4955_v41 }
 0x3fd   :  { %v6759_v6 = vrot.slane %v3978_v9, %v4973_v50  ;;  %v3456_v9 = vcombine.high %v6626_v42, %v7456_v35  ;;  %v2954_v57 = vcombine.high %v2929_v1, %v2945_v11  ;;  %v3927_v24 = vcombine.high %v6665_v5, %v7456_v35 }
 0x3fe   :  { %3788 = vrot.lane.b32.xlu1 %v6645_v15, %s4822_s22  ;;  %4552 = vrot.lane.b32.xlu0 %v4498_v7, %s4827_s27  ;;  %v6720_v45 = vrot.slane %v2699_v39, %v4973_v50  ;;  %v6735_v26 = vrot.slane %v2953_v56, %v4973_v50  ;;  %v6781_v53 = vrot.slane %v2700_v51, %v4973_v50  ;;  %v7503_v51 = vld [vmem:[#allocation14_spill] sm:$0xff] }
 0x3ff   :  { %v6794_v1 = vrot.slane %v2954_v57, %v4973_v50 }
 0x400   :  { %7497 = vst [vmem:[#allocation18_spill] sm:$0xff] %v6720_v45  ;;  %v2731_v46 = vcombine.high %v6720_v45, %v7456_v35  ;;  %7498 = vst [vmem:[#allocation16_spill] sm:$0xff] %v6735_v26  ;;  %v2985_v63 = vcombine.high %v6735_v26, %v7456_v35  ;;  %v4758_v45 = vld [vmem:[#allocation2 + $0x20] ss:$48 sps:$4 sm:$0xff]  }
 0x401   :  { %v2511_v42 = vrot.slane %v4758_v45, %v4955_v41  ;;  %v3439_v45 = vcombine.low %v6367_v59, %v6370_v32 }
 0x402   :  { %4010 = vrot.lane.b32.xlu1 %v6665_v5, %s4822_s22  ;;  %2836 = vrot.lane.b32.xlu0 %v6676_v2, %s4821_s21  ;;  %v4176_v5 = vcombine.high %v6690_v23, %v7456_v35 }
 0x404   :  { %v6698_v7 = vpop.permute.xlu0 %4528 }
 0x406   :  { %4266 = vrot.lane.b32.xlu1 %v6690_v23, %s4823_s23  ;;  %3090 = vrot.lane.b32.xlu0 %v6701_v62, %s4821_s21 }
 0x408   :  { %v6716_v17 = vpop.permute.xlu0 %4278 }
 0x40a   :  { %4520 = vrot.lane.b32.xlu1 %v4426_v30, %s4823_s23  ;;  %3314 = vrot.lane.b32.xlu0 %v6712_v4, %s4822_s22 }
 0x40c   :  { %v6727_v33 = vpop.permute.xlu0 %4532  ;;  %v6754_v56 = vpop.permute.xlu1 %4246 }
 0x40d   :  { %7499 = vst [vmem:[#allocation17_spill] sm:$0xff] %v6754_v56  ;;  %v4430_v56 = vcombine.high %v4426_v30, %v7456_v35  ;;  %v3705_v30 = vcombine.high %v6645_v15, %v7456_v35 }
 0x40e   :  { %3568 = vrot.lane.b32.xlu0 %v6730_v49, %s4822_s22  ;;  %2804 = vrot.lane.b32.xlu1 %v2731_v46, %s4824_s24 }
 0x410   :  { %v6742_v39 = vpop.permute.xlu0 %4026 }
 0x412   :  { %3824 = vrot.lane.b32.xlu0 %v6745_v34, %s4823_s23  ;;  %3058 = vrot.lane.b32.xlu1 %v2985_v63, %s4824_s24 }
 0x414   :  { %v6756_v46 = vpop.permute.xlu0 %4282  ;;  %v6766_v26 = vpop.permute.xlu1 %4500 }
 0x415   :  { %7500 = vst [vmem:[#allocation15_spill] sm:$0xff] %v6766_v26  ;;  %v2519_v26 = vcombine.low %v2495_v54, %v2511_v42 }
 0x416   :  { %4046 = vrot.lane.b32.xlu0 %v6759_v6, %s4823_s23  ;;  %3282 = vrot.lane.b32.xlu1 %v3202_v29, %s4825_s25 }
 0x417   :  { %v6815_v47 = vrot.slane %v2519_v26, %v4973_v50  ;;  %v2752_v26 = vcombine.high %v6380_v55, %v6400_v61  ;;  %v2520_v55 = vcombine.high %v2495_v54, %v2511_v42 }
 0x418   :  { %v6768_v63 = vpop.permute.xlu0 %4536 }
 0x419   :  { %7501 = vst [vmem:[#allocation30_spill] sm:$0xff] %v6768_v63  ;;  %7506 = vst [vmem:[#allocation26_spill] sm:$0xff] %v6815_v47  ;;  %v2551_v23 = vcombine.high %v6815_v47, %v7456_v35  ;;  %v3910_v47 = vcombine.high %v6618_v27, %v6621_v13  ;;  %v6853_v61 = vrot.slane %v2752_v26, %v4955_v41 }
 0x41a   :  { %4524 = vrot.lane.b32.xlu0 %v4430_v56, %s4827_s27  ;;  %3536 = vrot.lane.b32.xlu1 %v3456_v9, %s4825_s25  ;;  %v7504_v9 = vld [vmem:[#allocation13_spill] sm:$0xff]  ;;  %v2990_v13 = vcombine.high %v6461_v60, %v6498_v52 }
 0x41b   :  { %v3185_v15 = vcombine.low %v7504_v9, %v7503_v51  ;;  %v3924_v27 = vrot.slane %v3910_v47, %v4973_v50 }
 0x41c   :  { %v6776_v29 = vpop.permute.xlu1 %3804  ;;  %v6778_v18 = vpop.permute.xlu0 %3808  ;;  %v6884_v60 = vrot.slane %v2990_v13, %v4955_v41  ;;  %v3774_v13 = vcombine.high %v6745_v34, %v7456_v35  ;;  %v3996_v34 = vcombine.high %v6759_v6, %v7456_v35 }
 0x41d   :  { %v6810_v57 = vrot.slane %v3185_v15, %v4973_v50  ;;  %v6827_v15 = vrot.slane %v3439_v45, %v4973_v50  ;;  %v2800_v45 = vcombine.high %v6676_v2, %v7456_v35 }
 0x41e   :  { %2808 = vrot.lane.b32.xlu0 %v6781_v53, %s4821_s21  ;;  %3792 = vrot.lane.b32.xlu1 %v3705_v30, %s4826_s26 }
 0x420   :  { %v6789_v56 = vpop.permute.xlu1 %4250  ;;  %v6791_v11 = vpop.permute.xlu0 %4030 }
 0x421   :  { %7502 = vst [vmem:[#allocation29_spill] sm:$0xff] %v6789_v56 }
 0x422   :  { %3062 = vrot.lane.b32.xlu0 %v6794_v1, %s4821_s21  ;;  %4014 = vrot.lane.b32.xlu1 %v3927_v24, %s4826_s26  ;;  %v3688_v24 = vcombine.high %v6610_v43, %v6601_v20 }
 0x424   :  { %v6805_v30 = vpop.permute.xlu1 %4504  ;;  %v6807_v56 = vpop.permute.xlu0 %4286  ;;  %v6841_v43 = vrot.slane %v3688_v24, %v4973_v50  ;;  %v3006_v24 = vcombine.high %v6442_v0, %v6491_v44 }
 0x425   :  { %7505 = vst [vmem:[#allocation28_spill] sm:$0xff] %v6805_v30 }
 0x426   :  { %3286 = vrot.lane.b32.xlu0 %v6810_v57, %s4822_s22  ;;  %4270 = vrot.lane.b32.xlu1 %v4176_v5, %s4827_s27  ;;  %v6874_v44 = vrot.slane %v3006_v24, %v4955_v41 }
 0x428   :  { %v6822_v30 = vpop.permute.xlu1 %3776  ;;  %v6824_v63 = vpop.permute.xlu0 %4540  ;;  %v3037_v52 = vcombine.low %v6884_v60, %v6874_v44 }
 0x429   :  { %7507 = vst [vmem:[#allocation14_spill] sm:$0xff] %v6824_v63  ;;  %v2736_v63 = vcombine.high %v6387_v31, %v6407_v22  ;;  %v3054_v31 = vcombine.high %v6701_v62, %v7456_v35  ;;  %v2534_v62 = vrot.slane %v2520_v55, %v4973_v50  ;;  %v3525_v55 = vcombine.high %v6730_v49, %v7456_v35 }
 0x42a   :  { %3540 = vrot.lane.b32.xlu0 %v6827_v15, %s4822_s22  ;;  %2584 = vrot.lane.b32.xlu1 %v2551_v23, %s4824_s24 }
 0x42b   :  { %v6865_v22 = vrot.slane %v2736_v63, %v4955_v41  ;;  %v3271_v63 = vcombine.high %v6712_v4, %v7456_v35 }
 0x42c   :  { %v6836_v5 = vpop.permute.xlu1 %3998  ;;  %v6838_v20 = vpop.permute.xlu0 %3556 }
 0x42d   :  { %7508 = vst [vmem:[#allocation13_spill] sm:$0xff] %v6836_v5  ;;  %v2783_v0 = vcombine.low %v6865_v22, %v6853_v61 }
 0x42e   :  { %3796 = vrot.lane.b32.xlu0 %v6841_v43, %s4823_s23  ;;  %2840 = vrot.lane.b32.xlu1 %v2800_v45, %s4825_s25 }
 0x42f   :  { %v2791_v45 = vrot.slane %v2783_v0, %v4973_v50  ;;  %v3508_v0 = vcombine.high %v6704_v8, %v6695_v21 }
 0x430   :  { %v6857_v23 = vpop.permute.xlu1 %4254  ;;  %v6859_v2 = vpop.permute.xlu0 %3812 }
 0x431   :  { %7509 = vst [vmem:[#allocation36_spill] sm:$0xff] %v6857_v23 }
 0x432   :  { %4018 = vrot.lane.b32.xlu0 %v3924_v27, %s4823_s23  ;;  %3094 = vrot.lane.b32.xlu1 %v3054_v31, %s4825_s25  ;;  %v3045_v31 = vrot.slane %v3037_v52, %v4973_v50 }
 0x434   :  { %v6876_v47 = vpop.permute.xlu1 %4508  ;;  %v6878_v54 = vpop.permute.xlu0 %4034 }
 0x435   :  { %7510 = vst [vmem:[#allocation37_spill] sm:$0xff] %v6876_v47 }
 0x436   :  { %2588 = vrot.lane.b32.xlu0 %v2534_v62, %s4821_s21  ;;  %3318 = vrot.lane.b32.xlu1 %v3271_v63, %s4826_s26  ;;  %v3254_v63 = vcombine.high %v6668_v10, %v6656_v12 }
 0x438   :  { %v6890_v42 = vpop.permute.xlu1 %3302  ;;  %v6892_v26 = vpop.permute.xlu0 %4290  ;;  %v3268_v52 = vrot.slane %v3254_v63, %v4973_v50  ;;  %v2732_v63 = vcombine.high %v6781_v53, %v7456_v35 }
 0x43a   :  { %2844 = vrot.lane.b32.xlu0 %v2791_v45, %s4822_s22  ;;  %3572 = vrot.lane.b32.xlu1 %v3525_v55, %s4826_s26  ;;  %v7512_v55 = vld [vmem:[#allocation20_spill] sm:$0xff] }
 0x43c   :  { %v6899_v4 = vpop.permute.xlu1 %3780  ;;  %v6901_v24 = vpop.permute.xlu0 %4544 }
 0x43d   :  { %7511 = vst [vmem:[#allocation38_spill] sm:$0xff] %v6901_v24 }
 0x43e   :  { %3098 = vrot.lane.b32.xlu0 %v3045_v31, %s4822_s22  ;;  %3828 = vrot.lane.b32.xlu1 %v3774_v13, %s4827_s27 }
 0x43f   :  { %v2353_v49 = vpop.f32.mrf.mxu0 }
 0x440   :  { %v2354_v23 = vadd.f32 %v2353_v49, %v7512_v55  ;;  %v6913_v47 = vpop.permute.xlu1 %4002  ;;  %v6915_v5 = vpop.permute.xlu0 %3306  ;;  %v3522_v49 = vrot.slane %v3508_v0, %v4973_v50 }
 0x441   :  { %v2355_v12 = vpop.f32.mrf.mxu0 }
 0x442   :  { %v2358_v10 = vmax.f32 %v2354_v23, 0.0  ;;  %v2356_v24 = vadd.f32 %v2355_v12, %v7512_v55  ;;  %3322 = vrot.lane.b32.xlu0 %v3268_v52, %s4823_s23  ;;  %4050 = vrot.lane.b32.xlu1 %v3996_v34, %s4827_s27  ;;  %v2986_v55 = vcombine.high %v6794_v1, %v7456_v35  ;;  %v2552_v34 = vcombine.high %v2534_v62, %v7456_v35 }
 0x443   :  { %v3203_v12 = vcombine.high %v6810_v57, %v7456_v35  ;;  %v2684_v1 = vcombine.high %v6570_v19, %v6588_v40  ;;  %v2668_v62 = vcombine.high %v6577_v28, %v6594_v25  ;;  %v4760_v57 = vld [vmem:[#allocation2 + $0xc] ss:$48 sps:$4 sm:$0xff]   ;;  %v2938_v40 = vcombine.high %v6615_v38, %v6648_v48 }
 0x444   :  { %2360 = vst [vmem:[#allocation7] sm:$0xff] %v2358_v10  ;;  %v2359_v21 = vmax.f32 %v2356_v24, 0.0  ;;  %v6923_v8 = vpop.permute.xlu1 %4258  ;;  %v6925_v13 = vpop.permute.xlu0 %3560  ;;  %v3928_v24 = vcombine.high %v3924_v27, %v7456_v35  ;;  %v3055_v28 = vcombine.high %v3045_v31, %v7456_v35  ;;  %v6983_v38 = vrot.slane %v4760_v57, %v4955_v41 }
 0x445   :  { %v6964_v19 = vrot.slane %v2684_v1, %v4955_v41  ;;  %v6976_v25 = vrot.slane %v2668_v62, %v4955_v41  ;;  %v6991_v31 = vrot.slane %v2938_v40, %v4955_v41  ;;  %v3272_v62 = vcombine.high %v3268_v52, %v7456_v35 }
 0x446   :  { %2361 = vst [vmem:[#allocation7 + $0x8] sm:$0xff] %v2359_v21  ;;  %3576 = vrot.lane.b32.xlu0 %v3522_v49, %s4823_s23  ;;  %2812 = vrot.lane.b32.xlu1 %v2732_v63, %s4825_s25  ;;  %v2801_v21 = vcombine.high %v2791_v45, %v7456_v35  ;;  %v3457_v63 = vcombine.high %v6827_v15, %v7456_v35 }
 0x447   :  { %v3706_v15 = vcombine.high %v6841_v43, %v7456_v35  ;;  %v2715_v43 = vcombine.low %v6976_v25, %v6964_v19 }
 0x448   :  { %v6932_v6 = vpop.permute.xlu1 %4512  ;;  %v6934_v23 = vpop.permute.xlu0 %3816 }
 0x44a   :  { %4022 = vrot.lane.b32.xlu0 %v3928_v24, %s4827_s27  ;;  %3066 = vrot.lane.b32.xlu1 %v2986_v55, %s4825_s25  ;;  %v4761_v24 = vld [vmem:[#allocation2 + $0x24] ss:$48 sps:$4 sm:$0xff]  }
 0x44b   :  { %v6986_v48 = vrot.slane %v4761_v24, %v4955_v41  ;;  %v3336_v24 = vsel %vm292_vm3, %v6385_v3, %v6890_v42  ;;  %v7516_v3 = vld [vmem:[#allocation27_spill] sm:$0xff]  ;;  %v7517_v42 = vld [vmem:[#allocation33_spill] sm:$0xff] }
 0x44c   :  { %v6941_v0 = vpop.permute.xlu1 %3274  ;;  %v6943_v53 = vpop.permute.xlu0 %4038  ;;  %v3337_v52 = vsel %vm294_vm4, %v3336_v24, %v6915_v5  ;;  %v3838_v5 = vsel %vm292_vm3, %v7516_v3, %v6776_v29 }
 0x44d   :  { %v2535_v40 = vcombine.low %v6983_v38, %v6986_v48 }
 0x44e   :  { %2592 = vrot.lane.b32.xlu0 %v2552_v34, %s4825_s25  ;;  %3290 = vrot.lane.b32.xlu1 %v3203_v12, %s4826_s26  ;;  %v2922_v34 = vcombine.high %v6629_v36, %v6662_v37  ;;  %v7513_v36 = vld [vmem:[#allocation11_spill] sm:$0xff]  ;;  %v7514_v37 = vld [vmem:[#allocation10_spill] sm:$0xff] }
 0x450   :  { %v6952_v27 = vpop.permute.xlu1 %3528  ;;  %v6954_v10 = vpop.permute.xlu0 %4294  ;;  %v7003_v57 = vrot.slane %v2922_v34, %v4955_v41 }
 0x452   :  { %2848 = vrot.lane.b32.xlu0 %v2801_v21, %s4826_s26  ;;  %3544 = vrot.lane.b32.xlu1 %v3457_v63, %s4826_s26  ;;  %v7515_v21 = vcombine.high %v7513_v36, %v7514_v37  ;;  %v7019_v36 = vrot.slane %v2715_v43, %v4973_v50  ;;  %v3526_v37 = vcombine.high %v3522_v49, %v7456_v35 }
 0x453   :  { %v2784_v43 = vcombine.high %v6865_v22, %v6853_v61  ;;  %v3038_v22 = vcombine.high %v6884_v60, %v6874_v44 }
 0x454   :  { %v6968_v55 = vpop.permute.xlu1 %3784  ;;  %v6970_v45 = vpop.permute.xlu0 %4548  ;;  %v2466_v63 = vrot.slane %v7515_v21, %v4973_v50 }
 0x456   :  { %3800 = vrot.lane.b32.xlu1 %v3706_v15, %s4827_s27  ;;  %3102 = vrot.lane.b32.xlu0 %v3055_v28, %s4826_s26  ;;  %v2969_v15 = vcombine.low %v7003_v57, %v6991_v31 }
 0x458   :  { %v6993_v12 = vpop.permute.xlu1 %4006  ;;  %v6995_v1 = vpop.permute.xlu0 %3086 }
 0x45a   :  { %2560 = vrot.lane.b32.xlu1 %v2466_v63, %s4821_s21  ;;  %3326 = vrot.lane.b32.xlu0 %v3272_v62, %s4827_s27  ;;  %v3590_v62 = vsel %vm292_vm3, %v7517_v42, %v6838_v20  ;;  %v3839_v20 = vsel %vm294_vm4, %v3838_v5, %v6778_v18  ;;  %v7518_v18 = vcombine.high %v7504_v9, %v7503_v51  ;;  %v7520_v51 = vld [vmem:[#allocation21_spill] sm:$0xff] }
 0x45b   :  { %v3591_v49 = vsel %vm294_vm4, %v3590_v62, %v6925_v13  ;;  %v3840_v61 = vsel %vm296_vm5, %v3839_v20, %v6859_v2  ;;  %v7070_v5 = vrot.slane %v2784_v43, %v4973_v50  ;;  %v7519_v2 = vld [vmem:[#allocation24_spill] sm:$0xff]  ;;  %v4308_v9 = vsel %vm292_vm3, %v7520_v51, %v6740_v14  ;;  %v7526_v51 = vld [vmem:[#allocation38_spill] sm:$0xff] }
 0x45c   :  { %v7016_v28 = vpop.permute.xlu1 %4262  ;;  %v3311_v34 = vpop.permute.xlu0 %3310  ;;  %v3841_v13 = vsel %vm298_vm6, %v3840_v61, %v6934_v23  ;;  %v7067_v3 = vrot.slane %v7518_v18, %v4973_v50  ;;  %v4060_v42 = vsel %vm292_vm3, %v7519_v2, %v6742_v39  ;;  %v7521_v39 = vcombine.high %v6367_v59, %v6370_v32 }
 0x45d   :  { %v7023_v21 = vsel %vm296_vm5, %v3337_v52, %v3311_v34  ;;  %v7041_v34 = vrot.slane %v2969_v15, %v4973_v50  ;;  %v4061_v60 = vsel %vm294_vm4, %v4060_v42, %v6791_v11  ;;  %v4309_v11 = vsel %vm294_vm4, %v4308_v9, %v6716_v17  ;;  %v7522_v17 = vld [vmem:[#allocation22_spill] sm:$0xff] }
 0x45e   :  { %2816 = vrot.lane.b32.xlu1 %v7019_v36, %s4822_s22  ;;  %3580 = vrot.lane.b32.xlu0 %v3526_v37, %s4827_s27  ;;  %v7044_v37 = vrot.slane %v2535_v40, %v4973_v50  ;;  %v4062_v23 = vsel %vm296_vm5, %v4061_v60, %v6878_v54  ;;  %v3454_v62 = vrot.slane %v7521_v39, %v4973_v50  ;;  %v4765_v39 = vld [vmem:[#allocation2] sm:$0xff] }
 0x45f   :  { %v3329_v43 = vsel %vm292_vm3, %v6501_v58, %v6941_v0  ;;  %v7101_v20 = vrot.slane %v3038_v22, %v4973_v50  ;;  %v4310_v54 = vsel %vm296_vm5, %v4309_v11, %v6756_v46  ;;  %v4562_v0 = vsel %vm292_vm3, %v7522_v17, %v6698_v7  ;;  %v7523_v7 = vld [vmem:[#allocation30_spill] sm:$0xff]  ;;  %v4766_v11 = vld [vmem:[#allocation2 + $0x18] sm:$0xff] }
 0x460   :  { %v7038_v24 = vpop.permute.xlu1 %4516  ;;  %v3565_v52 = vpop.permute.xlu0 %3564  ;;  %v4311_v58 = vsel %vm298_vm6, %v4310_v54, %v6807_v56  ;;  %v4563_v61 = vsel %vm294_vm4, %v4562_v0, %v6727_v33  ;;  %v3583_v56 = vsel %vm292_vm3, %v6524_v16, %v6952_v27  ;;  %v3458_v18 = vcombine.high %v3454_v62, %v7456_v35  ;;  %v7524_v33 = vld [vmem:[#allocation31_spill] sm:$0xff]  ;;  %v7525_v16 = vld [vmem:[#allocation14_spill] sm:$0xff] }
 0x461   :  { %v7047_v29 = vsel %vm296_vm5, %v3591_v49, %v3565_v52  ;;  %v4063_v49 = vsel %vm298_vm6, %v4062_v23, %v6943_v53  ;;  %v4312_v46 = vsel %vm300_vm7, %v4311_v58, %v6892_v26  ;;  %v2484_v53 = vcombine.high %v2466_v63, %v7456_v35  ;;  %v4764_v23 = vld [vmem:[#allocation2 + $0x30] sm:$0xff] }
 0x462   :  { %3070 = vrot.lane.b32.xlu1 %v7041_v34, %s4822_s22  ;;  %2596 = vrot.lane.b32.xlu0 %v7044_v37, %s4822_s22  ;;  %v4313_v22 = vsel %vm302_vm8, %v4312_v46, %v6954_v10  ;;  %v4564_v2 = vsel %vm296_vm5, %v4563_v61, %v7523_v7  ;;  %v3831_v42 = vsel %vm292_vm3, %v7524_v33, %v6822_v30  ;;  %v7527_v46 = vld [vmem:[#allocation13_spill] sm:$0xff] }
 0x463   :  { %v4565_v27 = vsel %vm298_vm6, %v4564_v2, %v7525_v16  ;;  %v3832_v60 = vsel %vm294_vm4, %v3831_v42, %v6899_v4  ;;  %v2733_v4 = vcombine.high %v7019_v36, %v7456_v35  ;;  %v2553_v58 = vcombine.high %v7044_v37, %v7456_v35 }
 0x464   :  { %v7061_v40 = vpop.permute.xlu1 %2832  ;;  %v3821_v15 = vpop.permute.xlu0 %3820  ;;  %v4566_v9 = vsel %vm300_vm7, %v4565_v27, %v7526_v51  ;;  %v3056_v42 = vcombine.high %v7101_v20, %v7456_v35 }
 0x465   :  { %v7076_v44 = vsel %vm300_vm7, %v3841_v13, %v3821_v15 }
 0x466   :  { %3294 = vrot.lane.b32.xlu1 %v7067_v3, %s4823_s23  ;;  %2852 = vrot.lane.b32.xlu0 %v7070_v5, %s4823_s23 }
 0x468   :  { %v3279_v52 = vpop.permute.xlu1 %3278  ;;  %v4043_v14 = vpop.permute.xlu0 %4042 }
 0x469   :  { %v7106_v59 = vsel %vm294_vm4, %v3329_v43, %v3279_v52  ;;  %v7109_v32 = vsel %vm300_vm7, %v4063_v49, %v4043_v14  ;;  %v4767_v43 = vld [vmem:[#allocation2 + $0x48] sm:$0xff]  ;;  %v3833_v49 = vsel %vm296_vm5, %v3832_v60, %v6968_v55  ;;  %v4567_v52 = vsel %vm302_vm8, %v4566_v9, %v6970_v45 }
 0x46a   :  { %3548 = vrot.lane.b32.xlu1 %v3454_v62, %s4823_s23  ;;  %3106 = vrot.lane.b32.xlu0 %v7101_v20, %s4823_s23  ;;  %v2420_v62 = vcombine.high %v4765_v39, %v4764_v23  ;;  %v2436_v30 = vcombine.high %v4766_v11, %v4767_v43  ;;  %v7532_v11 = vld [vmem:[#allocation25_spill] sm:$0xff] }
 0x46c   :  { %v3533_v13 = vpop.permute.xlu1 %3532  ;;  %v4299_v15 = vpop.permute.xlu0 %4298  ;;  %v7167_v36 = vrot.slane %v2420_v62, %v4955_v41  ;;  %v7170_v37 = vrot.slane %v2436_v30, %v4955_v41  ;;  %v7531_v62 = vld [vmem:[#allocation15_spill] sm:$0xff]  ;;  %v7533_v30 = vld [vmem:[#allocation28_spill] sm:$0xff] }
 0x46d   :  { %v7133_v26 = vsel %vm294_vm4, %v3583_v56, %v3533_v13  ;;  %v4314_v63 = vsel %vm304_vm9, %v4313_v22, %v4299_v15  ;;  %v7529_v56 = vld [vmem:[#allocation35_spill] sm:$0xff]  ;;  %v4555_v43 = vsel %vm292_vm3, %v7532_v11, %v7531_v62 }
 0x46e   :  { %v4318_v10 = vrot.slane %v4314_v63, 4  ;;  %2564 = vrot.lane.b32.xlu1 %v2484_v53, %s4825_s25  ;;  %3552 = vrot.lane.b32.xlu0 %v3458_v18, %s4827_s27  ;;  %v7528_v53 = vld [vmem:[#allocation32_spill] sm:$0xff]  ;;  %v2866_v22 = vsel %vm292_vm3, %v7529_v56, %v7061_v40  ;;  %v2987_v18 = vcombine.high %v7041_v34, %v7456_v35  ;;  %v2536_v40 = vcombine.high %v6983_v38, %v6986_v48 }
 0x46f   :  { %v4053_v55 = vsel %vm292_vm3, %v7528_v53, %v7527_v46  ;;  %v2970_v34 = vcombine.high %v7003_v57, %v6991_v31  ;;  %v2467_v16 = vcombine.low %v7167_v36, %v7170_v37  ;;  %v2716_v48 = vcombine.high %v6976_v25, %v6964_v19 }
 0x470   :  { %4322 = vst [vmem:[#allocation3 + $0x20] sm:$0xf0] %v4318_v10  ;;  %v3789_v14 = vpop.permute.xlu1 %3788  ;;  %v4553_v54 = vpop.permute.xlu0 %4552  ;;  %v4054_v45 = vsel %vm294_vm4, %v4053_v55, %v6913_v47  ;;  %v2802_v47 = vcombine.high %v7070_v5, %v7456_v35  ;;  %v7530_v5 = vld [vmem:[#allocation34_spill] sm:$0xff]  ;;  %v2550_v20 = vrot.slane %v2536_v40, %v4973_v50  ;;  %v7538_v40 = vld [vmem:[#allocation29_spill] sm:$0xff] }
 0x471   :  { %v7156_v17 = vsel %vm298_vm6, %v3833_v49, %v3789_v14  ;;  %v4568_v0 = vsel %vm304_vm9, %v4567_v52, %v4553_v54  ;;  %v4055_v61 = vsel %vm296_vm5, %v4054_v45, %v6993_v12  ;;  %v3204_v12 = vcombine.high %v7067_v3, %v7456_v35 }
 0x472   :  { %4570 = vst [vmem:[#allocation3 + $0x38] sm:$0xf] %v4568_v0  ;;  %2820 = vrot.lane.b32.xlu1 %v2733_v4, %s4826_s26  ;;  %2600 = vrot.lane.b32.xlu0 %v2553_v58, %s4826_s26  ;;  %v3120_v2 = vsel %vm292_vm3, %v7530_v5, %v6995_v1  ;;  %v2475_v57 = vrot.slane %v2467_v16, %v4973_v50  ;;  %v7534_v4 = vld [vmem:[#allocation37_spill] sm:$0xff]  ;;  %v7539_v5 = vld [vmem:[#allocation16_spill] sm:$0xff] }
 0x473   :  { %v2984_v27 = vrot.slane %v2970_v34, %v4973_v50  ;;  %v2730_v19 = vrot.slane %v2716_v48, %v4973_v50  ;;  %v2554_v39 = vcombine.high %v2550_v20, %v7456_v35  ;;  %v4556_v49 = vsel %vm294_vm4, %v4555_v43, %v7533_v30 }
 0x474   :  { %v4011_v13 = vpop.permute.xlu1 %4010  ;;  %v2837_v15 = vpop.permute.xlu0 %2836  ;;  %v2485_v54 = vcombine.high %v2475_v57, %v7456_v35  ;;  %v4557_v58 = vsel %vm296_vm5, %v4556_v49, %v7534_v4 }
 0x475   :  { %v7182_v7 = vsel %vm298_vm6, %v4055_v61, %v4011_v13  ;;  %v7185_v41 = vsel %vm294_vm4, %v2866_v22, %v2837_v15  ;;  %v2988_v25 = vcombine.high %v2984_v27, %v7456_v35  ;;  %v4558_v46 = vsel %vm298_vm6, %v4557_v58, %v6932_v6  ;;  %v7535_v13 = vld [vmem:[#allocation18_spill] sm:$0xff] }
 0x476   :  { %3074 = vrot.lane.b32.xlu1 %v2987_v18, %s4826_s26  ;;  %2856 = vrot.lane.b32.xlu0 %v2802_v47, %s4827_s27  ;;  %v4559_v53 = vsel %vm300_vm7, %v4558_v46, %v7038_v24  ;;  %v2734_v56 = vcombine.high %v2730_v19, %v7456_v35  ;;  %v2468_v22 = vcombine.high %v7167_v36, %v7170_v37  ;;  %v7536_v36 = vld [vmem:[#allocation17_spill] sm:$0xff]  ;;  %v7537_v37 = vld [vmem:[#allocation23_spill] sm:$0xff] }
 0x478   :  { %v7198_v63 = vpop.permute.xlu1 %4266  ;;  %v3091_v33 = vpop.permute.xlu0 %3090  ;;  %v2482_v47 = vrot.slane %v2468_v22, %v4973_v50 }
 0x479   :  { %v7205_v3 = vsel %vm294_vm4, %v3120_v2, %v3091_v33  ;;  %v4581_v38 = vld [vmem:[#allocation3 + $0x38] sm:$0xf] }
 0x47a   :  { %3298 = vrot.lane.b32.xlu1 %v3204_v12, %s4827_s27  ;;  %3110 = vrot.lane.b32.xlu0 %v3056_v42, %s4827_s27  ;;  %v2486_v16 = vcombine.high %v2482_v47, %v7456_v35 }
 0x47b   :  { %4693 = vmatprep.subr.msk.mxu1 %vm2280_vm10, %v4581_v38  ;;  %v7540_v38 = vld [vmem:[#allocation36_spill] sm:$0xff] }
 0x47c   :  { %v4521_v31 = vpop.permute.xlu1 %4520  ;;  %v3315_v1 = vpop.permute.xlu0 %3314 }
 0x47d   :  { %v7217_v10 = vsel %vm298_vm6, %v7023_v21, %v3315_v1  ;;  %v4560_v55 = vsel %vm302_vm8, %v4559_v53, %v4521_v31 }
 0x47e   :  { %2568 = vrot.lane.b32.xlu1 %v2475_v57, %s4822_s22  ;;  %2604 = vrot.lane.b32.xlu0 %v2550_v20, %s4823_s23 }
 0x480   :  { %v2805_v60 = vpop.permute.xlu1 %2804  ;;  %v3569_v51 = vpop.permute.xlu0 %3568 }
 0x481   :  { %v7225_v9 = vsel %vm298_vm6, %v7047_v29, %v3569_v51  ;;  %v4582_v29 = vld [vmem:[%s7413_s2] sm:$0xff]  ;;  %v2859_v24 = vsel %vm292_vm3, %v7535_v13, %v2805_v60 }
 0x482   :  { %2824 = vrot.lane.b32.xlu1 %v2730_v19, %s4823_s23  ;;  %3082 = vrot.lane.b32.xlu0 %v2988_v25, %s4827_s27 }
 0x484   :  { %v3059_v21 = vpop.permute.xlu1 %3058  ;;  %v7229_v23 = vpop.permute.xlu0 %3824 }
 0x485   :  { %v3113_v2 = vsel %vm292_vm3, %v7539_v5, %v3059_v21 }
 0x486   :  { %3078 = vrot.lane.b32.xlu1 %v2984_v27, %s4823_s23  ;;  %2608 = vrot.lane.b32.xlu0 %v2554_v39, %s4827_s27 }
 0x488   :  { %v3283_v52 = vpop.permute.xlu1 %3282  ;;  %v7242_v14 = vpop.permute.xlu0 %4046 }
 0x489   :  { %v3331_v0 = vsel %vm296_vm5, %v7106_v59, %v3283_v52 }
 0x48a   :  { %2572 = vrot.lane.b32.xlu1 %v2485_v54, %s4826_s26  ;;  %4585 = vperm.xlu0 %4715, %v4582_v29   ;;  %v7541_v29 = vld [vmem:[#allocation26_spill] sm:$0xff] }
 0x48c   :  { %v3537_v45 = vpop.permute.xlu1 %3536  ;;  %v4525_v61 = vpop.permute.xlu0 %4524 }
 0x48d   :  { %v3585_v59 = vsel %vm296_vm5, %v7133_v26, %v3537_v45  ;;  %v4561_v6 = vsel %vm304_vm9, %v4560_v55, %v4525_v61  ;;  %v4301_v26 = vsel %vm292_vm3, %v7537_v37, %v7536_v36  ;;  %v4065_v55 = vsel %vm302_vm8, %v7109_v32, %v7242_v14 }
 0x48e   :  { %4569 = vst [vmem:[#allocation3 + $0x40] sm:$0xf] %v4561_v6  ;;  %2828 = vrot.lane.b32.xlu1 %v2734_v56, %s4827_s27  ;;  %v4302_v34 = vsel %vm294_vm4, %v4301_v26, %v7538_v40 }
 0x48f   :  { %v4303_v50 = vsel %vm296_vm5, %v4302_v34, %v7540_v38 }
 0x490   :  { %v7264_v15 = vpop.permute.xlu1 %3792  ;;  %v2809_v18 = vpop.permute.xlu0 %2808  ;;  %v4304_v1 = vsel %vm298_vm6, %v4303_v50, %v6923_v8 }
 0x491   :  { %v2860_v12 = vsel %vm294_vm4, %v2859_v24, %v2809_v18  ;;  %v4305_v57 = vsel %vm300_vm7, %v4304_v1, %v7016_v28 }
 0x492   :  { %2576 = vrot.lane.b32.xlu1 %v2482_v47, %s4823_s23  ;;  %v4306_v35 = vsel %vm302_vm8, %v4305_v57, %v7198_v63 }
 0x494   :  { %v4015_v33 = vpop.permute.xlu1 %4014  ;;  %v3063_v42 = vpop.permute.xlu0 %3062 }
 0x495   :  { %v7280_v48 = vsel %vm294_vm4, %v3113_v2, %v3063_v42  ;;  %v4580_v31 = vld [vmem:[#allocation3 + $0x40] sm:$0xf] }
 0x496   :  { %2580 = vrot.lane.b32.xlu1 %v2486_v16, %s4827_s27  ;;  %4694 = vmatpush1.msk.msra.mxu1 %vm2280_vm10, %v4580_v31 }
 0x498   :  { %v4271_v20 = vpop.permute.xlu1 %4270  ;;  %v3287_v27 = vpop.permute.xlu0 %3286 }
 0x499   :  { %v4307_v60 = vsel %vm304_vm9, %v4306_v35, %v4271_v20  ;;  %v7292_v51 = vsel %vm298_vm6, %v3331_v0, %v3287_v27 }
 0x49a   :  { %v4317_v19 = vrot.slane %v4307_v60, 4 }
 0x49c   :  { %4321 = vst [vmem:[#allocation3 + $0x8] sm:$0xf0] %v4317_v19  ;;  %v2585_v8 = vpop.permute.xlu1 %2584  ;;  %v3541_v25 = vpop.permute.xlu0 %3540 }
 0x49d   :  { %v7295_v21 = vsel %vm298_vm6, %v3585_v59, %v3541_v25  ;;  %v2618_v30 = vsel %vm292_vm3, %v7541_v29, %v2585_v8 }
 0x4a0   :  { %v2841_v39 = vpop.permute.xlu1 %2840  ;;  %v3797_v62 = vpop.permute.xlu0 %3796 }
 0x4a1   :  { %v7299_v28 = vsel %vm296_vm5, %v7185_v41, %v2841_v39  ;;  %v3843_v41 = vsel %vm302_vm8, %v7076_v44, %v7229_v23  ;;  %v4057_v23 = vsel %vm300_vm7, %v7182_v7, %v4015_v33  ;;  %v3835_v7 = vsel %vm300_vm7, %v7156_v17, %v7264_v15 }
 0x4a2   :  { %v3836_v26 = vsel %vm302_vm8, %v3835_v7, %v3797_v62 }
 0x4a4   :  { %v3095_v63 = vpop.permute.xlu1 %3094  ;;  %v4019_v11 = vpop.permute.xlu0 %4018 }
 0x4a5   :  { %v7303_v43 = vsel %vm296_vm5, %v7205_v3, %v3095_v63  ;;  %v4058_v6 = vsel %vm302_vm8, %v4057_v23, %v4019_v11 }
 0x4a8   :  { %v3319_v49 = vpop.permute.xlu1 %3318  ;;  %v2589_v52 = vpop.permute.xlu0 %2588 }
 0x4a9   :  { %v7308_v54 = vsel %vm294_vm4, %v2618_v30, %v2589_v52  ;;  %v3340_v33 = vsel %vm300_vm7, %v7217_v10, %v3319_v49 }
 0x4ac   :  { %v3573_v4 = vpop.permute.xlu1 %3572  ;;  %v7310_v58 = vpop.permute.xlu0 %2844 }
 0x4ad   :  { %v3594_v17 = vsel %vm300_vm7, %v7225_v9, %v3573_v4  ;;  %v2869_v49 = vsel %vm298_vm6, %v7299_v28, %v7310_v58 }
 0x4b0   :  { %v3829_v0 = vpop.permute.xlu1 %3828  ;;  %v7315_v46 = vpop.permute.xlu0 %3098 }
 0x4b1   :  { %v3844_v3 = vsel %vm304_vm9, %v3843_v41, %v3829_v0 }
 0x4b2   :  { %v3848_v53 = vrot.slane %v3844_v3, 4 }
 0x4b4   :  { %3852 = vst [vmem:[#allocation3 + $0x28] sm:$0xf0] %v3848_v53  ;;  %v4051_v45 = vpop.permute.xlu1 %4050  ;;  %v3323_v61 = vpop.permute.xlu0 %3322  ;;  %v3123_v53 = vsel %vm298_vm6, %v7303_v43, %v7315_v46 }
 0x4b5   :  { %v4066_v56 = vsel %vm304_vm9, %v4065_v55, %v4051_v45  ;;  %v3341_v42 = vsel %vm302_vm8, %v3340_v33, %v3323_v61 }
 0x4b6   :  { %4068 = vst [vmem:[#allocation3 + $0x20] sm:$0xf] %v4066_v56 }
 0x4b8   :  { %v2813_v22 = vpop.permute.xlu1 %2812  ;;  %v3577_v59 = vpop.permute.xlu0 %3576 }
 0x4b9   :  { %v7323_v44 = vsel %vm296_vm5, %v2860_v12, %v2813_v22  ;;  %v3595_v15 = vsel %vm302_vm8, %v3594_v17, %v3577_v59  ;;  %v7542_v17 = vld [vmem:[#allocation19_spill] sm:$0xff] }
 0x4bc   :  { %v7328_v13 = vpop.permute.xlu1 %3066  ;;  %v4023_v24 = vpop.permute.xlu0 %4022 }
 0x4bd   :  { %v4059_v32 = vsel %vm304_vm9, %v4058_v6, %v4023_v24  ;;  %v4579_v14 = vld [vmem:[#allocation3 + $0x20] sm:$0xff] }
 0x4be   :  { %4067 = vst [vmem:[#allocation3 + $0x8] sm:$0xf] %v4059_v32  ;;  %4621 = vmatprep.subr.mxu1 %v4579_v14 }
 0x4c0   :  { %v3291_v18 = vpop.permute.xlu1 %3290  ;;  %v7331_v47 = vpop.permute.xlu0 %2592 }
 0x4c1   :  { %v3333_v45 = vsel %vm300_vm7, %v7292_v51, %v3291_v18  ;;  %v2620_v32 = vsel %vm296_vm5, %v7308_v54, %v7331_v47  ;;  %v3115_v18 = vsel %vm296_vm5, %v7280_v48, %v7328_v13 }
 0x4c4   :  { %v3545_v36 = vpop.permute.xlu1 %3544  ;;  %v2849_v37 = vpop.permute.xlu0 %2848 }
 0x4c5   :  { %v4578_v12 = vld [vmem:[#allocation3 + $0x8] sm:$0xff]  ;;  %v3587_v9 = vsel %vm300_vm7, %v7295_v21, %v3545_v36  ;;  %v2870_v52 = vsel %vm300_vm7, %v2869_v49, %v2849_v37 }
 0x4c6   :  { %4622 = vmatpush1.msra.mxu1 %v4578_v12 }
 0x4c8   :  { %v3801_v40 = vpop.permute.xlu1 %3800  ;;  %v3103_v34 = vpop.permute.xlu0 %3102 }
 0x4c9   :  { %v3837_v5 = vsel %vm304_vm9, %v3836_v26, %v3801_v40  ;;  %v3124_v28 = vsel %vm300_vm7, %v3123_v53, %v3103_v34 }
 0x4ca   :  { %v3847_v2 = vrot.slane %v3837_v5, 4 }
 0x4cc   :  { %3851 = vst [vmem:[#allocation3 + $0x48] sm:$0xf0] %v3847_v2  ;;  %v7341_v16 = vpop.permute.xlu1 %2560  ;;  %v3327_v38 = vpop.permute.xlu0 %3326 }
 0x4cd   :  { %v3342_v50 = vsel %vm304_vm9, %v3341_v42, %v3327_v38 }
 0x4ce   :  { %v3346_v31 = vrot.slane %v3342_v50, 4 }
 0x4d0   :  { %3350 = vst [vmem:[#allocation3 + $0x10] sm:$0xf0] %v3346_v31  ;;  %v7347_v1 = vpop.permute.xlu1 %2816  ;;  %v3581_v57 = vpop.permute.xlu0 %3580 }
 0x4d1   :  { %v3596_v10 = vsel %vm304_vm9, %v3595_v15, %v3581_v57  ;;  %v2862_v13 = vsel %vm298_vm6, %v7323_v44, %v7347_v1  ;;  %v7543_v15 = vld [vmem:[#allocation12_spill] sm:$0xff] }
 0x4d2   :  { %3598 = vst [vmem:[#allocation3 + $0x28] sm:$0xf] %v3596_v10  ;;  %v2611_v57 = vsel %vm292_vm3, %v7543_v15, %v7542_v17 }
 0x4d4   :  { %v3071_v35 = vpop.permute.xlu1 %3070  ;;  %v2597_v20 = vpop.permute.xlu0 %2596 }
 0x4d5   :  { %v2621_v36 = vsel %vm298_vm6, %v2620_v32, %v2597_v20  ;;  %v3116_v37 = vsel %vm298_vm6, %v3115_v18, %v3071_v35  ;;  %v2612_v35 = vsel %vm294_vm4, %v2611_v57, %v7341_v16  ;;  %v4571_v16 = vld [vmem:[%s7412_s1] sm:$0xff] }
 0x4d8   :  { %v3295_v27 = vpop.permute.xlu1 %3294  ;;  %v2853_v60 = vpop.permute.xlu0 %2852 }
 0x4d9   :  { %v4577_v19 = vld [vmem:[#allocation3 + $0x28] sm:$0xff]  ;;  %v2871_v4 = vsel %vm302_vm8, %v2870_v52, %v2853_v60  ;;  %v3334_v58 = vsel %vm302_vm8, %v3333_v45, %v3295_v27 }
 0x4da   :  { %4623 = vmatprep.subr.mxu1 %v4577_v19 }
 0x4dc   :  { %v3549_v8 = vpop.permute.xlu1 %3548  ;;  %v3107_v25 = vpop.permute.xlu0 %3106 }
 0x4dd   :  { %v3588_v39 = vsel %vm302_vm8, %v3587_v9, %v3549_v8  ;;  %v3125_v61 = vsel %vm302_vm8, %v3124_v28, %v3107_v25 }
 0x4e0   :  { %v7353_v62 = vpop.permute.xlu1 %2564  ;;  %v3553_v63 = vpop.permute.xlu0 %3552 }
 0x4e1   :  { %v3589_v11 = vsel %vm304_vm9, %v3588_v39, %v3553_v63  ;;  %v2613_v1 = vsel %vm296_vm5, %v2612_v35, %v7353_v62 }
 0x4e2   :  { %3597 = vst [vmem:[#allocation3 + $0x48] sm:$0xf] %v3589_v11 }
 0x4e4   :  { %v2821_v29 = vpop.permute.xlu1 %2820  ;;  %v2601_v30 = vpop.permute.xlu0 %2600 }
 0x4e5   :  { %v2622_v12 = vsel %vm300_vm7, %v2621_v36, %v2601_v30  ;;  %v2863_v2 = vsel %vm300_vm7, %v2862_v13, %v2821_v29 }
 0x4e8   :  { %v3075_v41 = vpop.permute.xlu1 %3074  ;;  %v2857_v21 = vpop.permute.xlu0 %2856 }
 0x4e9   :  { %v2872_v0 = vsel %vm304_vm9, %v2871_v4, %v2857_v21  ;;  %v4576_v3 = vld [vmem:[#allocation3 + $0x48] sm:$0xff]  ;;  %v3117_v7 = vsel %vm300_vm7, %v3116_v37, %v3075_v41 }
 0x4ea   :  { %v2876_v55 = vrot.slane %v2872_v0, 4  ;;  %4624 = vmatpush1.msra.mxu1 %v4576_v3 }
 0x4ec   :  { %2880 = vst [vmem:[#allocation3] sm:$0xf0] %v2876_v55  ;;  %v3299_v56 = vpop.permute.xlu1 %3298  ;;  %v3111_v22 = vpop.permute.xlu0 %3110 }
 0x4ed   :  { %v3335_v59 = vsel %vm304_vm9, %v3334_v58, %v3299_v56  ;;  %v3126_v23 = vsel %vm304_vm9, %v3125_v61, %v3111_v22 }
 0x4ee   :  { %v3345_v6 = vrot.slane %v3335_v59, 4  ;;  %3128 = vst [vmem:[#allocation3 + $0x10] sm:$0xf] %v3126_v23 }
 0x4f0   :  { %3349 = vst [vmem:[#allocation3 + $0x18] sm:$0xf0] %v3345_v6  ;;  %v2569_v43 = vpop.permute.xlu1 %2568  ;;  %v2605_v46 = vpop.permute.xlu0 %2604 }
 0x4f1   :  { %v2623_v26 = vsel %vm302_vm8, %v2622_v12, %v2605_v46  ;;  %v2614_v20 = vsel %vm298_vm6, %v2613_v1, %v2569_v43 }
 0x4f4   :  { %v2825_v24 = vpop.permute.xlu1 %2824  ;;  %v3083_v51 = vpop.permute.xlu0 %3082 }
 0x4f5   :  { %v4575_v14 = vld [vmem:[#allocation3 + $0x10] sm:$0xff]  ;;  %v2864_v33 = vsel %vm302_vm8, %v2863_v2, %v2825_v24 }
 0x4f6   :  { %4625 = vmatprep.subr.mxu1 %v4575_v14 }
 0x4f8   :  { %v3079_v40 = vpop.permute.xlu1 %3078  ;;  %v2609_v34 = vpop.permute.xlu0 %2608 }
 0x4f9   :  { %v3118_v54 = vsel %vm302_vm8, %v3117_v7, %v3079_v40  ;;  %v2624_v47 = vsel %vm304_vm9, %v2623_v26, %v2609_v34 }
 0x4fa   :  { %v3119_v5 = vsel %vm304_vm9, %v3118_v54, %v3083_v51  ;;  %2626 = vst [vmem:[#allocation3] sm:$0xf] %v2624_v47 }
 0x4fb   :  { %3127 = vst [vmem:[#allocation3 + $0x18] sm:$0xf] %v3119_v5 }
 0x4fc   :  { %v2573_v48 = vpop.permute.xlu1 %2572 }
 0x4fd   :  { %v2615_v27 = vsel %vm300_vm7, %v2614_v20, %v2573_v48 }
 0x500   :  { %v2829_v42 = vpop.permute.xlu1 %2828 }
 0x501   :  { %v2865_v38 = vsel %vm304_vm9, %v2864_v33, %v2829_v42  ;;  %v4573_v10 = vld [vmem:[#allocation3] sm:$0xff] }
 0x502   :  { %v2875_v50 = vrot.slane %v2865_v38, 4  ;;  %v4574_v31 = vld [vmem:[#allocation3 + $0x18] sm:$0xff] }
 0x503   :  { %4626 = vmatpush1.msra.mxu1 %v4574_v31 }
 0x504   :  { %2879 = vst [vmem:[#allocation3 + $0x30] sm:$0xf0] %v2875_v50  ;;  %v2577_v44 = vpop.permute.xlu1 %2576  ;;  %4627 = vmatprep.subr.mxu1 %v4573_v10 }
 0x505   :  { %v2616_v60 = vsel %vm302_vm8, %v2615_v27, %v2577_v44  ;;  %v4586_v9 = vpop.permute.xlu0 %4585 }
 0x508   :  { %v2581_v19 = vpop.permute.xlu1 %2580 }
 0x509   :  { %v2617_v8 = vsel %vm304_vm9, %v2616_v60, %v2581_v19 }
 0x50a   :  { %2625 = vst [vmem:[#allocation3 + $0x30] sm:$0xf] %v2617_v8 }
 0x511   :  { %v4572_v25 = vld [vmem:[#allocation3 + $0x30] sm:$0xff] }
 0x512   :  { %4628 = vmatpush1.msra.mxu1 %v4572_v25 }
 0x513   :  { %4695 = vmatmul.mubr.msk.f32.vlgmr.msra.gmra.mxu1 %vm2276_vm11, %v4571_v16 }
 0x5d3   :  { %v4663_v39 = vpop.f32.mrf.mxu1 }
 0x5d4   :  { %v4664_v62 = vadd.f32 %v4663_v39, %v4586_v9 }
 0x5d5   :  { %v4665_v63 = vpop.f32.mrf.mxu1 }
 0x5d6   :  { %v4668_v11 = vmax.f32 %v4664_v62, 0.0  ;;  %v4666_v29 = vadd.f32 %v4665_v63, %v4586_v9 }
 0x5d8   :  { %4671 = vst [vmem:[#allocation7 + $0x10] sm:$0xff] %v4668_v11  ;;  %v4669_v30 = vmax.f32 %v4666_v29, 0.0 }
 0x5da   :  { %4672 = vst [vmem:[#allocation7 + $0x18] sm:$0xff] %v4669_v30 }
 0x5db   :  { %4799 = shalt.err (!%p4796_p9)
}
 0x5dc   :  { %s4830_s1 = smov 256  }
 0x5dd   :  { %4684 = dma.vmem_to_hbm [thread:$0]  %s4679_s9, 512, %s7414_s3, [#allocation6], %s4830_s1, %s4830_s1, %s4824_s24  }
 0x5de   :  { %4810 = dma.done.wait [#allocation6], 512  }
 0x5df   :  { %4811 = vsyncadd [#allocation6], 4294966784 }
 0x5e0   :  { %4688 = vsyncpa [#allocation5], 1 }
 0x5e1   :  { %4689 = vsyncpa [#allocation6], 1 }

</bundles_post_ra>
